<compile_context>
chip_gen: v7x
topology: tpu7x:2x2x1
jax: 0.10.0
libtpu: 0.0.40
codegen_flags: <defaults>
</compile_context>

<pallas_src>
import functools

import numpy as np
import jax
import jax.numpy as jnp
from jax.experimental import pallas as pl
from jax.experimental.pallas import tpu as pltpu

N_FEAT = 96          # logical channel count of the PyTorch module
C_PAD = 128          # lane-dense padded channel count used by the kernels
BN_EPS = 1e-5
SUBLANE = 16         # bf16 sublane tile


def _geometry(H, W):
    Wp = W + 2
    Hp = H + 2
    M = H * Wp                         # rows of the full-width conv output
    lead = (-(Wp + 1)) % SUBLANE       # makes the interior window 16-aligned
    off = lead + Wp + 1                # flat index of interior pixel (0, 0)
    flat = lead + (Hp + 1) * Wp        # one extra zero row covers slice overrun
    return Wp, M, lead, off, flat


# ----------------------------------------------------------------------------
# Kernel A: conv1(3x3) + bias + ReLU, per-sample BN partial sums, and the
# halo-padded bf16 activation written directly (no XLA pad pass afterwards).
# ----------------------------------------------------------------------------
def _conv1_relu_stats_kernel(xp_ref, mask_ref, w_ref, b_ref,
                             yp_ref, s_ref, q_ref, col_ref, *, H, W, C, lead):
    Wp = W + 2
    M = H * Wp
    off = lead + Wp + 1
    flat = yp_ref.shape[1]

    # im2col: 9 contiguous "full-width shift" slices -> bf16 scratch columns.
    for k in range(9):
        dy, dx = k // 3, k % 3
        start = lead + dy * Wp + dx
        col_ref[:, k * C:(k + 1) * C] = (
            xp_ref[0, start:start + M, :].astype(jnp.bfloat16))

    # One big-K MXU matmul: (M, 9C) @ (9C, C), f32 accumulation.
    acc = jnp.dot(col_ref[...], w_ref[...], preferred_element_type=jnp.float32)
    y = jnp.maximum(acc + b_ref[...], 0.0) * mask_ref[...]   # ReLU, zero junk cols

    # Per-sample BN partial sums (f32; junk columns are exactly zero).
    s_ref[0] = jnp.sum(y, axis=0, keepdims=True)
    q_ref[0] = jnp.sum(y * y, axis=0, keepdims=True)

    # Halo-padded bf16 activation: zero the frame, then write the interior
    # window (window start `off` is 16-aligned -> unmasked bf16 stores).
    yp_ref[0] = jnp.zeros((flat, C), jnp.bfloat16)
    yp_ref[0, off:off + M, :] = y.astype(jnp.bfloat16)


# ----------------------------------------------------------------------------
# Kernel B: BatchNorm affine (interior only, zero halo) + conv2(3x3) + bias
# (+ folded residual scale `a`) + residual add.
# ----------------------------------------------------------------------------
def _conv2_bn_residual_kernel(yp_ref, xres_ref, mask_ref, scale_ref, shift_ref,
                              w_ref, b_ref, o_ref, zp_ref, col_ref,
                              *, H, W, C, lead):
    Wp = W + 2
    M = H * Wp
    off = lead + Wp + 1
    flat = zp_ref.shape[0]

    # BN affine on the interior only; halo frame stays exactly zero (matches
    # torch's zero padding of the BN output before conv2).
    y = yp_ref[0, off:off + M, :].astype(jnp.float32)
    z = (y * scale_ref[...] + shift_ref[...]) * mask_ref[...]
    zp_ref[...] = jnp.zeros((flat, C), jnp.bfloat16)
    zp_ref[off:off + M, :] = z.astype(jnp.bfloat16)

    # im2col over the normalized, halo-padded activation.
    for k in range(9):
        dy, dx = k // 3, k % 3
        start = lead + dy * Wp + dx
        col_ref[:, k * C:(k + 1) * C] = zp_ref[start:start + M, :]

    acc = jnp.dot(col_ref[...], w_ref[...], preferred_element_type=jnp.float32)
    # conv2 (with `a` folded into w/b) + bias + residual x (f32).
    o_ref[0] = acc + b_ref[...] + xres_ref[0, off:off + M, :]


# ----------------------------------------------------------------------------
# pallas_call wrappers
# ----------------------------------------------------------------------------
def conv1_relu_stats(xp, mask, w1, b1, *, H, W, lead):
    N, flat, C = xp.shape
    Wp = W + 2
    M = H * Wp
    kernel = functools.partial(_conv1_relu_stats_kernel, H=H, W=W, C=C, lead=lead)
    return pl.pallas_call(
        kernel,
        out_shape=(jax.ShapeDtypeStruct((N, flat, C), jnp.bfloat16),
                   jax.ShapeDtypeStruct((N, 1, C), jnp.float32),
                   jax.ShapeDtypeStruct((N, 1, C), jnp.float32)),
        grid_spec=pltpu.PrefetchScalarGridSpec(
            num_scalar_prefetch=0,
            grid=(N,),
            in_specs=[pl.BlockSpec((1, flat, C), lambda n: (n, 0, 0)),
                      pl.BlockSpec((M, 1), lambda n: (0, 0)),
                      pl.BlockSpec((9 * C, C), lambda n: (0, 0)),
                      pl.BlockSpec((1, C), lambda n: (0, 0))],
            out_specs=(pl.BlockSpec((1, flat, C), lambda n: (n, 0, 0)),
                       pl.BlockSpec((1, 1, C), lambda n: (n, 0, 0)),
                       pl.BlockSpec((1, 1, C), lambda n: (n, 0, 0))),
            scratch_shapes=[pltpu.VMEM((M, 9 * C), jnp.bfloat16)]),
        compiler_params=pltpu.CompilerParams(
            dimension_semantics=("parallel",)),
    )(xp, mask, w1, b1)


def conv2_bn_residual(yp, xres, mask, scale, shift, w2, b2, *, H, W, lead):
    N, flat, C = yp.shape
    Wp = W + 2
    M = H * Wp
    kernel = functools.partial(_conv2_bn_residual_kernel, H=H, W=W, C=C, lead=lead)
    return pl.pallas_call(
        kernel,
        out_shape=jax.ShapeDtypeStruct((N, M, C), jnp.float32),
        grid_spec=pltpu.PrefetchScalarGridSpec(
            num_scalar_prefetch=0,
            grid=(N,),
            in_specs=[pl.BlockSpec((1, flat, C), lambda n: (n, 0, 0)),
                      pl.BlockSpec((1, flat, C), lambda n: (n, 0, 0)),
                      pl.BlockSpec((M, 1), lambda n: (0, 0)),
                      pl.BlockSpec((1, C), lambda n: (0, 0)),
                      pl.BlockSpec((1, C), lambda n: (0, 0)),
                      pl.BlockSpec((9 * C, C), lambda n: (0, 0)),
                      pl.BlockSpec((1, C), lambda n: (0, 0))],
            out_specs=pl.BlockSpec((1, M, C), lambda n: (n, 0, 0)),
            scratch_shapes=[pltpu.VMEM((flat, C), jnp.bfloat16),
                            pltpu.VMEM((M, 9 * C), jnp.bfloat16)]),
        compiler_params=pltpu.CompilerParams(
            dimension_semantics=("parallel",)),
    )(yp, xres, mask, scale, shift, w2, b2)


# ----------------------------------------------------------------------------
# Parameters (synthetic init; torch (Cout,Cin,3,3) weights represented as
# (3,3,Cin,Cout), zero-padded to 128 channels and reshaped to (9*C, C)).
# ----------------------------------------------------------------------------
def init_params(key):
    k1, k2, k3, k4 = jax.random.split(key, 4)
    std = 1.0 / np.sqrt(9 * N_FEAT)
    pad_c = C_PAD - N_FEAT

    def conv_w(k):
        w = jax.random.normal(k, (3, 3, N_FEAT, N_FEAT), jnp.float32) * std
        w = jnp.pad(w, ((0, 0), (0, 0), (0, pad_c), (0, pad_c)))
        return w.reshape(9 * C_PAD, C_PAD)

    def conv_b(k):
        b = jax.random.normal(k, (1, N_FEAT), jnp.float32) * std
        return jnp.pad(b, ((0, 0), (0, pad_c)))

    gamma = jnp.pad(jnp.ones((1, N_FEAT), jnp.float32), ((0, 0), (0, pad_c)))
    beta = jnp.zeros((1, C_PAD), jnp.float32)
    return {
        "w1": conv_w(k1).astype(jnp.bfloat16),   # used as-is -> store bf16
        "b1": conv_b(k2),
        "w2": conv_w(k3),                        # f32; `a` folded + bf16 cast later
        "b2": conv_b(k4),
        "gamma": gamma,
        "beta": beta,
    }


# ----------------------------------------------------------------------------
# Forward pass (matches _Res_Block.forward: y = conv2(BN(relu(conv1(x))));
# y *= a; y += x).  BN uses training-mode batch statistics (biased variance).
# ----------------------------------------------------------------------------
def res_block_forward(x_nchw, params, a=1.0):
    N, Cin, H, W = x_nchw.shape
    C = C_PAD
    Wp, M, lead, _off, _flat = _geometry(H, W)

    # Layout plumbing (once per block): NCHW -> NHWC, channel pad to 128,
    # spatial halo pad, flatten spatial, 16-align the interior window.
    x = jnp.transpose(x_nchw, (0, 2, 3, 1)).astype(jnp.float32)
    x = jnp.pad(x, ((0, 0), (0, 0), (0, 0), (0, C - Cin)))
    xp = jnp.pad(x, ((0, 0), (1, 2), (1, 1), (0, 0)))          # (N, H+3, W+2, C)
    xp = xp.reshape(N, (H + 3) * Wp, C)
    xp = jnp.pad(xp, ((0, 0), (lead, 0), (0, 0)))              # (N, flat, C)

    # Valid-column mask for the full-width (shift-trick) conv output rows.
    mask = (jnp.arange(M, dtype=jnp.int32) % Wp < W)
    mask = mask.astype(jnp.float32).reshape(M, 1)

    # conv1 + bias + ReLU (+ per-sample BN partial sums), halo-padded bf16 out.
    yp, ssum, qsum = conv1_relu_stats(xp, mask, params["w1"], params["b1"],
                                      H=H, W=W, lead=lead)

    # Training-mode BatchNorm statistics over (N, H, W), biased variance.
    cnt = float(N * H * W)
    mean = jnp.sum(ssum, axis=0) / cnt                          # (1, C)
    var = jnp.maximum(jnp.sum(qsum, axis=0) / cnt - mean * mean, 0.0)
    scale = params["gamma"] * jax.lax.rsqrt(var + BN_EPS)
    shift = params["beta"] - mean * scale

    # Fold only the residual scale `a` into conv2 (BN is applied in-kernel).
    w2a = (params["w2"] * a).astype(jnp.bfloat16)
    b2a = params["b2"] * a

    out = conv2_bn_residual(yp, xp, mask, scale, shift, w2a, b2a,
                            H=H, W=W, lead=lead)                # (N, M, C) f32

    out = out.reshape(N, H, Wp, C)[:, :, :W, :Cin]              # drop junk cols/pad
    return jnp.transpose(out, (0, 3, 1, 2))                     # back to NCHW


# ----------------------------------------------------------------------------
# Pure-XLA f32 reference of the torch math (for a loose-tolerance sanity check;
# the Pallas kernels use bf16 MXU operands).
# ----------------------------------------------------------------------------
def reference_forward(x_nchw, params, a=1.0):
    C = N_FEAT
    w1 = params["w1"].astype(jnp.float32).reshape(3, 3, C_PAD, C_PAD)[:, :, :C, :C]
    w2 = params["w2"].reshape(3, 3, C_PAD, C_PAD)[:, :, :C, :C]
    b1 = params["b1"][0, :C]
    b2 = params["b2"][0, :C]
    gamma = params["gamma"][0, :C]
    beta = params["beta"][0, :C]
    x = jnp.transpose(x_nchw, (0, 2, 3, 1)).astype(jnp.float32)
    dn = jax.lax.conv_dimension_numbers(x.shape, w1.shape, ("NHWC", "HWIO", "NHWC"))
    y = jax.lax.conv_general_dilated(x, w1, (1, 1), ((1, 1), (1, 1)),
                                     dimension_numbers=dn) + b1
    y = jnp.maximum(y, 0.0)
    mean = jnp.mean(y, axis=(0, 1, 2))
    var = jnp.var(y, axis=(0, 1, 2))
    z = (y - mean) * jax.lax.rsqrt(var + BN_EPS) * gamma + beta
    o = jax.lax.conv_general_dilated(z, w2, (1, 1), ((1, 1), (1, 1)),
                                     dimension_numbers=dn) + b2
    o = o * a + x
    return jnp.transpose(o, (0, 3, 1, 2))


if __name__ == "__main__":
    key = jax.random.PRNGKey(0)
    kp, kx = jax.random.split(key)

    N, Cc, H, W = 2, N_FEAT, 16, 16
    params = init_params(kp)
    x = jax.random.normal(kx, (N, Cc, H, W), jnp.float32)

    fwd = jax.jit(functools.partial(res_block_forward, a=1.0))
    out = fwd(x, params)
    jax.block_until_ready(out)

    assert out.shape == (N, Cc, H, W), out.shape
    assert out.dtype == jnp.float32
    assert bool(jnp.all(jnp.isfinite(out)))

    # Loose-tolerance check vs. the f32 XLA reference (bf16 MXU in the kernels).
    ref = reference_forward(x, params, a=1.0)
    np.testing.assert_allclose(np.asarray(out), np.asarray(ref),
                               rtol=1e-1, atol=1e-1)
    print("KERNEL_OK")
</pallas_src>

<mosaic_0001>
module attributes {stable_mosaic.version = 11 : i64} {
  func.func @_conv1_relu_stats_kernel(%arg0: i32, %arg1: memref<1x355x128xf32, #tpu.memory_space<vmem>>, %arg2: memref<288x1xf32, #tpu.memory_space<vmem>>, %arg3: memref<1152x128xbf16, #tpu.memory_space<vmem>>, %arg4: memref<1x128xf32, #tpu.memory_space<vmem>>, %arg5: memref<1x355x128xbf16, #tpu.memory_space<vmem>>, %arg6: memref<1x1x128xf32, #tpu.memory_space<vmem>>, %arg7: memref<1x1x128xf32, #tpu.memory_space<vmem>>, %arg8: memref<288x1152xbf16, #tpu.memory_space<vmem>>) attributes {dimension_semantics = [#tpu.dimension_semantics<parallel>], iteration_bounds = array<i64: 2>, scalar_prefetch = 0 : i64, scratch_operands = 1 : i64, tpu.core_type = #tpu.core_type<tc>, window_params = [{transform_indices = @transform_0, window_bounds = array<i64: 1, 355, 128>}, {pipeline_mode = #tpu.pipeline_mode<synchronous>, transform_indices = @transform_1, window_bounds = array<i64: 288, 1>}, {pipeline_mode = #tpu.pipeline_mode<synchronous>, transform_indices = @transform_2, window_bounds = array<i64: 1152, 128>}, {pipeline_mode = #tpu.pipeline_mode<synchronous>, transform_indices = @transform_3, window_bounds = array<i64: 1, 128>}, {transform_indices = @transform_4, window_bounds = array<i64: 1, 355, 128>}, {transform_indices = @transform_5, window_bounds = array<i64: 1, 1, 128>}, {transform_indices = @transform_6, window_bounds = array<i64: 1, 1, 128>}]} {
    %c0 = arith.constant 0 : index
    %c13 = arith.constant 13 : index
    %c0_0 = arith.constant 0 : index
    %0 = vector.load %arg1[%c0, %c13, %c0_0] : memref<1x355x128xf32, #tpu.memory_space<vmem>>, vector<1x288x128xf32>
    %1 = vector.shape_cast %0 : vector<1x288x128xf32> to vector<288x128xf32>
    %2 = arith.truncf %1 : vector<288x128xf32> to vector<288x128xbf16>
    %c0_1 = arith.constant 0 : index
    %c0_2 = arith.constant 0 : index
    %3 = vector.load %arg8[%c0_1, %c0_2] : memref<288x1152xbf16, #tpu.memory_space<vmem>>, vector<288x128xbf16>
    tpu.vector_store %arg8[%c0_1, %c0_2], %2 {strides = array<i32>} : memref<288x1152xbf16, #tpu.memory_space<vmem>>, vector<288x128xbf16>,
    %c0_3 = arith.constant 0 : index
    %c14 = arith.constant 14 : index
    %c0_4 = arith.constant 0 : index
    %4 = vector.load %arg1[%c0_3, %c14, %c0_4] : memref<1x355x128xf32, #tpu.memory_space<vmem>>, vector<1x288x128xf32>
    %5 = vector.shape_cast %4 : vector<1x288x128xf32> to vector<288x128xf32>
    %6 = arith.truncf %5 : vector<288x128xf32> to vector<288x128xbf16>
    %c0_5 = arith.constant 0 : index
    %c128 = arith.constant 128 : index
    %7 = vector.load %arg8[%c0_5, %c128] : memref<288x1152xbf16, #tpu.memory_space<vmem>>, vector<288x128xbf16>
    tpu.vector_store %arg8[%c0_5, %c128], %6 {strides = array<i32>} : memref<288x1152xbf16, #tpu.memory_space<vmem>>, vector<288x128xbf16>,
    %c0_6 = arith.constant 0 : index
    %c15 = arith.constant 15 : index
    %c0_7 = arith.constant 0 : index
    %8 = vector.load %arg1[%c0_6, %c15, %c0_7] : memref<1x355x128xf32, #tpu.memory_space<vmem>>, vector<1x288x128xf32>
    %9 = vector.shape_cast %8 : vector<1x288x128xf32> to vector<288x128xf32>
    %10 = arith.truncf %9 : vector<288x128xf32> to vector<288x128xbf16>
    %c0_8 = arith.constant 0 : index
    %c256 = arith.constant 256 : index
    %11 = vector.load %arg8[%c0_8, %c256] : memref<288x1152xbf16, #tpu.memory_space<vmem>>, vector<288x128xbf16>
    tpu.vector_store %arg8[%c0_8, %c256], %10 {strides = array<i32>} : memref<288x1152xbf16, #tpu.memory_space<vmem>>, vector<288x128xbf16>,
    %c0_9 = arith.constant 0 : index
    %c31 = arith.constant 31 : index
    %c0_10 = arith.constant 0 : index
    %12 = vector.load %arg1[%c0_9, %c31, %c0_10] : memref<1x355x128xf32, #tpu.memory_space<vmem>>, vector<1x288x128xf32>
    %13 = vector.shape_cast %12 : vector<1x288x128xf32> to vector<288x128xf32>
    %14 = arith.truncf %13 : vector<288x128xf32> to vector<288x128xbf16>
    %c0_11 = arith.constant 0 : index
    %c384 = arith.constant 384 : index
    %15 = vector.load %arg8[%c0_11, %c384] : memref<288x1152xbf16, #tpu.memory_space<vmem>>, vector<288x128xbf16>
    tpu.vector_store %arg8[%c0_11, %c384], %14 {strides = array<i32>} : memref<288x1152xbf16, #tpu.memory_space<vmem>>, vector<288x128xbf16>,
    %c0_12 = arith.constant 0 : index
    %c32 = arith.constant 32 : index
    %c0_13 = arith.constant 0 : index
    %16 = vector.load %arg1[%c0_12, %c32, %c0_13] : memref<1x355x128xf32, #tpu.memory_space<vmem>>, vector<1x288x128xf32>
    %17 = vector.shape_cast %16 : vector<1x288x128xf32> to vector<288x128xf32>
    %18 = arith.truncf %17 : vector<288x128xf32> to vector<288x128xbf16>
    %c0_14 = arith.constant 0 : index
    %c512 = arith.constant 512 : index
    %19 = vector.load %arg8[%c0_14, %c512] : memref<288x1152xbf16, #tpu.memory_space<vmem>>, vector<288x128xbf16>
    tpu.vector_store %arg8[%c0_14, %c512], %18 {strides = array<i32>} : memref<288x1152xbf16, #tpu.memory_space<vmem>>, vector<288x128xbf16>,
    %c0_15 = arith.constant 0 : index
    %c33 = arith.constant 33 : index
    %c0_16 = arith.constant 0 : index
    %20 = vector.load %arg1[%c0_15, %c33, %c0_16] : memref<1x355x128xf32, #tpu.memory_space<vmem>>, vector<1x288x128xf32>
    %21 = vector.shape_cast %20 : vector<1x288x128xf32> to vector<288x128xf32>
    %22 = arith.truncf %21 : vector<288x128xf32> to vector<288x128xbf16>
    %c0_17 = arith.constant 0 : index
    %c640 = arith.constant 640 : index
    %23 = vector.load %arg8[%c0_17, %c640] : memref<288x1152xbf16, #tpu.memory_space<vmem>>, vector<288x128xbf16>
    tpu.vector_store %arg8[%c0_17, %c640], %22 {strides = array<i32>} : memref<288x1152xbf16, #tpu.memory_space<vmem>>, vector<288x128xbf16>,
    %c0_18 = arith.constant 0 : index
    %c49 = arith.constant 49 : index
    %c0_19 = arith.constant 0 : index
    %24 = vector.load %arg1[%c0_18, %c49, %c0_19] : memref<1x355x128xf32, #tpu.memory_space<vmem>>, vector<1x288x128xf32>
    %25 = vector.shape_cast %24 : vector<1x288x128xf32> to vector<288x128xf32>
    %26 = arith.truncf %25 : vector<288x128xf32> to vector<288x128xbf16>
    %c0_20 = arith.constant 0 : index
    %c768 = arith.constant 768 : index
    %27 = vector.load %arg8[%c0_20, %c768] : memref<288x1152xbf16, #tpu.memory_space<vmem>>, vector<288x128xbf16>
    tpu.vector_store %arg8[%c0_20, %c768], %26 {strides = array<i32>} : memref<288x1152xbf16, #tpu.memory_space<vmem>>, vector<288x128xbf16>,
    %c0_21 = arith.constant 0 : index
    %c50 = arith.constant 50 : index
    %c0_22 = arith.constant 0 : index
    %28 = vector.load %arg1[%c0_21, %c50, %c0_22] : memref<1x355x128xf32, #tpu.memory_space<vmem>>, vector<1x288x128xf32>
    %29 = vector.shape_cast %28 : vector<1x288x128xf32> to vector<288x128xf32>
    %30 = arith.truncf %29 : vector<288x128xf32> to vector<288x128xbf16>
    %c0_23 = arith.constant 0 : index
    %c896 = arith.constant 896 : index
    %31 = vector.load %arg8[%c0_23, %c896] : memref<288x1152xbf16, #tpu.memory_space<vmem>>, vector<288x128xbf16>
    tpu.vector_store %arg8[%c0_23, %c896], %30 {strides = array<i32>} : memref<288x1152xbf16, #tpu.memory_space<vmem>>, vector<288x128xbf16>,
    %c0_24 = arith.constant 0 : index
    %c51 = arith.constant 51 : index
    %c0_25 = arith.constant 0 : index
    %32 = vector.load %arg1[%c0_24, %c51, %c0_25] : memref<1x355x128xf32, #tpu.memory_space<vmem>>, vector<1x288x128xf32>
    %33 = vector.shape_cast %32 : vector<1x288x128xf32> to vector<288x128xf32>
    %34 = arith.truncf %33 : vector<288x128xf32> to vector<288x128xbf16>
    %c0_26 = arith.constant 0 : index
    %c1024 = arith.constant 1024 : index
    %35 = vector.load %arg8[%c0_26, %c1024] : memref<288x1152xbf16, #tpu.memory_space<vmem>>, vector<288x128xbf16>
    tpu.vector_store %arg8[%c0_26, %c1024], %34 {strides = array<i32>} : memref<288x1152xbf16, #tpu.memory_space<vmem>>, vector<288x128xbf16>,
    %c0_27 = arith.constant 0 : index
    %c0_28 = arith.constant 0 : index
    %36 = vector.load %arg8[%c0_27, %c0_28] : memref<288x1152xbf16, #tpu.memory_space<vmem>>, vector<288x1152xbf16>
    %c0_29 = arith.constant 0 : index
    %c0_30 = arith.constant 0 : index
    %37 = vector.load %arg3[%c0_29, %c0_30] : memref<1152x128xbf16, #tpu.memory_space<vmem>>, vector<1152x128xbf16>
    %cst = arith.constant dense<0.000000e+00> : vector<288x128xf32>
    %38 = tpu.matmul %36, %37, %cst {dimension_numbers = #tpu.dot_dimension_numbers<[1], [0], [0], [1], [0, 0, 1, 1], [], []>} : vector<288x1152xbf16>, vector<1152x128xbf16>, vector<288x128xf32> -> vector<288x128xf32>
    %c0_31 = arith.constant 0 : index
    %c0_32 = arith.constant 0 : index
    %39 = vector.load %arg4[%c0_31, %c0_32] : memref<1x128xf32, #tpu.memory_space<vmem>>, vector<1x128xf32>
    %40 = vector.broadcast %39 : vector<1x128xf32> to vector<288x128xf32>
    %41 = arith.addf %38, %40 : vector<288x128xf32>
    %cst_33 = arith.constant 0.000000e+00 : f32
    %42 = vector.broadcast %cst_33 : f32 to vector<288x128xf32>
    %43 = arith.maximumf %41, %42 : vector<288x128xf32>
    %c0_34 = arith.constant 0 : index
    %c0_35 = arith.constant 0 : index
    %44 = vector.load %arg2[%c0_34, %c0_35] : memref<288x1xf32, #tpu.memory_space<vmem>>, vector<288x1xf32>
    %45 = vector.broadcast %44 : vector<288x1xf32> to vector<288x128xf32>
    %46 = arith.mulf %43, %45 : vector<288x128xf32>
    %cst_36 = arith.constant dense<0.000000e+00> : vector<128xf32>
    %47 = vector.multi_reduction <add>, %46, %cst_36 [0] : vector<288x128xf32> to vector<128xf32>
    %48 = vector.shape_cast %47 : vector<128xf32> to vector<1x128xf32>
    %c0_37 = arith.constant 0 : index
    %c0_38 = arith.constant 0 : index
    %c0_39 = arith.constant 0 : index
    %49 = vector.load %arg6[%c0_37, %c0_38, %c0_39] : memref<1x1x128xf32, #tpu.memory_space<vmem>>, vector<1x1x128xf32>
    %50 = vector.shape_cast %49 : vector<1x1x128xf32> to vector<1x128xf32>
    %51 = vector.shape_cast %48 : vector<1x128xf32> to vector<1x1x128xf32>
    tpu.vector_store %arg6[%c0_37, %c0_38, %c0_39], %51 {strides = array<i32>} : memref<1x1x128xf32, #tpu.memory_space<vmem>>, vector<1x1x128xf32>,
    %52 = arith.mulf %46, %46 : vector<288x128xf32>
    %cst_40 = arith.constant dense<0.000000e+00> : vector<128xf32>
    %53 = vector.multi_reduction <add>, %52, %cst_40 [0] : vector<288x128xf32> to vector<128xf32>
    %54 = vector.shape_cast %53 : vector<128xf32> to vector<1x128xf32>
    %c0_41 = arith.constant 0 : index
    %c0_42 = arith.constant 0 : index
    %c0_43 = arith.constant 0 : index
    %55 = vector.load %arg7[%c0_41, %c0_42, %c0_43] : memref<1x1x128xf32, #tpu.memory_space<vmem>>, vector<1x1x128xf32>
    %56 = vector.shape_cast %55 : vector<1x1x128xf32> to vector<1x128xf32>
    %57 = vector.shape_cast %54 : vector<1x128xf32> to vector<1x1x128xf32>
    tpu.vector_store %arg7[%c0_41, %c0_42, %c0_43], %57 {strides = array<i32>} : memref<1x1x128xf32, #tpu.memory_space<vmem>>, vector<1x1x128xf32>,
    %cst_44 = arith.constant 0.000000e+00 : bf16
    %58 = vector.broadcast %cst_44 : bf16 to vector<355x128xbf16>
    %c0_45 = arith.constant 0 : index
    %c0_46 = arith.constant 0 : index
    %c0_47 = arith.constant 0 : index
    %59 = vector.load %arg5[%c0_45, %c0_46, %c0_47] : memref<1x355x128xbf16, #tpu.memory_space<vmem>>, vector<1x355x128xbf16>
    %60 = vector.shape_cast %59 : vector<1x355x128xbf16> to vector<355x128xbf16>
    %61 = vector.shape_cast %58 : vector<355x128xbf16> to vector<1x355x128xbf16>
    tpu.vector_store %arg5[%c0_45, %c0_46, %c0_47], %61 {strides = array<i32>} : memref<1x355x128xbf16, #tpu.memory_space<vmem>>, vector<1x355x128xbf16>,
    %62 = arith.truncf %46 : vector<288x128xf32> to vector<288x128xbf16>
    %c0_48 = arith.constant 0 : index
    %c32_49 = arith.constant 32 : index
    %c0_50 = arith.constant 0 : index
    %63 = vector.load %arg5[%c0_48, %c32_49, %c0_50] : memref<1x355x128xbf16, #tpu.memory_space<vmem>>, vector<1x288x128xbf16>
    %64 = vector.shape_cast %63 : vector<1x288x128xbf16> to vector<288x128xbf16>
    %65 = vector.shape_cast %62 : vector<288x128xbf16> to vector<1x288x128xbf16>
    tpu.vector_store %arg5[%c0_48, %c32_49, %c0_50], %65 {strides = array<i32>} : memref<1x355x128xbf16, #tpu.memory_space<vmem>>, vector<1x288x128xbf16>,
    return
  }
  func.func @transform_0(%arg0: i32) -> (i32, i32, i32) {
    %c0_i32 = arith.constant 0 : i32
    %c0_i32_0 = arith.constant 0 : i32
    %c0_i32_1 = arith.constant 0 : i32
    return %arg0, %c0_i32, %c0_i32_0 : i32, i32, i32
  }
  func.func @transform_1(%arg0: i32) -> (i32, i32) {
    %c0_i32 = arith.constant 0 : i32
    %c0_i32_0 = arith.constant 0 : i32
    %c0_i32_1 = arith.constant 0 : i32
    return %c0_i32, %c0_i32_0 : i32, i32
  }
  func.func @transform_2(%arg0: i32) -> (i32, i32) {
    %c0_i32 = arith.constant 0 : i32
    %c0_i32_0 = arith.constant 0 : i32
    %c0_i32_1 = arith.constant 0 : i32
    return %c0_i32, %c0_i32_0 : i32, i32
  }
  func.func @transform_3(%arg0: i32) -> (i32, i32) {
    %c0_i32 = arith.constant 0 : i32
    %c0_i32_0 = arith.constant 0 : i32
    %c0_i32_1 = arith.constant 0 : i32
    return %c0_i32, %c0_i32_0 : i32, i32
  }
  func.func @transform_4(%arg0: i32) -> (i32, i32, i32) {
    %c0_i32 = arith.constant 0 : i32
    %c0_i32_0 = arith.constant 0 : i32
    %c0_i32_1 = arith.constant 0 : i32
    return %arg0, %c0_i32, %c0_i32_0 : i32, i32, i32
  }
  func.func @transform_5(%arg0: i32) -> (i32, i32, i32) {
    %c0_i32 = arith.constant 0 : i32
    %c0_i32_0 = arith.constant 0 : i32
    %c0_i32_1 = arith.constant 0 : i32
    return %arg0, %c0_i32, %c0_i32_0 : i32, i32, i32
  }
  func.func @transform_6(%arg0: i32) -> (i32, i32, i32) {
    %c0_i32 = arith.constant 0 : i32
    %c0_i32_0 = arith.constant 0 : i32
    %c0_i32_1 = arith.constant 0 : i32
    return %arg0, %c0_i32, %c0_i32_0 : i32, i32, i32
  }
}

module attributes {stable_mosaic.version = 11 : i64} {
  func.func @_conv2_bn_residual_kernel(%arg0: i32, %arg1: memref<1x355x128xbf16, #tpu.memory_space<vmem>>, %arg2: memref<1x355x128xf32, #tpu.memory_space<vmem>>, %arg3: memref<288x1xf32, #tpu.memory_space<vmem>>, %arg4: memref<1x128xf32, #tpu.memory_space<vmem>>, %arg5: memref<1x128xf32, #tpu.memory_space<vmem>>, %arg6: memref<1152x128xbf16, #tpu.memory_space<vmem>>, %arg7: memref<1x128xf32, #tpu.memory_space<vmem>>, %arg8: memref<1x288x128xf32, #tpu.memory_space<vmem>>, %arg9: memref<355x128xbf16, #tpu.memory_space<vmem>>, %arg10: memref<288x1152xbf16, #tpu.memory_space<vmem>>) attributes {dimension_semantics = [#tpu.dimension_semantics<parallel>], iteration_bounds = array<i64: 2>, scalar_prefetch = 0 : i64, scratch_operands = 2 : i64, tpu.core_type = #tpu.core_type<tc>, window_params = [{transform_indices = @transform_0, window_bounds = array<i64: 1, 355, 128>}, {transform_indices = @transform_1, window_bounds = array<i64: 1, 355, 128>}, {pipeline_mode = #tpu.pipeline_mode<synchronous>, transform_indices = @transform_2, window_bounds = array<i64: 288, 1>}, {pipeline_mode = #tpu.pipeline_mode<synchronous>, transform_indices = @transform_3, window_bounds = array<i64: 1, 128>}, {pipeline_mode = #tpu.pipeline_mode<synchronous>, transform_indices = @transform_4, window_bounds = array<i64: 1, 128>}, {pipeline_mode = #tpu.pipeline_mode<synchronous>, transform_indices = @transform_5, window_bounds = array<i64: 1152, 128>}, {pipeline_mode = #tpu.pipeline_mode<synchronous>, transform_indices = @transform_6, window_bounds = array<i64: 1, 128>}, {transform_indices = @transform_7, window_bounds = array<i64: 1, 288, 128>}]} {
    %c0 = arith.constant 0 : index
    %c32 = arith.constant 32 : index
    %c0_0 = arith.constant 0 : index
    %0 = vector.load %arg1[%c0, %c32, %c0_0] : memref<1x355x128xbf16, #tpu.memory_space<vmem>>, vector<1x288x128xbf16>
    %1 = vector.shape_cast %0 : vector<1x288x128xbf16> to vector<288x128xbf16>
    %2 = arith.extf %1 : vector<288x128xbf16> to vector<288x128xf32>
    %c0_1 = arith.constant 0 : index
    %c0_2 = arith.constant 0 : index
    %3 = vector.load %arg4[%c0_1, %c0_2] : memref<1x128xf32, #tpu.memory_space<vmem>>, vector<1x128xf32>
    %4 = vector.broadcast %3 : vector<1x128xf32> to vector<288x128xf32>
    %5 = arith.mulf %2, %4 : vector<288x128xf32>
    %c0_3 = arith.constant 0 : index
    %c0_4 = arith.constant 0 : index
    %6 = vector.load %arg5[%c0_3, %c0_4] : memref<1x128xf32, #tpu.memory_space<vmem>>, vector<1x128xf32>
    %7 = vector.broadcast %6 : vector<1x128xf32> to vector<288x128xf32>
    %8 = arith.addf %5, %7 : vector<288x128xf32>
    %c0_5 = arith.constant 0 : index
    %c0_6 = arith.constant 0 : index
    %9 = vector.load %arg3[%c0_5, %c0_6] : memref<288x1xf32, #tpu.memory_space<vmem>>, vector<288x1xf32>
    %10 = vector.broadcast %9 : vector<288x1xf32> to vector<288x128xf32>
    %11 = arith.mulf %8, %10 : vector<288x128xf32>
    %cst = arith.constant 0.000000e+00 : bf16
    %12 = vector.broadcast %cst : bf16 to vector<355x128xbf16>
    %c0_7 = arith.constant 0 : index
    %c0_8 = arith.constant 0 : index
    %13 = vector.load %arg9[%c0_7, %c0_8] : memref<355x128xbf16, #tpu.memory_space<vmem>>, vector<355x128xbf16>
    tpu.vector_store %arg9[%c0_7, %c0_8], %12 {strides = array<i32>} : memref<355x128xbf16, #tpu.memory_space<vmem>>, vector<355x128xbf16>,
    %14 = arith.truncf %11 : vector<288x128xf32> to vector<288x128xbf16>
    %c32_9 = arith.constant 32 : index
    %c0_10 = arith.constant 0 : index
    %15 = vector.load %arg9[%c32_9, %c0_10] : memref<355x128xbf16, #tpu.memory_space<vmem>>, vector<288x128xbf16>
    tpu.vector_store %arg9[%c32_9, %c0_10], %14 {strides = array<i32>} : memref<355x128xbf16, #tpu.memory_space<vmem>>, vector<288x128xbf16>,
    %c13 = arith.constant 13 : index
    %c0_11 = arith.constant 0 : index
    %16 = vector.load %arg9[%c13, %c0_11] : memref<355x128xbf16, #tpu.memory_space<vmem>>, vector<288x128xbf16>
    %c0_12 = arith.constant 0 : index
    %c0_13 = arith.constant 0 : index
    %17 = vector.load %arg10[%c0_12, %c0_13] : memref<288x1152xbf16, #tpu.memory_space<vmem>>, vector<288x128xbf16>
    tpu.vector_store %arg10[%c0_12, %c0_13], %16 {strides = array<i32>} : memref<288x1152xbf16, #tpu.memory_space<vmem>>, vector<288x128xbf16>,
    %c14 = arith.constant 14 : index
    %c0_14 = arith.constant 0 : index
    %18 = vector.load %arg9[%c14, %c0_14] : memref<355x128xbf16, #tpu.memory_space<vmem>>, vector<288x128xbf16>
    %c0_15 = arith.constant 0 : index
    %c128 = arith.constant 128 : index
    %19 = vector.load %arg10[%c0_15, %c128] : memref<288x1152xbf16, #tpu.memory_space<vmem>>, vector<288x128xbf16>
    tpu.vector_store %arg10[%c0_15, %c128], %18 {strides = array<i32>} : memref<288x1152xbf16, #tpu.memory_space<vmem>>, vector<288x128xbf16>,
    %c15 = arith.constant 15 : index
    %c0_16 = arith.constant 0 : index
    %20 = vector.load %arg9[%c15, %c0_16] : memref<355x128xbf16, #tpu.memory_space<vmem>>, vector<288x128xbf16>
    %c0_17 = arith.constant 0 : index
    %c256 = arith.constant 256 : index
    %21 = vector.load %arg10[%c0_17, %c256] : memref<288x1152xbf16, #tpu.memory_space<vmem>>, vector<288x128xbf16>
    tpu.vector_store %arg10[%c0_17, %c256], %20 {strides = array<i32>} : memref<288x1152xbf16, #tpu.memory_space<vmem>>, vector<288x128xbf16>,
    %c31 = arith.constant 31 : index
    %c0_18 = arith.constant 0 : index
    %22 = vector.load %arg9[%c31, %c0_18] : memref<355x128xbf16, #tpu.memory_space<vmem>>, vector<288x128xbf16>
    %c0_19 = arith.constant 0 : index
    %c384 = arith.constant 384 : index
    %23 = vector.load %arg10[%c0_19, %c384] : memref<288x1152xbf16, #tpu.memory_space<vmem>>, vector<288x128xbf16>
    tpu.vector_store %arg10[%c0_19, %c384], %22 {strides = array<i32>} : memref<288x1152xbf16, #tpu.memory_space<vmem>>, vector<288x128xbf16>,
    %c32_20 = arith.constant 32 : index
    %c0_21 = arith.constant 0 : index
    %24 = vector.load %arg9[%c32_20, %c0_21] : memref<355x128xbf16, #tpu.memory_space<vmem>>, vector<288x128xbf16>
    %c0_22 = arith.constant 0 : index
    %c512 = arith.constant 512 : index
    %25 = vector.load %arg10[%c0_22, %c512] : memref<288x1152xbf16, #tpu.memory_space<vmem>>, vector<288x128xbf16>
    tpu.vector_store %arg10[%c0_22, %c512], %24 {strides = array<i32>} : memref<288x1152xbf16, #tpu.memory_space<vmem>>, vector<288x128xbf16>,
    %c33 = arith.constant 33 : index
    %c0_23 = arith.constant 0 : index
    %26 = vector.load %arg9[%c33, %c0_23] : memref<355x128xbf16, #tpu.memory_space<vmem>>, vector<288x128xbf16>
    %c0_24 = arith.constant 0 : index
    %c640 = arith.constant 640 : index
    %27 = vector.load %arg10[%c0_24, %c640] : memref<288x1152xbf16, #tpu.memory_space<vmem>>, vector<288x128xbf16>
    tpu.vector_store %arg10[%c0_24, %c640], %26 {strides = array<i32>} : memref<288x1152xbf16, #tpu.memory_space<vmem>>, vector<288x128xbf16>,
    %c49 = arith.constant 49 : index
    %c0_25 = arith.constant 0 : index
    %28 = vector.load %arg9[%c49, %c0_25] : memref<355x128xbf16, #tpu.memory_space<vmem>>, vector<288x128xbf16>
    %c0_26 = arith.constant 0 : index
    %c768 = arith.constant 768 : index
    %29 = vector.load %arg10[%c0_26, %c768] : memref<288x1152xbf16, #tpu.memory_space<vmem>>, vector<288x128xbf16>
    tpu.vector_store %arg10[%c0_26, %c768], %28 {strides = array<i32>} : memref<288x1152xbf16, #tpu.memory_space<vmem>>, vector<288x128xbf16>,
    %c50 = arith.constant 50 : index
    %c0_27 = arith.constant 0 : index
    %30 = vector.load %arg9[%c50, %c0_27] : memref<355x128xbf16, #tpu.memory_space<vmem>>, vector<288x128xbf16>
    %c0_28 = arith.constant 0 : index
    %c896 = arith.constant 896 : index
    %31 = vector.load %arg10[%c0_28, %c896] : memref<288x1152xbf16, #tpu.memory_space<vmem>>, vector<288x128xbf16>
    tpu.vector_store %arg10[%c0_28, %c896], %30 {strides = array<i32>} : memref<288x1152xbf16, #tpu.memory_space<vmem>>, vector<288x128xbf16>,
    %c51 = arith.constant 51 : index
    %c0_29 = arith.constant 0 : index
    %32 = vector.load %arg9[%c51, %c0_29] : memref<355x128xbf16, #tpu.memory_space<vmem>>, vector<288x128xbf16>
    %c0_30 = arith.constant 0 : index
    %c1024 = arith.constant 1024 : index
    %33 = vector.load %arg10[%c0_30, %c1024] : memref<288x1152xbf16, #tpu.memory_space<vmem>>, vector<288x128xbf16>
    tpu.vector_store %arg10[%c0_30, %c1024], %32 {strides = array<i32>} : memref<288x1152xbf16, #tpu.memory_space<vmem>>, vector<288x128xbf16>,
    %c0_31 = arith.constant 0 : index
    %c0_32 = arith.constant 0 : index
    %34 = vector.load %arg10[%c0_31, %c0_32] : memref<288x1152xbf16, #tpu.memory_space<vmem>>, vector<288x1152xbf16>
    %c0_33 = arith.constant 0 : index
    %c0_34 = arith.constant 0 : index
    %35 = vector.load %arg6[%c0_33, %c0_34] : memref<1152x128xbf16, #tpu.memory_space<vmem>>, vector<1152x128xbf16>
    %cst_35 = arith.constant dense<0.000000e+00> : vector<288x128xf32>
    %36 = tpu.matmul %34, %35, %cst_35 {dimension_numbers = #tpu.dot_dimension_numbers<[1], [0], [0], [1], [0, 0, 1, 1], [], []>} : vector<288x1152xbf16>, vector<1152x128xbf16>, vector<288x128xf32> -> vector<288x128xf32>
    %c0_36 = arith.constant 0 : index
    %c0_37 = arith.constant 0 : index
    %37 = vector.load %arg7[%c0_36, %c0_37] : memref<1x128xf32, #tpu.memory_space<vmem>>, vector<1x128xf32>
    %38 = vector.broadcast %37 : vector<1x128xf32> to vector<288x128xf32>
    %39 = arith.addf %36, %38 : vector<288x128xf32>
    %c0_38 = arith.constant 0 : index
    %c32_39 = arith.constant 32 : index
    %c0_40 = arith.constant 0 : index
    %40 = vector.load %arg2[%c0_38, %c32_39, %c0_40] : memref<1x355x128xf32, #tpu.memory_space<vmem>>, vector<1x288x128xf32>
    %41 = vector.shape_cast %40 : vector<1x288x128xf32> to vector<288x128xf32>
    %42 = arith.addf %39, %41 : vector<288x128xf32>
    %c0_41 = arith.constant 0 : index
    %c0_42 = arith.constant 0 : index
    %c0_43 = arith.constant 0 : index
    %43 = vector.load %arg8[%c0_41, %c0_42, %c0_43] : memref<1x288x128xf32, #tpu.memory_space<vmem>>, vector<1x288x128xf32>
    %44 = vector.shape_cast %43 : vector<1x288x128xf32> to vector<288x128xf32>
    %45 = vector.shape_cast %42 : vector<288x128xf32> to vector<1x288x128xf32>
    tpu.vector_store %arg8[%c0_41, %c0_42, %c0_43], %45 {strides = array<i32>} : memref<1x288x128xf32, #tpu.memory_space<vmem>>, vector<1x288x128xf32>,
    return
  }
  func.func @transform_0(%arg0: i32) -> (i32, i32, i32) {
    %c0_i32 = arith.constant 0 : i32
    %c0_i32_0 = arith.constant 0 : i32
    %c0_i32_1 = arith.constant 0 : i32
    return %arg0, %c0_i32, %c0_i32_0 : i32, i32, i32
  }
  func.func @transform_1(%arg0: i32) -> (i32, i32, i32) {
    %c0_i32 = arith.constant 0 : i32
    %c0_i32_0 = arith.constant 0 : i32
    %c0_i32_1 = arith.constant 0 : i32
    return %arg0, %c0_i32, %c0_i32_0 : i32, i32, i32
  }
  func.func @transform_2(%arg0: i32) -> (i32, i32) {
    %c0_i32 = arith.constant 0 : i32
    %c0_i32_0 = arith.constant 0 : i32
    %c0_i32_1 = arith.constant 0 : i32
    return %c0_i32, %c0_i32_0 : i32, i32
  }
  func.func @transform_3(%arg0: i32) -> (i32, i32) {
    %c0_i32 = arith.constant 0 : i32
    %c0_i32_0 = arith.constant 0 : i32
    %c0_i32_1 = arith.constant 0 : i32
    return %c0_i32, %c0_i32_0 : i32, i32
  }
  func.func @transform_4(%arg0: i32) -> (i32, i32) {
    %c0_i32 = arith.constant 0 : i32
    %c0_i32_0 = arith.constant 0 : i32
    %c0_i32_1 = arith.constant 0 : i32
    return %c0_i32, %c0_i32_0 : i32, i32
  }
  func.func @transform_5(%arg0: i32) -> (i32, i32) {
    %c0_i32 = arith.constant 0 : i32
    %c0_i32_0 = arith.constant 0 : i32
    %c0_i32_1 = arith.constant 0 : i32
    return %c0_i32, %c0_i32_0 : i32, i32
  }
  func.func @transform_6(%arg0: i32) -> (i32, i32) {
    %c0_i32 = arith.constant 0 : i32
    %c0_i32_0 = arith.constant 0 : i32
    %c0_i32_1 = arith.constant 0 : i32
    return %c0_i32, %c0_i32_0 : i32, i32
  }
  func.func @transform_7(%arg0: i32) -> (i32, i32, i32) {
    %c0_i32 = arith.constant 0 : i32
    %c0_i32_0 = arith.constant 0 : i32
    %c0_i32_1 = arith.constant 0 : i32
    return %arg0, %c0_i32, %c0_i32_0 : i32, i32, i32
  }
}

</mosaic_0001>

<bundles_post_ra>
// kernel: res_block_forward.2
= control target key start
LH: loop header
LB: loop body
LE: loop exit
PB: predicated region body
PF: predicated region fallthrough
CT: control target
= control target key end

     0   :  { %s3982_s21 = smov 0   ;;  %s5492_s0 = inlined_call_operand.vmem [shape: f32[2,355,128], index: 0, kind: input, shape index: {}]   ;;  %s5493_s1 = inlined_call_operand.vmem [shape: f32[288,1], index: 1, kind: input, shape index: {}]   ;;  %s5494_s2 = inlined_call_operand.vmem [shape: bf16[1152,128], index: 2, kind: input, shape index: {}]   ;;  %s5495_s3 = inlined_call_operand.vmem [shape: f32[1,128], index: 3, kind: input, shape index: {}]   ;;  %s5496_s4 = inlined_call_operand.vmem [shape: bf16[2,355,128], index: 4, kind: output, shape index: {0}]   ;;  %s5497_s5 = inlined_call_operand.vmem [shape: f32[2,1,128], index: 5, kind: output, shape index: {1}]   ;;  %s5498_s6 = inlined_call_operand.vmem [shape: f32[2,1,128], index: 6, kind: output, shape index: {2}]  }
   0x1 LB: > { %s3291_s22 = sadd.s32 4294967295, %s3944_s21   ;;  %p3295_p0 = scmp.ge.s32.totalorder %s3944_s21, 1  ;;  %s3944_s21 = sphi %s3982_s21, %s17_s21  }
   0x2   : > { %p217_p1 = scmp.lt.s32.totalorder %s3944_s21, 3 }
   0x4   : > { %p218_p2 = pnand %p3295_p0, %p217_p1 }
   0x6   : > { %221 = sbr.rel (%p218_p2) target bundleno = 690 (0x2b2), region = 36 }
   0xd   : > { %v3866_v0 = vld [vmem:[%s5494_s2] sm:$0xff]   ;;  %v3946_v1 = vmov 0   ;;  %v3868_v3 = vld [vmem:[%s5494_s2 + $0x8] sm:$0xff]   ;;  %v3870_v5 = vld [vmem:[%s5494_s2 + $0x10] sm:$0xff]   ;;  %p253_p3 = scmp.lt.s32.totalorder %s3291_s22, 1  ;;  %vm3000_vm0 = vcmask 1041408  }
   0xe   : > { %1663 = vmatprep.subr.bf16.mxu1 %v3946_v1  ;;  %1840 = vmatprep.subr.bf16.mxu0 %v3946_v1  ;;  %v3867_v2 = vld [vmem:[%s5494_s2 + $0x80] sm:$0xff]   ;;  %v3869_v4 = vld [vmem:[%s5494_s2 + $0x88] sm:$0xff]   ;;  %v3871_v6 = vld [vmem:[%s5494_s2 + $0x90] sm:$0xff]   ;;  %vm3001_vm1 = vsmask.f32 1280 }
   0xf   : > { %1664 = vmatpush1.bf16.msra.mxu1 %v3866_v0  ;;  %3864 = vset.pattern.permute.xlu0 %v3946_v1  ;;  %v3872_v7 = vld [vmem:[%s5494_s2 + $0x18] sm:$0xff]   ;;  %v3874_v9 = vld [vmem:[%s5494_s2 + $0x20] sm:$0xff]   ;;  %v3876_v11 = vld [vmem:[%s5494_s2 + $0x28] sm:$0xff]   ;;  %s5550_s22 = smov (!%p253_p3, %s3291_s22), 1 }
  0x10   : > { %1841 = vmatpush1.bf16.msra.mxu0 %v3867_v2  ;;  %1665 = vmatprep.subr.bf16.mxu1 %v3946_v1  ;;  %v3873_v8 = vld [vmem:[%s5494_s2 + $0x98] sm:$0xff]   ;;  %v3875_v10 = vld [vmem:[%s5494_s2 + $0xa0] sm:$0xff]   ;;  %v3877_v12 = vld [vmem:[%s5494_s2 + $0xa8] sm:$0xff]   ;;  %s3853_s29 = smul.u32 360, %s5550_s22  ;;  %s265_s15 = scalar_lea.vmem %s5497_s5, %s5550_s22 }
  0x11   : > { %1842 = vmatprep.subr.bf16.mxu0 %v3946_v1  ;;  %3865 = vset.pattern.permute.xlu1 %v3946_v1  ;;  %v3878_v13 = vld [vmem:[%s5494_s2 + $0x30] sm:$0xff]   ;;  %v3880_v15 = vld [vmem:[%s5494_s2 + $0x38] sm:$0xff]   ;;  %v3882_v17 = vld [vmem:[%s5494_s2 + $0x40] sm:$0xff]   ;;  %s268_s18 = scalar_lea.vmem %s5498_s6, %s5550_s22 }
  0x12   : > { %v3879_v14 = vld [vmem:[%s5494_s2 + $0xb0] sm:$0xff]   ;;  %v3881_v16 = vld [vmem:[%s5494_s2 + $0xb8] sm:$0xff]   ;;  %s4066_s12 = scalar_lea.vmem %s5492_s0, %s3853_s29  ;;  %v3883_v18 = vld [vmem:[%s5494_s2 + $0xc0] sm:$0xff]  }
  0x13   : > { %1666 = vmatpush1.bf16.msra.mxu1 %v3868_v3  ;;  %v342_v19 = vld [vmem:[%s4066_s12 + $0xe] sm:$0xff]  ;;  %v343_v20 = vld [vmem:[%s4066_s12 + $0x16] sm:$0xff]  ;;  %v486_v21 = vld [vmem:[%s4066_s12 + $0x1f] sm:$0xff] }
  0x14   : > { %1843 = vmatpush1.bf16.msra.mxu0 %v3869_v4  ;;  %1667 = vmatprep.subr.bf16.mxu1 %v3946_v1  ;;  %v378_v22 = vpack.c.bf16 %v343_v20, %v342_v19  ;;  %v487_v23 = vld [vmem:[%s4066_s12 + $0x27] sm:$0xff]  ;;  %v3886_v27 = vld [vmem:[%s5494_s2 + $0x50] sm:$0xff]   ;;  %v3888_v29 = vld [vmem:[%s5494_s2 + $0x58] sm:$0xff]  }
  0x15   : > { %1844 = vmatprep.subr.bf16.mxu0 %v3946_v1  ;;  %v3884_v24 = vld [vmem:[%s5494_s2 + $0x48] sm:$0xff]   ;;  %v4083_v25 = vpack.c.bf16 %v487_v23, %v486_v21  ;;  %v3887_v28 = vld [vmem:[%s5494_s2 + $0xd0] sm:$0xff]   ;;  %v3889_v30 = vld [vmem:[%s5494_s2 + $0xd8] sm:$0xff]  }
  0x16   : > { %v3885_v26 = vld [vmem:[%s5494_s2 + $0xc8] sm:$0xff]   ;;  %1695 = vmatprep.mubr.bf16.mxu1 %v378_v22  ;;  %v3890_v31 = vld [vmem:[%s5494_s2 + $0x60] sm:$0xff]   ;;  %v3894_v35 = vld [vmem:[%s5494_s2 + $0x70] sm:$0xff]  }
  0x17   : > { %1668 = vmatpush1.bf16.msra.mxu1 %v3870_v5  ;;  %1872 = vmatprep.mubr.bf16.mxu0 %v4083_v25  ;;  %v3891_v32 = vld [vmem:[%s5494_s2 + $0xe0] sm:$0xff]   ;;  %v3892_v33 = vld [vmem:[%s5494_s2 + $0x68] sm:$0xff]   ;;  %v3895_v36 = vld [vmem:[%s5494_s2 + $0xf0] sm:$0xff]  }
  0x18   : > { %1845 = vmatpush1.bf16.msra.mxu0 %v3871_v6  ;;  %1669 = vmatprep.subr.bf16.mxu1 %v3946_v1  ;;  %v3893_v34 = vld [vmem:[%s5494_s2 + $0xe8] sm:$0xff]   ;;  %v3896_v37 = vld [vmem:[%s5494_s2 + $0x78] sm:$0xff]   ;;  %v3898_v50 = vld [vmem:[%s5494_s2 + $0x100] sm:$0xff]  }
  0x19   : > { %1846 = vmatprep.subr.bf16.mxu0 %v3946_v1  ;;  %v3897_v38 = vld [vmem:[%s5494_s2 + $0xf8] sm:$0xff]   ;;  %v270_v39 = vld [vmem:[%s4066_s12 + $0xd] sm:$0xff]  ;;  %v4155_v52 = vld [vmem:[%s5494_s2 + $0x180] sm:$0xff]  }
  0x1a   : > { %v271_v40 = vld [vmem:[%s4066_s12 + $0x15] sm:$0xff]  ;;  %v344_v43 = vld [vmem:[%s4066_s12 + $0x1e] sm:$0xff]  ;;  %v345_v44 = vld [vmem:[%s4066_s12 + $0x26] sm:$0xff] }
  0x1b   : > { %1670 = vmatpush1.bf16.msra.mxu1 %v3872_v7  ;;  %v414_v41 = vld [vmem:[%s4066_s12 + $0xf] sm:$0xff]  ;;  %v415_v42 = vld [vmem:[%s4066_s12 + $0x17] sm:$0xff]  ;;  %v306_v47 = vpack.c.bf16 %v271_v40, %v270_v39  ;;  %v379_v49 = vpack.c.bf16 %v345_v44, %v344_v43  ;;  %v273_v54 = vld [vmem:[%s4066_s12 + $0x25] sm:$0xff] }
  0x1c   : > { %1847 = vmatpush1.bf16.msra.mxu0 %v3873_v8  ;;  %1671 = vmatprep.subr.bf16.mxu1 %v3946_v1  ;;  %v488_v45 = vld [vmem:[%s4066_s12 + $0x2f] sm:$0xff]  ;;  %v489_v46 = vld [vmem:[%s4066_s12 + $0x37] sm:$0xff]  ;;  %v450_v48 = vpack.c.bf16 %v415_v42, %v414_v41  ;;  %v490_v58 = vld [vmem:[%s4066_s12 + $0x3f] sm:$0xff] }
  0x1d   : > { %1848 = vmatprep.subr.bf16.mxu0 %v3946_v1  ;;  %v523_v51 = vpack.c.bf16 %v489_v46, %v488_v45  ;;  %v272_v53 = vld [vmem:[%s4066_s12 + $0x1d] sm:$0xff]  ;;  %v3899_v55 = vld [vmem:[%s5494_s2 + $0x108] sm:$0xff]   ;;  %v3900_v0 = vld [vmem:[%s5494_s2 + $0x110] sm:$0xff]  }
  0x1e   : > { %v346_v56 = vld [vmem:[%s4066_s12 + $0x2e] sm:$0xff]  ;;  %v347_v57 = vld [vmem:[%s4066_s12 + $0x36] sm:$0xff]  ;;  %v307_v61 = vpack.c.bf16 %v273_v54, %v272_v53  ;;  %v348_v5 = vld [vmem:[%s4066_s12 + $0x3e] sm:$0xff] }
  0x1f   : > { %1672 = vmatpush1.bf16.msra.mxu1 %v3874_v9  ;;  %v491_v59 = vld [vmem:[%s4066_s12 + $0x47] sm:$0xff]  ;;  %v380_v62 = vpack.c.bf16 %v347_v57, %v346_v56  ;;  %v4182_v2 = vld [vmem:[%s5494_s2 + $0x190] sm:$0xff]   ;;  %v3901_v8 = vld [vmem:[%s5494_s2 + $0x118] sm:$0xff]  }
  0x20   : > { %1849 = vmatpush1.bf16.msra.mxu0 %v3875_v10  ;;  %1673 = vmatprep.subr.bf16.mxu1 %v3946_v1  ;;  %v4171_v60 = vld [vmem:[%s5494_s2 + $0x188] sm:$0xff]   ;;  %v524_v63 = vpack.c.bf16 %v491_v59, %v490_v58  ;;  %v275_v4 = vld [vmem:[%s4066_s12 + $0x35] sm:$0xff]  ;;  %v494_v20 = vld [vmem:[%s4066_s12 + $0x5f] sm:$0xff] }
  0x21   : > { %1850 = vmatprep.subr.bf16.mxu0 %v3946_v1  ;;  %v274_v3 = vld [vmem:[%s4066_s12 + $0x2d] sm:$0xff]  ;;  %v493_v9 = vld [vmem:[%s4066_s12 + $0x57] sm:$0xff]  ;;  %v3908_v40 = vld [vmem:[%s5494_s2 + $0x140] sm:$0xff]  }
  0x22   : > { %v349_v6 = vld [vmem:[%s4066_s12 + $0x46] sm:$0xff]  ;;  %v492_v7 = vld [vmem:[%s4066_s12 + $0x4f] sm:$0xff]  ;;  %v4200_v10 = vld [vmem:[%s5494_s2 + $0x198] sm:$0xff]  }
  0x23   : > { %1674 = vmatpush1.bf16.msra.mxu1 %v3876_v11  ;;  %v308_v11 = vpack.c.bf16 %v275_v4, %v274_v3  ;;  %v351_v19 = vld [vmem:[%s4066_s12 + $0x56] sm:$0xff]  ;;  %v495_v21 = vld [vmem:[%s4066_s12 + $0x67] sm:$0xff]  ;;  %v498_v46 = vld [vmem:[%s4066_s12 + $0x7f] sm:$0xff] }
  0x24   : > { %1851 = vmatpush1.bf16.msra.mxu0 %v3877_v12  ;;  %1675 = vmatprep.subr.bf16.mxu1 %v3946_v1  ;;  %v381_v12 = vpack.c.bf16 %v349_v6, %v348_v5  ;;  %v3903_v22 = vld [vmem:[%s5494_s2 + $0x128] sm:$0xff]   ;;  %v280_v41 = vld [vmem:[%s4066_s12 + $0x5d] sm:$0xff]  ;;  %v3912_v54 = vld [vmem:[%s5494_s2 + $0x150] sm:$0xff]  }
  0x25   : > { %1852 = vmatprep.subr.bf16.mxu0 %v3946_v1  ;;  %v4228_v23 = vld [vmem:[%s5494_s2 + $0x1a8] sm:$0xff]   ;;  %v4269_v43 = vld [vmem:[%s5494_s2 + $0x1c0] sm:$0xff]   ;;  %v355_v45 = vld [vmem:[%s4066_s12 + $0x76] sm:$0xff] }
  0x26   : > { %v281_v42 = vld [vmem:[%s4066_s12 + $0x65] sm:$0xff]  ;;  %v354_v44 = vld [vmem:[%s4066_s12 + $0x6e] sm:$0xff]  ;;  %vm3002_vm2 = vmand %vm3000_vm0, %vm3001_vm1 }
  0x27   : > { %1676 = vmatpush1.bf16.msra.mxu1 %v3878_v13  ;;  %v525_v13 = vpack.c.bf16 %v493_v9, %v492_v7  ;;  %v282_v56 = vld [vmem:[%s4066_s12 + $0x6d] sm:$0xff]  ;;  %v283_v57 = vld [vmem:[%s4066_s12 + $0x75] sm:$0xff]  ;;  %v356_v58 = vld [vmem:[%s4066_s12 + $0x7e] sm:$0xff] }
  0x28   : > { %1853 = vmatpush1.bf16.msra.mxu0 %v3879_v14  ;;  %1677 = vmatprep.subr.bf16.mxu1 %v3946_v1  ;;  %v3902_v14 = vld [vmem:[%s5494_s2 + $0x120] sm:$0xff]   ;;  %v312_v3 = vpack.c.bf16 %v283_v57, %v282_v56  ;;  %v509_v56 = vld [vmem:[%s4066_s12 + $0xd7] sm:$0xff] }
  0x29   : > { %1854 = vmatprep.subr.bf16.mxu0 %v3946_v1  ;;  %v357_v59 = vld [vmem:[%s4066_s12 + $0x86] sm:$0xff] }
  0x2a   : > { %v385_v4 = vpack.c.bf16 %v357_v59, %v356_v58  ;;  %v3917_v6 = vld [vmem:[%s5494_s2 + $0x160] sm:$0xff]  }
  0x2b   : > { %1678 = vmatpush1.bf16.msra.mxu1 %v3880_v15  ;;  %v4211_v15 = vld [vmem:[%s5494_s2 + $0x1a0] sm:$0xff]  }
  0x2c   : > { %1855 = vmatpush1.bf16.msra.mxu0 %v3881_v16  ;;  %1679 = vmatprep.subr.bf16.mxu1 %v3946_v1  ;;  %v276_v16 = vld [vmem:[%s4066_s12 + $0x3d] sm:$0xff]  ;;  %v285_v9 = vld [vmem:[%s4066_s12 + $0x85] sm:$0xff] }
  0x2d   : > { %1856 = vmatprep.subr.bf16.mxu0 %v3946_v1  ;;  %v4323_v7 = vld [vmem:[%s5494_s2 + $0x1e0] sm:$0xff]  }
  0x2f   : > { %1680 = vmatpush1.bf16.msra.mxu1 %v3882_v17  ;;  %v277_v17 = vld [vmem:[%s4066_s12 + $0x45] sm:$0xff] }
  0x30   : > { %1857 = vmatpush1.bf16.msra.mxu0 %v3883_v18  ;;  %1681 = vmatprep.subr.bf16.mxu1 %v3946_v1  ;;  %v350_v18 = vld [vmem:[%s4066_s12 + $0x4e] sm:$0xff] }
  0x31   : > { %1858 = vmatprep.subr.bf16.mxu0 %v3946_v1 }
  0x33   : > { %1682 = vmatpush1.bf16.msra.mxu1 %v3884_v24  ;;  %v309_v24 = vpack.c.bf16 %v277_v17, %v276_v16  ;;  %v3921_v16 = vld [vmem:[%s5494_s2 + $0x168] sm:$0xff]  }
  0x34   : > { %1859 = vmatpush1.bf16.msra.mxu0 %v3885_v26  ;;  %1683 = vmatprep.subr.bf16.mxu1 %v3946_v1  ;;  %v526_v26 = vpack.c.bf16 %v495_v21, %v494_v20  ;;  %v4340_v17 = vld [vmem:[%s5494_s2 + $0x1e8] sm:$0xff]   ;;  %v3924_v21 = vld [vmem:[%s5494_s2 + $0x170] sm:$0xff]  }
  0x35   : > { %1860 = vmatprep.subr.bf16.mxu0 %v3946_v1 }
  0x37   : > { %1684 = vmatpush1.bf16.msra.mxu1 %v3886_v27  ;;  %v3904_v27 = vld [vmem:[%s5494_s2 + $0x130] sm:$0xff]  }
  0x38   : > { %1861 = vmatpush1.bf16.msra.mxu0 %v3887_v28  ;;  %1685 = vmatprep.subr.bf16.mxu1 %v3946_v1  ;;  %v278_v28 = vld [vmem:[%s4066_s12 + $0x4d] sm:$0xff] }
  0x39   : > { %1862 = vmatprep.subr.bf16.mxu0 %v3946_v1 }
  0x3b   : > { %1686 = vmatpush1.bf16.msra.mxu1 %v3888_v29  ;;  %v4240_v29 = vld [vmem:[%s5494_s2 + $0x1b0] sm:$0xff]  }
  0x3c   : > { %1863 = vmatpush1.bf16.msra.mxu0 %v3889_v30  ;;  %1687 = vmatprep.subr.bf16.mxu1 %v3946_v1  ;;  %v279_v30 = vld [vmem:[%s4066_s12 + $0x55] sm:$0xff] }
  0x3d   : > { %1864 = vmatprep.subr.bf16.mxu0 %v3946_v1 }
  0x3f   : > { %1688 = vmatpush1.bf16.msra.mxu1 %v3890_v31  ;;  %v352_v31 = vld [vmem:[%s4066_s12 + $0x5e] sm:$0xff] }
  0x40   : > { %1865 = vmatpush1.bf16.msra.mxu0 %v3891_v32  ;;  %1689 = vmatprep.subr.bf16.mxu1 %v3946_v1  ;;  %v353_v32 = vld [vmem:[%s4066_s12 + $0x66] sm:$0xff] }
  0x41   : > { %1866 = vmatprep.subr.bf16.mxu0 %v3946_v1 }
  0x43   : > { %1690 = vmatpush1.bf16.msra.mxu1 %v3892_v33  ;;  %v496_v33 = vld [vmem:[%s4066_s12 + $0x6f] sm:$0xff] }
  0x44   : > { %1867 = vmatpush1.bf16.msra.mxu0 %v3893_v34  ;;  %1691 = vmatprep.subr.bf16.mxu1 %v3946_v1  ;;  %v497_v34 = vld [vmem:[%s4066_s12 + $0x77] sm:$0xff] }
  0x45   : > { %1868 = vmatprep.subr.bf16.mxu0 %v3946_v1  ;;  %v527_v39 = vpack.c.bf16 %v497_v34, %v496_v33 }
  0x47   : > { %1692 = vmatpush1.bf16.msra.mxu1 %v3894_v35  ;;  %v3906_v35 = vld [vmem:[%s5494_s2 + $0x138] sm:$0xff]  }
  0x48   : > { %1869 = vmatpush1.bf16.msra.mxu0 %v3895_v36  ;;  %1693 = vmatprep.subr.bf16.mxu1 %v3946_v1  ;;  %v4256_v36 = vld [vmem:[%s5494_s2 + $0x1b8] sm:$0xff]  }
  0x49   : > { %1870 = vmatprep.subr.bf16.mxu0 %v3946_v1 }
  0x4b   : > { %1694 = vmatpush1.bf16.msra.mxu1 %v3896_v37  ;;  %v310_v37 = vpack.c.bf16 %v279_v30, %v278_v28  ;;  %v3927_v28 = vld [vmem:[%s5494_s2 + $0x178] sm:$0xff]   ;;  %v504_v30 = vld [vmem:[%s4066_s12 + $0xaf] sm:$0xff] }
  0x4c   : > { %1871 = vmatpush1.bf16.msra.mxu0 %v3897_v38  ;;  %3631 = vmatprep.subr.bf16.mxu1 %v3946_v1  ;;  %v383_v38 = vpack.c.bf16 %v353_v32, %v352_v31  ;;  %v505_v31 = vld [vmem:[%s4066_s12 + $0xb7] sm:$0xff] }
  0x4d   : > { %2017 = vmatprep.subr.bf16.mxu0 %v3946_v1  ;;  %v4368_v32 = vld [vmem:[%s5494_s2 + $0x1f8] sm:$0xff]  }
  0x4e   : > { %1696 = vmatmul.mubr.bf16.vlgmr.msra.gmra.mrb[0].mxu1 %v306_v47  ;;  %v3910_v47 = vld [vmem:[%s5494_s2 + $0x148] sm:$0xff]  }
  0x4f   : > { %1873 = vmatmul.mubr.bf16.vlgmr.msra.gmra.mrb[0].mxu0 %v450_v48  ;;  %1703 = vmatprep.mubr.bf16.mxu1 %v379_v49  ;;  %v499_v48 = vld [vmem:[%s4066_s12 + $0x87] sm:$0xff] }
  0x50   : > { %2018 = vmatpush1.bf16.msra.mxu0 %v3898_v50  ;;  %1880 = vmatprep.mubr.bf16.mxu0 %v523_v51  ;;  %v4284_v49 = vld [vmem:[%s5494_s2 + $0x1c8] sm:$0xff]   ;;  %v311_v50 = vpack.c.bf16 %v281_v42, %v280_v41  ;;  %v528_v53 = vpack.c.bf16 %v499_v48, %v498_v46  ;;  %v506_v41 = vld [vmem:[%s4066_s12 + $0xbf] sm:$0xff]  ;;  %v291_v48 = vld [vmem:[%s4066_s12 + $0xb5] sm:$0xff] }
  0x51   : > { %2019 = vmatprep.subr.bf16.mxu0 %v3946_v1  ;;  %3647 = vmatpush1.bf16.msra.mxu1 %v4155_v52  ;;  %v507_v42 = vld [vmem:[%s4066_s12 + $0xc7] sm:$0xff] }
  0x52   : > { %3632 = vmatprep.subr.bf16.mxu1 %v3946_v1  ;;  %v532_v46 = vpack.c.bf16 %v507_v42, %v506_v41  ;;  %v517_v41 = vld [vmem:[%s4066_s12 + $0x117] sm:$0xff] }
  0x54   : > { %2020 = vmatpush1.bf16.msra.mxu0 %v3899_v55  ;;  %v4295_v55 = vld [vmem:[%s5494_s2 + $0x1d0] sm:$0xff]  }
  0x55   : > { %2021 = vmatprep.subr.bf16.mxu0 %v3946_v1  ;;  %3648 = vmatpush1.bf16.msra.mxu1 %v4171_v60 }
  0x56   : > { %1704 = vmatmul.mubr.bf16.gmra.mrb[4].mxu1 %v307_v61  ;;  %3633 = vmatprep.subr.bf16.mxu1 %v3946_v1  ;;  %v3914_v61 = vld [vmem:[%s5494_s2 + $0x158] sm:$0xff]  }
  0x57   : > { %1881 = vmatmul.mubr.bf16.gmra.mrb[4].mxu0 %v4083_v25  ;;  %1711 = vmatprep.mubr.bf16.mxu1 %v380_v62  ;;  %v382_v25 = vpack.c.bf16 %v351_v19, %v350_v18  ;;  %v500_v62 = vld [vmem:[%s4066_s12 + $0x8f] sm:$0xff] }
  0x58   : > { %1888 = vmatprep.mubr.bf16.mxu0 %v524_v63  ;;  %2022 = vmatpush1.bf16.msra.mxu0 %v3900_v0  ;;  %v4312_v0 = vld [vmem:[%s5494_s2 + $0x1d8] sm:$0xff]  }
  0x59   : > { %2023 = vmatprep.subr.bf16.mxu0 %v3946_v1  ;;  %3649 = vmatpush1.bf16.msra.mxu1 %v4182_v2 }
  0x5a   : > { %3634 = vmatprep.subr.bf16.mxu1 %v3946_v1 }
  0x5c   : > { %2024 = vmatpush1.bf16.msra.mxu0 %v3901_v8  ;;  %v284_v8 = vld [vmem:[%s4066_s12 + $0x7d] sm:$0xff] }
  0x5d   : > { %2025 = vmatprep.subr.bf16.mxu0 %v3946_v1  ;;  %3650 = vmatpush1.bf16.msra.mxu1 %v4200_v10  ;;  %v313_v18 = vpack.c.bf16 %v285_v9, %v284_v8 }
  0x5e   : > { %1712 = vmatmul.mubr.bf16.gmra.mrb[8].mxu1 %v308_v11  ;;  %3635 = vmatprep.subr.bf16.mxu1 %v3946_v1  ;;  %v358_v11 = vld [vmem:[%s4066_s12 + $0x8e] sm:$0xff] }
  0x5f   : > { %1889 = vmatmul.mubr.bf16.gmra.mrb[8].mxu0 %v523_v51  ;;  %1719 = vmatprep.mubr.bf16.mxu1 %v381_v12  ;;  %v384_v51 = vpack.c.bf16 %v355_v45, %v354_v44  ;;  %v359_v12 = vld [vmem:[%s4066_s12 + $0x96] sm:$0xff] }
  0x60   : > { %1896 = vmatprep.mubr.bf16.mxu0 %v525_v13  ;;  %2026 = vmatpush1.bf16.msra.mxu0 %v3902_v14  ;;  %v503_v14 = vld [vmem:[%s4066_s12 + $0xa7] sm:$0xff]  ;;  %v386_v19 = vpack.c.bf16 %v359_v12, %v358_v11  ;;  %v295_v12 = vld [vmem:[%s4066_s12 + $0xd5] sm:$0xff] }
  0x61   : > { %2027 = vmatprep.subr.bf16.mxu0 %v3946_v1  ;;  %3651 = vmatpush1.bf16.msra.mxu1 %v4211_v15  ;;  %v294_v11 = vld [vmem:[%s4066_s12 + $0xcd] sm:$0xff] }
  0x62   : > { %3636 = vmatprep.subr.bf16.mxu1 %v3946_v1 }
  0x64   : > { %2028 = vmatpush1.bf16.msra.mxu0 %v3903_v22  ;;  %v4349_v22 = vld [vmem:[%s5494_s2 + $0x1f0] sm:$0xff]  }
  0x65   : > { %2029 = vmatprep.subr.bf16.mxu0 %v3946_v1  ;;  %3652 = vmatpush1.bf16.msra.mxu1 %v4228_v23 }
  0x66   : > { %1720 = vmatmul.mubr.bf16.gmra.mrb[12].mxu1 %v309_v24  ;;  %3637 = vmatprep.subr.bf16.mxu1 %v3946_v1  ;;  %v286_v24 = vld [vmem:[%s4066_s12 + $0x8d] sm:$0xff] }
  0x67   : > { %1897 = vmatmul.mubr.bf16.gmra.mrb[12].mxu0 %v524_v63  ;;  %1727 = vmatprep.mubr.bf16.mxu1 %v382_v25  ;;  %v501_v63 = vld [vmem:[%s4066_s12 + $0x97] sm:$0xff] }
  0x68   : > { %1904 = vmatprep.mubr.bf16.mxu0 %v526_v26  ;;  %2030 = vmatpush1.bf16.msra.mxu0 %v3904_v27  ;;  %v529_v5 = vpack.c.bf16 %v501_v63, %v500_v62  ;;  %v287_v25 = vld [vmem:[%s4066_s12 + $0x95] sm:$0xff]  ;;  %v361_v27 = vld [vmem:[%s4066_s12 + $0xa6] sm:$0xff] }
  0x69   : > { %2031 = vmatprep.subr.bf16.mxu0 %v3946_v1  ;;  %3653 = vmatpush1.bf16.msra.mxu1 %v4240_v29  ;;  %v314_v33 = vpack.c.bf16 %v287_v25, %v286_v24  ;;  %v293_v62 = vld [vmem:[%s4066_s12 + $0xc5] sm:$0xff]  ;;  %v366_v63 = vld [vmem:[%s4066_s12 + $0xce] sm:$0xff]  ;;  %v296_v24 = vld [vmem:[%s4066_s12 + $0xdd] sm:$0xff] }
  0x6a   : > { %3638 = vmatprep.subr.bf16.mxu1 %v3946_v1  ;;  %v297_v25 = vld [vmem:[%s4066_s12 + $0xe5] sm:$0xff] }
  0x6c   : > { %2032 = vmatpush1.bf16.msra.mxu0 %v3906_v35  ;;  %v531_v35 = vpack.c.bf16 %v505_v31, %v504_v30  ;;  %v515_v30 = vld [vmem:[%s4066_s12 + $0x107] sm:$0xff]  ;;  %v319_v31 = vpack.c.bf16 %v297_v25, %v296_v24 }
  0x6d   : > { %2033 = vmatprep.subr.bf16.mxu0 %v3946_v1  ;;  %3654 = vmatpush1.bf16.msra.mxu1 %v4256_v36  ;;  %v712_v24 = vld [vmem:[%s4066_s12 + $0x81] sm:$0xff]  ;;  %v713_v25 = vld [vmem:[%s4066_s12 + $0x89] sm:$0xff] }
  0x6e   : > { %1728 = vmatmul.mubr.bf16.gmra.mrb[16].mxu1 %v310_v37  ;;  %3639 = vmatprep.subr.bf16.mxu1 %v3946_v1  ;;  %v288_v37 = vld [vmem:[%s4066_s12 + $0x9d] sm:$0xff] }
  0x6f   : > { %1905 = vmatmul.mubr.bf16.gmra.mrb[16].mxu0 %v525_v13  ;;  %1735 = vmatprep.mubr.bf16.mxu1 %v383_v38  ;;  %v502_v13 = vld [vmem:[%s4066_s12 + $0x9f] sm:$0xff] }
  0x70   : > { %1912 = vmatprep.mubr.bf16.mxu0 %v527_v39  ;;  %2034 = vmatpush1.bf16.msra.mxu0 %v3908_v40  ;;  %v530_v20 = vpack.c.bf16 %v503_v14, %v502_v13  ;;  %v289_v38 = vld [vmem:[%s4066_s12 + $0xa5] sm:$0xff]  ;;  %v363_v40 = vld [vmem:[%s4066_s12 + $0xb6] sm:$0xff] }
  0x71   : > { %2035 = vmatprep.subr.bf16.mxu0 %v3946_v1  ;;  %3655 = vmatpush1.bf16.msra.mxu1 %v4269_v43  ;;  %v315_v44 = vpack.c.bf16 %v289_v38, %v288_v37  ;;  %v368_v13 = vld [vmem:[%s4066_s12 + $0xde] sm:$0xff]  ;;  %v369_v14 = vld [vmem:[%s4066_s12 + $0xe6] sm:$0xff]  ;;  %v299_v37 = vld [vmem:[%s4066_s12 + $0xf5] sm:$0xff] }
  0x72   : > { %3640 = vmatprep.subr.bf16.mxu1 %v3946_v1  ;;  %v372_v38 = vld [vmem:[%s4066_s12 + $0xfe] sm:$0xff] }
  0x74   : > { %2036 = vmatpush1.bf16.msra.mxu0 %v3910_v47  ;;  %v290_v47 = vld [vmem:[%s4066_s12 + $0xad] sm:$0xff] }
  0x75   : > { %2037 = vmatprep.subr.bf16.mxu0 %v3946_v1  ;;  %3656 = vmatpush1.bf16.msra.mxu1 %v4284_v49  ;;  %v316_v57 = vpack.c.bf16 %v291_v48, %v290_v47  ;;  %v301_v47 = vld [vmem:[%s4066_s12 + $0x105] sm:$0xff]  ;;  %v374_v48 = vld [vmem:[%s4066_s12 + $0x10e] sm:$0xff] }
  0x76   : > { %1736 = vmatmul.mubr.bf16.gmra.mrb[20].mxu1 %v311_v50  ;;  %3641 = vmatprep.subr.bf16.mxu1 %v3946_v1  ;;  %v4384_v50 = vld [vmem:[%s5494_s2 + $0x200] sm:$0xff]  }
  0x77   : > { %1913 = vmatmul.mubr.bf16.gmra.mrb[20].mxu0 %v526_v26  ;;  %1743 = vmatprep.mubr.bf16.mxu1 %v384_v51  ;;  %v360_v26 = vld [vmem:[%s4066_s12 + $0x9e] sm:$0xff] }
  0x78   : > { %1920 = vmatprep.mubr.bf16.mxu0 %v528_v53  ;;  %2038 = vmatpush1.bf16.msra.mxu0 %v3912_v54  ;;  %v387_v34 = vpack.c.bf16 %v361_v27, %v360_v26  ;;  %v364_v51 = vld [vmem:[%s4066_s12 + $0xbe] sm:$0xff]  ;;  %v508_v54 = vld [vmem:[%s4066_s12 + $0xcf] sm:$0xff] }
  0x79   : > { %2039 = vmatprep.subr.bf16.mxu0 %v3946_v1  ;;  %3657 = vmatpush1.bf16.msra.mxu1 %v4295_v55  ;;  %v533_v59 = vpack.c.bf16 %v509_v56, %v508_v54  ;;  %v370_v26 = vld [vmem:[%s4066_s12 + $0xee] sm:$0xff]  ;;  %v371_v27 = vld [vmem:[%s4066_s12 + $0xf6] sm:$0xff] }
  0x7a   : > { %3642 = vmatprep.subr.bf16.mxu1 %v3946_v1  ;;  %v519_v54 = vld [vmem:[%s4066_s12 + $0x127] sm:$0xff] }
  0x7c   : > { %2040 = vmatpush1.bf16.msra.mxu0 %v3914_v61  ;;  %v292_v61 = vld [vmem:[%s4066_s12 + $0xbd] sm:$0xff] }
  0x7d   : > { %2041 = vmatprep.subr.bf16.mxu0 %v3946_v1  ;;  %3658 = vmatpush1.bf16.msra.mxu1 %v4312_v0 }
  0x7e   : > { %1744 = vmatmul.mubr.bf16.gmra.mrb[24].mxu1 %v312_v3  ;;  %3643 = vmatprep.subr.bf16.mxu1 %v3946_v1  ;;  %v367_v3 = vld [vmem:[%s4066_s12 + $0xd6] sm:$0xff] }
  0x7f   : > { %1921 = vmatmul.mubr.bf16.gmra.mrb[24].mxu0 %v527_v39  ;;  %1751 = vmatprep.mubr.bf16.mxu1 %v385_v4  ;;  %v362_v39 = vld [vmem:[%s4066_s12 + $0xae] sm:$0xff]  ;;  %v510_v4 = vld [vmem:[%s4066_s12 + $0xdf] sm:$0xff]  ;;  %v390_v8 = vpack.c.bf16 %v367_v3, %v366_v63 }
  0x80   : > { %1928 = vmatprep.mubr.bf16.mxu0 %v529_v5  ;;  %2042 = vmatpush1.bf16.msra.mxu0 %v3917_v6  ;;  %v388_v45 = vpack.c.bf16 %v363_v40, %v362_v39  ;;  %v317_v6 = vpack.c.bf16 %v293_v62, %v292_v61  ;;  %v373_v39 = vld [vmem:[%s4066_s12 + $0x106] sm:$0xff]  ;;  %v516_v40 = vld [vmem:[%s4066_s12 + $0x10f] sm:$0xff]  ;;  %v376_v62 = vld [vmem:[%s4066_s12 + $0x11e] sm:$0xff] }
  0x81   : > { %2043 = vmatprep.subr.bf16.mxu0 %v3946_v1  ;;  %3659 = vmatpush1.bf16.msra.mxu1 %v4323_v7  ;;  %v303_v61 = vld [vmem:[%s4066_s12 + $0x115] sm:$0xff]  ;;  %v377_v63 = vld [vmem:[%s4066_s12 + $0x126] sm:$0xff] }
  0x82   : > { %3644 = vmatprep.subr.bf16.mxu1 %v3946_v1  ;;  %v520_v3 = vld [vmem:[%s4066_s12 + $0x12f] sm:$0xff] }
  0x84   : > { %2044 = vmatpush1.bf16.msra.mxu0 %v3921_v16  ;;  %v512_v16 = vld [vmem:[%s4066_s12 + $0xef] sm:$0xff] }
  0x85   : > { %2045 = vmatprep.subr.bf16.mxu0 %v3946_v1  ;;  %3660 = vmatpush1.bf16.msra.mxu1 %v4340_v17 }
  0x86   : > { %1752 = vmatmul.mubr.bf16.gmra.mrb[28].mxu1 %v313_v18  ;;  %3645 = vmatprep.subr.bf16.mxu1 %v3946_v1  ;;  %v513_v18 = vld [vmem:[%s4066_s12 + $0xf7] sm:$0xff] }
  0x87   : > { %1929 = vmatmul.mubr.bf16.gmra.mrb[28].mxu0 %v528_v53  ;;  %1759 = vmatprep.mubr.bf16.mxu1 %v386_v19  ;;  %v365_v53 = vld [vmem:[%s4066_s12 + $0xc6] sm:$0xff]  ;;  %v318_v19 = vpack.c.bf16 %v295_v12, %v294_v11 }
  0x88   : > { %1936 = vmatprep.mubr.bf16.mxu0 %v530_v20  ;;  %2046 = vmatpush1.bf16.msra.mxu0 %v3924_v21  ;;  %v389_v58 = vpack.c.bf16 %v365_v53, %v364_v51  ;;  %v535_v21 = vpack.c.bf16 %v513_v18, %v512_v16  ;;  %v375_v51 = vld [vmem:[%s4066_s12 + $0x116] sm:$0xff]  ;;  %v518_v53 = vld [vmem:[%s4066_s12 + $0x11f] sm:$0xff]  ;;  %v631_v16 = vld [vmem:[%s4066_s12 + $0x29] sm:$0xff] }
  0x89   : > { %2047 = vmatprep.subr.bf16.mxu0 %v3946_v1  ;;  %3661 = vmatpush1.bf16.msra.mxu1 %v4349_v22  ;;  %v305_v11 = vld [vmem:[%s4066_s12 + $0x125] sm:$0xff] }
  0x8a   : > { %3646 = vmatprep.subr.bf16.mxu1 %v3946_v1  ;;  %v784_v12 = vld [vmem:[%s4066_s12 + $0x82] sm:$0xff] }
  0x8c   : > { %2048 = vmatpush1.bf16.msra.mxu0 %v3927_v28  ;;  %v514_v28 = vld [vmem:[%s4066_s12 + $0xff] sm:$0xff] }
  0x8d   : > { %3662 = vmatpush1.bf16.msra.mxu1 %v4368_v32  ;;  %2194 = vmatprep.subr.bf16.mxu0 %v3946_v1 }
  0x8e   : > { %1760 = vmatmul.mubr.bf16.gmra.mrb[32].mxu1 %v314_v33  ;;  %3579 = vmatprep.subr.bf16.mxu1 %v4384_v50  ;;  %v392_v33 = vpack.c.bf16 %v371_v27, %v370_v26  ;;  %v559_v26 = vld [vmem:[%s4066_s12 + $0x28] sm:$0xff]  ;;  %v786_v27 = vld [vmem:[%s4066_s12 + $0x92] sm:$0xff] }
  0x8f   : > { %1937 = vmatmul.mubr.bf16.gmra.mrb[32].mxu0 %v529_v5  ;;  %1767 = vmatprep.mubr.bf16.mxu1 %v387_v34  ;;  %v511_v5 = vld [vmem:[%s4066_s12 + $0xe7] sm:$0xff]  ;;  %v536_v34 = vpack.c.bf16 %v515_v30, %v514_v28  ;;  %v787_v28 = vld [vmem:[%s4066_s12 + $0x9a] sm:$0xff]  ;;  %v632_v30 = vld [vmem:[%s4066_s12 + $0x31] sm:$0xff] }
  0x90   : > { %1944 = vmatprep.mubr.bf16.mxu0 %v531_v35  ;;  %v534_v9 = vpack.c.bf16 %v511_v5, %v510_v4  ;;  %v521_v4 = vld [vmem:[%s4066_s12 + $0x137] sm:$0xff] }
  0x96   : > { %1768 = vmatmul.mubr.bf16.gmra.mrb[36].mxu1 %v315_v44  ;;  %v393_v44 = vpack.c.bf16 %v373_v39, %v372_v38  ;;  %v3931_v38 = vld [vmem:[%s5494_s2 + $0x208] sm:$0xff]   ;;  %v560_v39 = vld [vmem:[%s4066_s12 + $0x30] sm:$0xff] }
  0x97   : > { %1945 = vmatmul.mubr.bf16.gmra.mrb[36].mxu0 %v530_v20  ;;  %1775 = vmatprep.mubr.bf16.mxu1 %v388_v45  ;;  %v391_v20 = vpack.c.bf16 %v369_v14, %v368_v13  ;;  %v537_v45 = vpack.c.bf16 %v517_v41, %v516_v40  ;;  %v785_v13 = vld [vmem:[%s4066_s12 + $0x8a] sm:$0xff]  ;;  %v630_v14 = vld [vmem:[%s4066_s12 + $0x21] sm:$0xff]  ;;  %v715_v41 = vld [vmem:[%s4066_s12 + $0x99] sm:$0xff] }
  0x98   : > { %1952 = vmatprep.mubr.bf16.mxu0 %v532_v46  ;;  %v714_v40 = vld [vmem:[%s4066_s12 + $0x91] sm:$0xff] }
  0x9e   : > { %1776 = vmatmul.mubr.bf16.gmra.mrb[40].mxu1 %v316_v57  ;;  %v394_v57 = vpack.c.bf16 %v375_v51, %v374_v48  ;;  %v4461_v48 = vpack.c.bf16 %v715_v41, %v714_v40 }
  0x9f   : > { %1953 = vmatmul.mubr.bf16.gmra.mrb[40].mxu0 %v531_v35  ;;  %1783 = vmatprep.mubr.bf16.mxu1 %v389_v58  ;;  %v298_v35 = vld [vmem:[%s4066_s12 + $0xed] sm:$0xff]  ;;  %v538_v58 = vpack.c.bf16 %v519_v54, %v518_v53 }
  0xa0   : > { %1960 = vmatprep.mubr.bf16.mxu0 %v533_v59  ;;  %v320_v42 = vpack.c.bf16 %v299_v37, %v298_v35  ;;  %v816_v35 = vpack.c.bf16 %v787_v28, %v786_v27  ;;  %v720_v27 = vld [vmem:[%s4066_s12 + $0xc1] sm:$0xff]  ;;  %v721_v28 = vld [vmem:[%s4066_s12 + $0xc9] sm:$0xff] }
  0xa6   : > { %1784 = vmatmul.mubr.bf16.gmra.mrb[44].mxu1 %v317_v6  ;;  %v395_v6 = vpack.c.bf16 %v377_v63, %v376_v62  ;;  %v636_v62 = vld [vmem:[%s4066_s12 + $0x51] sm:$0xff]  ;;  %v637_v63 = vld [vmem:[%s4066_s12 + $0x59] sm:$0xff] }
  0xa7   : > { %1961 = vmatmul.mubr.bf16.gmra.mrb[44].mxu0 %v532_v46  ;;  %1791 = vmatprep.mubr.bf16.mxu1 %v390_v8  ;;  %v300_v46 = vld [vmem:[%s4066_s12 + $0xfd] sm:$0xff]  ;;  %v539_v8 = vpack.c.bf16 %v521_v4, %v520_v3 }
  0xa8   : > { %1968 = vmatprep.mubr.bf16.mxu0 %v534_v9  ;;  %v321_v56 = vpack.c.bf16 %v301_v47, %v300_v46  ;;  %v634_v46 = vld [vmem:[%s4066_s12 + $0x41] sm:$0xff]  ;;  %v635_v47 = vld [vmem:[%s4066_s12 + $0x49] sm:$0xff] }
  0xa9   : > { %v4467_v54 = vpack.c.bf16 %v635_v47, %v634_v46  ;;  %v3934_v4 = vld [vmem:[%s5494_s2 + $0x220] sm:$0xff]   ;;  %v797_v47 = vld [vmem:[%s4066_s12 + $0xea] sm:$0xff] }
  0xaa   : > { %v796_v46 = vld [vmem:[%s4066_s12 + $0xe2] sm:$0xff] }
  0xae   : > { %1792 = vmatmul.mubr.bf16.gmra.mrb[48].mxu1 %v318_v19  ;;  %v815_v19 = vpack.c.bf16 %v785_v13, %v784_v12  ;;  %v719_v12 = vld [vmem:[%s4066_s12 + $0xb9] sm:$0xff]  ;;  %v792_v13 = vld [vmem:[%s4066_s12 + $0xc2] sm:$0xff] }
  0xaf   : > { %1969 = vmatmul.mubr.bf16.gmra.mrb[48].mxu0 %v533_v59  ;;  %1799 = vmatprep.mubr.bf16.mxu1 %v391_v20  ;;  %v302_v59 = vld [vmem:[%s4066_s12 + $0x10d] sm:$0xff]  ;;  %v666_v20 = vpack.c.bf16 %v631_v16, %v630_v14  ;;  %v638_v16 = vld [vmem:[%s4066_s12 + $0x61] sm:$0xff] }
  0xb0   : > { %1976 = vmatprep.mubr.bf16.mxu0 %v535_v21  ;;  %v322_v5 = vpack.c.bf16 %v303_v61, %v302_v59  ;;  %v790_v59 = vld [vmem:[%s4066_s12 + $0xb2] sm:$0xff]  ;;  %v791_v61 = vld [vmem:[%s4066_s12 + $0xba] sm:$0xff]  ;;  %v793_v14 = vld [vmem:[%s4066_s12 + $0xca] sm:$0xff] }
  0xb6   : > { %1800 = vmatmul.mubr.bf16.gmra.mrb[52].mxu1 %v319_v31  ;;  %v633_v31 = vld [vmem:[%s4066_s12 + $0x39] sm:$0xff] }
  0xb7   : > { %1977 = vmatmul.mubr.bf16.gmra.mrb[52].mxu0 %v534_v9  ;;  %1807 = vmatprep.mubr.bf16.mxu1 %v392_v33  ;;  %v304_v9 = vld [vmem:[%s4066_s12 + $0x11d] sm:$0xff]  ;;  %v4441_v33 = vpack.c.bf16 %v713_v25, %v712_v24  ;;  %v4443_v37 = vpack.c.bf16 %v633_v31, %v632_v30  ;;  %v819_v24 = vpack.c.bf16 %v793_v14, %v792_v13  ;;  %v794_v30 = vld [vmem:[%s4066_s12 + $0xd2] sm:$0xff]  ;;  %v729_v13 = vld [vmem:[%s4066_s12 + $0x109] sm:$0xff] }
  0xb8   : > { %1984 = vmatprep.mubr.bf16.mxu0 %v536_v34  ;;  %v323_v18 = vpack.c.bf16 %v305_v11, %v304_v9  ;;  %v564_v9 = vld [vmem:[%s4066_s12 + $0x50] sm:$0xff]  ;;  %v3937_v25 = vld [vmem:[%s5494_s2 + $0x238] sm:$0xff]   ;;  %v2589_v14 = vld [vmem:[%s5493_s1 + $0x28] sm:$0xff] }
  0xb9   : > { %v718_v11 = vld [vmem:[%s4066_s12 + $0xb1] sm:$0xff]  ;;  %v795_v31 = vld [vmem:[%s4066_s12 + $0xda] sm:$0xff] }
  0xba   : > { %v820_v40 = vpack.c.bf16 %v795_v31, %v794_v30  ;;  %v804_v30 = vld [vmem:[%s4066_s12 + $0x122] sm:$0xff]  ;;  %v805_v31 = vld [vmem:[%s4066_s12 + $0x12a] sm:$0xff] }
  0xbe   : > { %1808 = vmatmul.mubr.bf16.gmra.mrb[56].mxu1 %v320_v42  ;;  %v561_v42 = vld [vmem:[%s4066_s12 + $0x38] sm:$0xff] }
  0xbf   : > { %1985 = vmatmul.mubr.bf16.gmra.mrb[56].mxu0 %v535_v21  ;;  %1815 = vmatprep.mubr.bf16.mxu1 %v393_v44  ;;  %v558_v21 = vld [vmem:[%s4066_s12 + $0x20] sm:$0xff]  ;;  %v595_v51 = vpack.c.bf16 %v561_v42, %v560_v39  ;;  %v722_v42 = vld [vmem:[%s4066_s12 + $0xd1] sm:$0xff] }
  0xc0   : > { %1992 = vmatprep.mubr.bf16.mxu0 %v537_v45  ;;  %v788_v44 = vld [vmem:[%s4066_s12 + $0xa2] sm:$0xff] }
  0xc6   : > { %1816 = vmatmul.mubr.bf16.gmra.mrb[60].mxu1 %v321_v56  ;;  %v562_v56 = vld [vmem:[%s4066_s12 + $0x40] sm:$0xff] }
  0xc7   : > { %1993 = vmatmul.mubr.bf16.gmra.mrb[60].mxu0 %v536_v34  ;;  %1823 = vmatprep.mubr.bf16.mxu1 %v394_v57  ;;  %v594_v34 = vpack.c.bf16 %v559_v26, %v558_v21  ;;  %v716_v57 = vld [vmem:[%s4066_s12 + $0xa1] sm:$0xff] }
  0xc8   : > { %2000 = vmatprep.mubr.bf16.mxu0 %v538_v58  ;;  %v566_v26 = vld [vmem:[%s4066_s12 + $0x60] sm:$0xff] }
  0xce   : > { %1824 = vmatmul.mubr.bf16.gmra.mrb[64].mxu1 %v322_v5 }
  0xcf   : > { %2001 = vmatmul.mubr.bf16.gmra.mrb[64].mxu0 %v537_v45  ;;  %1831 = vmatprep.mubr.bf16.mxu1 %v395_v6  ;;  %v789_v45 = vld [vmem:[%s4066_s12 + $0xaa] sm:$0xff]  ;;  %v4490_v6 = vpack.c.bf16 %v637_v63, %v636_v62  ;;  %v2584_v62 = vld [vmem:[%s5493_s1] sm:$0xff] }
  0xd0   : > { %2008 = vmatprep.mubr.bf16.mxu0 %v539_v8  ;;  %v817_v53 = vpack.c.bf16 %v789_v45, %v788_v44  ;;  %v3935_v8 = vld [vmem:[%s5494_s2 + $0x228] sm:$0xff]   ;;  %v723_v44 = vld [vmem:[%s4066_s12 + $0xd9] sm:$0xff]  ;;  %v2586_v63 = vld [vmem:[%s5493_s1 + $0x10] sm:$0xff]  ;;  %2622 = vperm.xlu0 %3864, %v2584_v62  }
  0xd1   : > { %v569_v45 = vld [vmem:[%s4066_s12 + $0x78] sm:$0xff]  ;;  %2632 = vperm.xlu1 %3865, %v2586_v63   ;;  %v580_v63 = vld [vmem:[%s4066_s12 + $0xd0] sm:$0xff] }
  0xd6   : > { %1832 = vmatmul.mubr.bf16.gmra.mrb[68].mxu1 %v323_v18  ;;  %v639_v18 = vld [vmem:[%s4066_s12 + $0x69] sm:$0xff] }
  0xd7   : > { %2009 = vmatmul.mubr.bf16.gmra.mrb[68].mxu0 %v538_v58  ;;  %2266 = vmatprep.mubr.bf16.mxu1 %v815_v19  ;;  %v563_v58 = vld [vmem:[%s4066_s12 + $0x48] sm:$0xff]  ;;  %v4509_v19 = vpack.c.bf16 %v719_v12, %v718_v11  ;;  %v574_v11 = vld [vmem:[%s4066_s12 + $0xa0] sm:$0xff] }
  0xd8   : > { %2049 = vmatprep.mubr.bf16.mxu0 %v666_v20  ;;  %v596_v5 = vpack.c.bf16 %v563_v58, %v562_v56  ;;  %v3936_v20 = vld [vmem:[%s5494_s2 + $0x230] sm:$0xff]   ;;  %v571_v56 = vld [vmem:[%s4066_s12 + $0x88] sm:$0xff]  ;;  %v2588_v12 = vld [vmem:[%s5493_s1 + $0x20] sm:$0xff] }
  0xde   : > { %2267 = vmatmul.mubr.bf16.vlgmr.msra.gmra.mrb[72].mxu1 %v4441_v33 }
  0xdf   : > { %2050 = vmatmul.mubr.bf16.vlgmr.msra.gmra.mrb[0].mxu0 %v594_v34  ;;  %2274 = vmatprep.mubr.bf16.mxu1 %v816_v35  ;;  %v640_v34 = vld [vmem:[%s4066_s12 + $0x71] sm:$0xff]  ;;  %v641_v35 = vld [vmem:[%s4066_s12 + $0x79] sm:$0xff] }
  0xe0   : > { %2195 = vmatpush1.bf16.msra.mxu0 %v4155_v52  ;;  %2057 = vmatprep.mubr.bf16.mxu0 %v4443_v37  ;;  %v3932_v52 = vld [vmem:[%s5494_s2 + $0x210] sm:$0xff]   ;;  %v4535_v41 = vpack.c.bf16 %v641_v35, %v640_v34 }
  0xe1   : > { %2196 = vmatprep.subr.bf16.mxu0 %v3946_v1  ;;  %3580 = vmatpush3.bf16.msra.mxu1 %v4384_v50  ;;  %v3933_v50 = vld [vmem:[%s5494_s2 + $0x218] sm:$0xff]  }
  0xe2   : > { %3581 = vmatprep.subr.bf16.mxu1 %v3931_v38 }
  0xe4   : > { %2197 = vmatpush1.bf16.msra.mxu0 %v4171_v60  ;;  %v717_v60 = vld [vmem:[%s4066_s12 + $0xa9] sm:$0xff] }
  0xe5   : > { %2198 = vmatprep.subr.bf16.mxu0 %v3946_v1  ;;  %3582 = vmatpush3.bf16.msra.mxu1 %v3931_v38  ;;  %v4485_v3 = vpack.c.bf16 %v717_v60, %v716_v57  ;;  %v4533_v38 = vpack.c.bf16 %v721_v28, %v720_v27  ;;  %v798_v57 = vld [vmem:[%s4066_s12 + $0xf2] sm:$0xff]  ;;  %v799_v60 = vld [vmem:[%s4066_s12 + $0xfa] sm:$0xff] }
  0xe6   : > { %2275 = vmatmul.mubr.bf16.gmra.mrb[76].mxu1 %v4461_v48  ;;  %3583 = vmatprep.subr.bf16.mxu1 %v3932_v52  ;;  %v730_v27 = vld [vmem:[%s4066_s12 + $0x111] sm:$0xff]  ;;  %v731_v28 = vld [vmem:[%s4066_s12 + $0x119] sm:$0xff] }
  0xe7   : > { %2058 = vmatmul.mubr.bf16.gmra.mrb[4].mxu0 %v595_v51  ;;  %2282 = vmatprep.mubr.bf16.mxu1 %v817_v53  ;;  %v821_v51 = vpack.c.bf16 %v797_v47, %v796_v46  ;;  %v570_v53 = vld [vmem:[%s4066_s12 + $0x80] sm:$0xff]  ;;  %v4634_v35 = vpack.c.bf16 %v731_v28, %v730_v27  ;;  %v846_v27 = vld [vmem:[%s4066_s12 + $0x33] sm:$0xff] }
  0xe8   : > { %2065 = vmatprep.mubr.bf16.mxu0 %v4467_v54  ;;  %2199 = vmatpush1.bf16.msra.mxu0 %v4182_v2  ;;  %v818_v2 = vpack.c.bf16 %v791_v61, %v790_v59  ;;  %v600_v58 = vpack.c.bf16 %v571_v56, %v570_v53  ;;  %v822_v59 = vpack.c.bf16 %v799_v60, %v798_v57  ;;  %v726_v61 = vld [vmem:[%s4066_s12 + $0xf1] sm:$0xff]  ;;  %v578_v46 = vld [vmem:[%s4066_s12 + $0xc0] sm:$0xff]  ;;  %v2597_v53 = vld [vmem:[%s5493_s1 + $0x68] sm:$0xff] }
  0xe9   : > { %2200 = vmatprep.subr.bf16.mxu0 %v3946_v1  ;;  %3584 = vmatpush3.bf16.msra.mxu1 %v3932_v52  ;;  %v2596_v47 = vld [vmem:[%s5493_s1 + $0x60] sm:$0xff] }
  0xea   : > { %3585 = vmatprep.subr.bf16.mxu1 %v3933_v50  ;;  %v807_v56 = vld [vmem:[%s4066_s12 + $0x13a] sm:$0xff] }
  0xeb   : > { %v847_v28 = vld [vmem:[%s4066_s12 + $0x3b] sm:$0xff] }
  0xec   : > { %2201 = vmatpush1.bf16.msra.mxu0 %v4200_v10  ;;  %v565_v10 = vld [vmem:[%s4066_s12 + $0x58] sm:$0xff] }
  0xed   : > { %2202 = vmatprep.subr.bf16.mxu0 %v3946_v1  ;;  %3586 = vmatpush3.bf16.msra.mxu1 %v3933_v50  ;;  %v597_v21 = vpack.c.bf16 %v565_v10, %v564_v9  ;;  %v724_v50 = vld [vmem:[%s4066_s12 + $0xe1] sm:$0xff] }
  0xee   : > { %2283 = vmatmul.mubr.bf16.gmra.mrb[80].mxu1 %v4485_v3  ;;  %3587 = vmatprep.subr.bf16.mxu1 %v3934_v4  ;;  %v728_v10 = vld [vmem:[%s4066_s12 + $0x101] sm:$0xff] }
  0xef   : > { %2066 = vmatmul.mubr.bf16.gmra.mrb[8].mxu0 %v596_v5  ;;  %2290 = vmatprep.mubr.bf16.mxu1 %v818_v2  ;;  %v801_v5 = vld [vmem:[%s4066_s12 + $0x10a] sm:$0xff] }
  0xf0   : > { %2073 = vmatprep.mubr.bf16.mxu0 %v4490_v6  ;;  %2203 = vmatpush1.bf16.msra.mxu0 %v4211_v15  ;;  %v4514_v15 = vpack.c.bf16 %v639_v18, %v638_v16  ;;  %v802_v16 = vld [vmem:[%s4066_s12 + $0x112] sm:$0xff]  ;;  %v803_v18 = vld [vmem:[%s4066_s12 + $0x11a] sm:$0xff] }
  0xf1   : > { %2204 = vmatprep.subr.bf16.mxu0 %v3946_v1  ;;  %3588 = vmatpush3.bf16.msra.mxu1 %v3934_v4  ;;  %v800_v4 = vld [vmem:[%s4066_s12 + $0x102] sm:$0xff] }
  0xf2   : > { %3589 = vmatprep.subr.bf16.mxu1 %v3935_v8 }
  0xf4   : > { %2205 = vmatpush1.bf16.msra.mxu0 %v4228_v23  ;;  %v567_v23 = vld [vmem:[%s4066_s12 + $0x68] sm:$0xff] }
  0xf5   : > { %2206 = vmatprep.subr.bf16.mxu0 %v3946_v1  ;;  %3590 = vmatpush3.bf16.msra.mxu1 %v3935_v8  ;;  %v598_v39 = vpack.c.bf16 %v567_v23, %v566_v26  ;;  %v2585_v8 = vld [vmem:[%s5493_s1 + $0x8] sm:$0xff]  ;;  %v2592_v26 = vld [vmem:[%s5493_s1 + $0x40] sm:$0xff] }
  0xf6   : > { %2291 = vmatmul.mubr.bf16.gmra.mrb[84].mxu1 %v4509_v19  ;;  %3591 = vmatprep.subr.bf16.mxu1 %v3936_v20  ;;  %v2593_v23 = vld [vmem:[%s5493_s1 + $0x48] sm:$0xff] }
  0xf7   : > { %2074 = vmatmul.mubr.bf16.gmra.mrb[12].mxu0 %v597_v21  ;;  %2298 = vmatprep.mubr.bf16.mxu1 %v819_v24  ;;  %v2590_v21 = vld [vmem:[%s5493_s1 + $0x30] sm:$0xff]  ;;  %v824_v24 = vpack.c.bf16 %v803_v18, %v802_v16  ;;  %v2603_v16 = vld [vmem:[%s5493_s1 + $0x98] sm:$0xff] }
  0xf8   : > { %2081 = vmatprep.mubr.bf16.mxu0 %v4514_v15  ;;  %2207 = vmatpush1.bf16.msra.mxu0 %v4240_v29  ;;  %v568_v29 = vld [vmem:[%s4066_s12 + $0x70] sm:$0xff] }
  0xf9   : > { %2208 = vmatprep.subr.bf16.mxu0 %v3946_v1  ;;  %3592 = vmatpush3.bf16.msra.mxu1 %v3936_v20  ;;  %v599_v52 = vpack.c.bf16 %v569_v45, %v568_v29  ;;  %v4609_v20 = vpack.c.bf16 %v729_v13, %v728_v10  ;;  %v2602_v13 = vld [vmem:[%s5493_s1 + $0x90] sm:$0xff] }
  0xfa   : > { %3593 = vmatprep.subr.bf16.mxu1 %v3937_v25  ;;  %2627 = vperm.xlu0 %3864, %v2585_v8   ;;  %v2601_v8 = vld [vmem:[%s5493_s1 + $0x88] sm:$0xff] }
  0xfc   : > { %2209 = vmatpush1.bf16.msra.mxu0 %v4256_v36  ;;  %v4549_v36 = vpack.c.bf16 %v723_v44, %v722_v42  ;;  %v2595_v44 = vld [vmem:[%s5493_s1 + $0x58] sm:$0xff] }
  0xfd   : > { %2210 = vmatprep.subr.bf16.mxu0 %v3946_v1  ;;  %3594 = vmatpush3.bf16.msra.mxu1 %v3937_v25  ;;  %v576_v25 = vld [vmem:[%s4066_s12 + $0xb0] sm:$0xff] }
  0xfe   : > { %2299 = vmatmul.mubr.bf16.gmra.mrb[88].mxu1 %v4533_v38  ;;  %2642 = vperm.xlu0 %3864, %v2588_v12  }
  0xff   : > { %2082 = vmatmul.mubr.bf16.gmra.mrb[16].mxu0 %v598_v39  ;;  %2306 = vmatprep.mubr.bf16.mxu1 %v820_v40  ;;  %v2594_v40 = vld [vmem:[%s5493_s1 + $0x50] sm:$0xff] }
 0x100   : > { %2089 = vmatprep.mubr.bf16.mxu0 %v4535_v41  ;;  %2211 = vmatpush1.bf16.msra.mxu0 %v4269_v43  ;;  %v725_v43 = vld [vmem:[%s4066_s12 + $0xe9] sm:$0xff] }
 0x101   : > { %2212 = vmatprep.subr.bf16.mxu0 %v3946_v1 }
 0x102   : > { %2652 = vperm.xlu0 %3864, %v2590_v21   ;;  %v582_v21 = vld [vmem:[%s4066_s12 + $0xe0] sm:$0xff] }
 0x104   : > { %2213 = vmatpush1.bf16.msra.mxu0 %v4284_v49  ;;  %v4563_v49 = vpack.c.bf16 %v725_v43, %v724_v50  ;;  %v579_v50 = vld [vmem:[%s4066_s12 + $0xc8] sm:$0xff]  ;;  %v806_v43 = vld [vmem:[%s4066_s12 + $0x132] sm:$0xff] }
 0x105   : > { %2214 = vmatprep.subr.bf16.mxu0 %v3946_v1 }
 0x106   : > { %2307 = vmatmul.mubr.bf16.gmra.mrb[92].mxu1 %v4549_v36  ;;  %2662 = vperm.xlu0 %3864, %v2592_v26   ;;  %v583_v26 = vld [vmem:[%s4066_s12 + $0xe8] sm:$0xff] }
 0x107   : > { %2090 = vmatmul.mubr.bf16.gmra.mrb[20].mxu0 %v599_v52  ;;  %2314 = vmatprep.mubr.bf16.mxu1 %v821_v51  ;;  %v732_v52 = vld [vmem:[%s4066_s12 + $0x121] sm:$0xff]  ;;  %v733_v51 = vld [vmem:[%s4066_s12 + $0x129] sm:$0xff] }
 0x108   : > { %2097 = vmatprep.mubr.bf16.mxu0 %v4441_v33  ;;  %2215 = vmatpush1.bf16.msra.mxu0 %v4295_v55  ;;  %v572_v33 = vld [vmem:[%s4066_s12 + $0x90] sm:$0xff]  ;;  %v727_v55 = vld [vmem:[%s4066_s12 + $0xf9] sm:$0xff]  ;;  %v4660_v60 = vpack.c.bf16 %v733_v51, %v732_v52  ;;  %v2609_v52 = vld [vmem:[%s5493_s1 + $0xc8] sm:$0xff] }
 0x109   : > { %2216 = vmatprep.subr.bf16.mxu0 %v3946_v1  ;;  %v4583_v2 = vpack.c.bf16 %v727_v55, %v726_v61  ;;  %v2599_v55 = vld [vmem:[%s5493_s1 + $0x78] sm:$0xff] }
 0x10a   : > { %2672 = vperm.xlu0 %3864, %v2594_v40   ;;  %v882_v40 = vpack.c.bf16 %v847_v28, %v846_v27  ;;  %v585_v51 = vld [vmem:[%s4066_s12 + $0xf8] sm:$0xff]  ;;  %v2617_v27 = vld [vmem:[%s5493_s1 + $0x108] sm:$0xff] }
 0x10b   : > { %v589_v28 = vld [vmem:[%s4066_s12 + $0x118] sm:$0xff] }
 0x10c   : > { %2217 = vmatpush1.bf16.msra.mxu0 %v4312_v0  ;;  %v573_v0 = vld [vmem:[%s4066_s12 + $0x98] sm:$0xff] }
 0x10d   : > { %2218 = vmatprep.subr.bf16.mxu0 %v3946_v1  ;;  %v601_v9 = vpack.c.bf16 %v573_v0, %v572_v33  ;;  %v604_v33 = vpack.c.bf16 %v579_v50, %v578_v46  ;;  %v2600_v0 = vld [vmem:[%s5493_s1 + $0x80] sm:$0xff] }
 0x10e   : > { %2315 = vmatmul.mubr.bf16.gmra.mrb[96].mxu1 %v4563_v49  ;;  %2682 = vperm.xlu0 %3864, %v2596_v47   ;;  %v848_v46 = vld [vmem:[%s4066_s12 + $0x43] sm:$0xff]  ;;  %v849_v47 = vld [vmem:[%s4066_s12 + $0x4b] sm:$0xff]  ;;  %v851_v50 = vld [vmem:[%s4066_s12 + $0x5b] sm:$0xff] }
 0x10f   : > { %2098 = vmatmul.mubr.bf16.gmra.mrb[24].mxu0 %v600_v58  ;;  %2322 = vmatprep.mubr.bf16.mxu1 %v822_v59  ;;  %v2598_v59 = vld [vmem:[%s5493_s1 + $0x70] sm:$0xff] }
 0x110   : > { %2105 = vmatprep.mubr.bf16.mxu0 %v4461_v48  ;;  %2219 = vmatpush1.bf16.msra.mxu0 %v4323_v7  ;;  %v823_v48 = vpack.c.bf16 %v801_v5, %v800_v4  ;;  %v2587_v7 = vld [vmem:[%s5493_s1 + $0x18] sm:$0xff] }
 0x111   : > { %2220 = vmatprep.subr.bf16.mxu0 %v3946_v1  ;;  %2637 = vperm.xlu1 %3865, %v2587_v7   ;;  %v734_v4 = vld [vmem:[%s4066_s12 + $0x131] sm:$0xff]  ;;  %v735_v5 = vld [vmem:[%s4066_s12 + $0x139] sm:$0xff] }
 0x112   : > { %2692 = vperm.xlu0 %3864, %v2598_v59   ;;  %v809_v7 = vld [vmem:[%s4066_s12 + $0x14a] sm:$0xff]  ;;  %v4686_v12 = vpack.c.bf16 %v735_v5, %v734_v4 }
 0x113   : > { %v2610_v59 = vld [vmem:[%s5493_s1 + $0xd0] sm:$0xff]  ;;  %v852_v4 = vld [vmem:[%s4066_s12 + $0x63] sm:$0xff] }
 0x114   : > { %2221 = vmatpush1.bf16.msra.mxu0 %v4340_v17  ;;  %v575_v17 = vld [vmem:[%s4066_s12 + $0xa8] sm:$0xff] }
 0x115   : > { %2222 = vmatprep.subr.bf16.mxu0 %v3946_v1  ;;  %2647 = vperm.xlu1 %3865, %v2589_v14   ;;  %v853_v5 = vld [vmem:[%s4066_s12 + $0x6b] sm:$0xff] }
 0x116   : > { %2323 = vmatmul.mubr.bf16.gmra.mrb[100].mxu1 %v4583_v2  ;;  %2702 = vperm.xlu0 %3864, %v2600_v0   ;;  %v2612_v0 = vld [vmem:[%s5493_s1 + $0xe0] sm:$0xff] }
 0x117   : > { %2106 = vmatmul.mubr.bf16.gmra.mrb[28].mxu0 %v601_v9  ;;  %2330 = vmatprep.mubr.bf16.mxu1 %v823_v48  ;;  %v581_v9 = vld [vmem:[%s4066_s12 + $0xd8] sm:$0xff]  ;;  %v808_v48 = vld [vmem:[%s4066_s12 + $0x142] sm:$0xff] }
 0x118   : > { %2113 = vmatprep.mubr.bf16.mxu0 %v4485_v3  ;;  %2223 = vmatpush1.bf16.msra.mxu0 %v4349_v22  ;;  %v602_v3 = vpack.c.bf16 %v575_v17, %v574_v11  ;;  %v2591_v22 = vld [vmem:[%s5493_s1 + $0x38] sm:$0xff]  ;;  %v605_v14 = vpack.c.bf16 %v581_v9, %v580_v63  ;;  %v586_v63 = vld [vmem:[%s4066_s12 + $0x100] sm:$0xff]  ;;  %v587_v9 = vld [vmem:[%s4066_s12 + $0x108] sm:$0xff] }
 0x119   : > { %2224 = vmatprep.subr.bf16.mxu0 %v3946_v1  ;;  %2657 = vperm.xlu1 %3865, %v2591_v22   ;;  %v737_v22 = vld [vmem:[%s4066_s12 + $0x149] sm:$0xff] }
 0x11a   : > { %2712 = vperm.xlu0 %3864, %v2602_v13   ;;  %v885_v13 = vpack.c.bf16 %v853_v5, %v852_v4  ;;  %v865_v4 = vld [vmem:[%s4066_s12 + $0xcb] sm:$0xff]  ;;  %v593_v5 = vld [vmem:[%s4066_s12 + $0x138] sm:$0xff] }
 0x11c   : > { %2225 = vmatpush1.bf16.msra.mxu0 %v4368_v32  ;;  %v577_v32 = vld [vmem:[%s4066_s12 + $0xb8] sm:$0xff] }
 0x11d   : > { %2667 = vperm.xlu1 %3865, %v2593_v23   ;;  %v603_v29 = vpack.c.bf16 %v577_v32, %v576_v25  ;;  %v2605_v25 = vld [vmem:[%s5493_s1 + $0xa8] sm:$0xff] }
 0x11e   : > { %2331 = vmatmul.mubr.bf16.gmra.mrb[104].mxu1 %v4609_v20 }
 0x11f   : > { %2114 = vmatmul.mubr.bf16.gmra.mrb[32].mxu0 %v602_v3  ;;  %2338 = vmatprep.mubr.bf16.mxu1 %v824_v24  ;;  %v2604_v3 = vld [vmem:[%s5493_s1 + $0xa0] sm:$0xff] }
 0x120   : > { %2121 = vmatprep.mubr.bf16.mxu0 %v4509_v19  ;;  %v825_v19 = vpack.c.bf16 %v805_v31, %v804_v30  ;;  %v736_v24 = vld [vmem:[%s4066_s12 + $0x141] sm:$0xff]  ;;  %2722 = vperm.xlu0 %3864, %v2604_v3   ;;  %v2606_v31 = vld [vmem:[%s5493_s1 + $0xb0] sm:$0xff] }
 0x121   : > { %v4632_v34 = vpop.f32.mrb[0].mxu1  ;;  %2677 = vperm.xlu1 %3865, %v2595_v44   ;;  %v755_v32 = vpack.c.bf16 %v737_v22, %v736_v24  ;;  %v584_v44 = vld [vmem:[%s4066_s12 + $0xf0] sm:$0xff]  ;;  %v2616_v22 = vld [vmem:[%s5493_s1 + $0x100] sm:$0xff] }
 0x122   : > { %v1699_v39 = vpop.f32.mrb[1].mxu1  ;;  %v588_v24 = vld [vmem:[%s4066_s12 + $0x110] sm:$0xff] }
 0x123   : > { %v4639_v42 = vpop.f32.mrb[2].mxu1  ;;  %v606_v39 = vpack.c.bf16 %v583_v26, %v582_v21  ;;  %v2615_v21 = vld [vmem:[%s5493_s1 + $0xf8] sm:$0xff]  ;;  %v857_v26 = vld [vmem:[%s4066_s12 + $0x8b] sm:$0xff] }
 0x124   : > { %v1702_v45 = vpop.f32.mrb[3].mxu1  ;;  %2732 = vperm.xlu0 %3864, %v2606_v31  }
 0x125   : > { %2687 = vperm.xlu1 %3865, %v2597_v53   ;;  %v2608_v45 = vld [vmem:[%s5493_s1 + $0xc0] sm:$0xff]  ;;  %v850_v53 = vld [vmem:[%s4066_s12 + $0x53] sm:$0xff] }
 0x126   : > { %2339 = vmatmul.mubr.bf16.gmra.mrb[108].mxu1 %v4634_v35 }
 0x127   : > { %2122 = vmatmul.mubr.bf16.gmra.mrb[36].mxu0 %v603_v29  ;;  %2346 = vmatprep.mubr.bf16.mxu1 %v825_v19  ;;  %v2607_v29 = vld [vmem:[%s5493_s1 + $0xb8] sm:$0xff] }
 0x128   : > { %2129 = vmatprep.mubr.bf16.mxu0 %v4533_v38  ;;  %v826_v38 = vpack.c.bf16 %v807_v56, %v806_v43  ;;  %2742 = vperm.xlu0 %3864, %v2608_v45   ;;  %v883_v56 = vpack.c.bf16 %v849_v47, %v848_v46  ;;  %v590_v46 = vld [vmem:[%s4066_s12 + $0x120] sm:$0xff] }
 0x129   : > { %v4658_v57 = vpop.f32.mrb[4].mxu1  ;;  %2697 = vperm.xlu1 %3865, %v2599_v55   ;;  %v2611_v55 = vld [vmem:[%s5493_s1 + $0xd8] sm:$0xff]  ;;  %v860_v47 = vld [vmem:[%s4066_s12 + $0xa3] sm:$0xff] }
 0x12a   : > { %v1707_v58 = vpop.f32.mrb[5].mxu1 }
 0x12b   : > { %v4665_v61 = vpop.f32.mrb[6].mxu1 }
 0x12c   : > { %v1710_v62 = vpop.f32.mrb[7].mxu1  ;;  %2752 = vperm.xlu0 %3864, %v2610_v59  }
 0x12d   : > { %2707 = vperm.xlu1 %3865, %v2601_v8   ;;  %v2613_v8 = vld [vmem:[%s5493_s1 + $0xe8] sm:$0xff] }
 0x12e   : > { %2347 = vmatmul.mubr.bf16.gmra.mrb[112].mxu1 %v4660_v60 }
 0x12f   : > { %2130 = vmatmul.mubr.bf16.gmra.mrb[40].mxu0 %v604_v33  ;;  %2354 = vmatprep.mubr.bf16.mxu1 %v826_v38  ;;  %v607_v33 = vpack.c.bf16 %v585_v51, %v584_v44  ;;  %v884_v38 = vpack.c.bf16 %v851_v50, %v850_v53  ;;  %v591_v51 = vld [vmem:[%s4066_s12 + $0x128] sm:$0xff]  ;;  %v862_v53 = vld [vmem:[%s4066_s12 + $0xb3] sm:$0xff]  ;;  %v863_v50 = vld [vmem:[%s4066_s12 + $0xbb] sm:$0xff] }
 0x130   : > { %2137 = vmatprep.mubr.bf16.mxu0 %v4549_v36  ;;  %v827_v36 = vpack.c.bf16 %v809_v7, %v808_v48  ;;  %v854_v48 = vld [vmem:[%s4066_s12 + $0x73] sm:$0xff]  ;;  %v855_v7 = vld [vmem:[%s4066_s12 + $0x7b] sm:$0xff]  ;;  %2762 = vperm.xlu0 %3864, %v2612_v0   ;;  %v864_v0 = vld [vmem:[%s4066_s12 + $0xc3] sm:$0xff] }
 0x131   : > { %v4684_v11 = vpop.f32.mrb[8].mxu1  ;;  %2717 = vperm.xlu1 %3865, %v2603_v16   ;;  %v608_v16 = vpack.c.bf16 %v587_v9, %v586_v63  ;;  %v592_v63 = vld [vmem:[%s4066_s12 + $0x130] sm:$0xff]  ;;  %v867_v9 = vld [vmem:[%s4066_s12 + $0xdb] sm:$0xff] }
 0x132   : > { %5501 = vst [vmem:[#allocation3_spill] sm:$0xff] %v4684_v11  ;;  %v1715_v10 = vpop.f32.mrb[9].mxu1 }
 0x133   : > { %v4691_v17 = vpop.f32.mrb[10].mxu1 }
 0x134   : > { %5502 = vst [vmem:[#allocation4_spill] sm:$0xff] %v4691_v17  ;;  %v1718_v18 = vpop.f32.mrb[11].mxu1 }
 0x135   : > { %2727 = vperm.xlu1 %3865, %v2605_v25   ;;  %v886_v18 = vpack.c.bf16 %v855_v7, %v854_v48  ;;  %v856_v25 = vld [vmem:[%s4066_s12 + $0x83] sm:$0xff]  ;;  %v774_v48 = vld [vmem:[%s4066_s12 + $0x32] sm:$0xff]  ;;  %v775_v7 = vld [vmem:[%s4066_s12 + $0x3a] sm:$0xff] }
 0x136   : > { %2355 = vmatmul.mubr.bf16.gmra.mrb[116].mxu1 %v4686_v12 }
 0x137   : > { %2138 = vmatmul.mubr.bf16.gmra.mrb[44].mxu0 %v605_v14  ;;  %2362 = vmatprep.mubr.bf16.mxu1 %v827_v36  ;;  %v2614_v36 = vld [vmem:[%s5493_s1 + $0xf0] sm:$0xff] }
 0x138   : > { %2145 = vmatprep.mubr.bf16.mxu0 %v4563_v49  ;;  %2772 = vperm.xlu0 %3864, %v2614_v36  }
 0x139   : > { %v4710_v23 = vpop.f32.mrb[12].mxu1  ;;  %2737 = vperm.xlu1 %3865, %v2607_v29   ;;  %v2618_v29 = vld [vmem:[%s5493_s1 + $0x110] sm:$0xff] }
 0x13a   : > { %5503 = vst [vmem:[#allocation5_spill] sm:$0xff] %v4710_v23  ;;  %v1723_v30 = vpop.f32.mrb[13].mxu1 }
 0x13b   : > { %v4715_v49 = vpop.f32.mrb[14].mxu1  ;;  %v859_v30 = vld [vmem:[%s4066_s12 + $0x9b] sm:$0xff] }
 0x13c   : > { %5504 = vst [vmem:[#allocation6_spill] sm:$0xff] %v4715_v49  ;;  %v1726_v19 = vpop.f32.mrb[15].mxu1  ;;  %2782 = vperm.xlu0 %3864, %v2616_v22   ;;  %v869_v22 = vld [vmem:[%s4066_s12 + $0xeb] sm:$0xff] }
 0x13d   : > { %2747 = vperm.xlu1 %3865, %v2609_v52   ;;  %v861_v52 = vld [vmem:[%s4066_s12 + $0xab] sm:$0xff] }
 0x13e   : > { %2363 = vmatmul.mubr.bf16.gmra.mrb[120].mxu1 %v755_v32  ;;  %v858_v32 = vld [vmem:[%s4066_s12 + $0x93] sm:$0xff] }
 0x13f   : > { %2146 = vmatmul.mubr.bf16.gmra.mrb[48].mxu0 %v606_v39  ;;  %3595 = vmatprep.mubr.bf16.mxu1 %v882_v40  ;;  %v887_v39 = vpack.c.bf16 %v857_v26, %v856_v25  ;;  %v888_v19 = vpack.c.bf16 %v859_v30, %v858_v32  ;;  %v870_v25 = vld [vmem:[%s4066_s12 + $0xf3] sm:$0xff]  ;;  %v871_v26 = vld [vmem:[%s4066_s12 + $0xfb] sm:$0xff] }
 0x140   : > { %2153 = vmatprep.mubr.bf16.mxu0 %v4583_v2  ;;  %2792 = vperm.xlu0 %3864, %v2618_v29  }
 0x141   : > { %v4733_v43 = vpop.f32.mrb[16].mxu1  ;;  %2757 = vperm.xlu1 %3865, %v2611_v55  }
 0x142   : > { %5505 = vst [vmem:[#allocation7_spill] sm:$0xff] %v4733_v43  ;;  %v1731_v58 = vpop.f32.mrb[17].mxu1 }
 0x143   : > { %v4738_v2 = vpop.f32.mrb[18].mxu1  ;;  %v889_v58 = vpack.c.bf16 %v861_v52, %v860_v47  ;;  %v874_v47 = vld [vmem:[%s4066_s12 + $0x113] sm:$0xff]  ;;  %v875_v52 = vld [vmem:[%s4066_s12 + $0x11b] sm:$0xff] }
 0x144   : > { %5506 = vst [vmem:[#allocation8_spill] sm:$0xff] %v4738_v2  ;;  %v1734_v62 = vpop.f32.mrb[19].mxu1 }
 0x145   : > { %2767 = vperm.xlu1 %3865, %v2613_v8   ;;  %v866_v8 = vld [vmem:[%s4066_s12 + $0xd3] sm:$0xff] }
 0x146   : > { %3596 = vmatmul.mubr.bf16.vlgmr.msra.gmra.mrb[124].mxu1 %v883_v56 }
 0x147   : > { %2154 = vmatmul.mubr.bf16.gmra.mrb[52].mxu0 %v607_v33  ;;  %3599 = vmatprep.mubr.bf16.mxu1 %v884_v38  ;;  %v2619_v33 = vld [vmem:[%s5493_s1 + $0x118] sm:$0xff]  ;;  %v610_v38 = vpack.c.bf16 %v591_v51, %v590_v46  ;;  %v873_v46 = vld [vmem:[%s4066_s12 + $0x10b] sm:$0xff] }
 0x148   : > { %2161 = vmatprep.mubr.bf16.mxu0 %v4609_v20  ;;  %v778_v51 = vld [vmem:[%s4066_s12 + $0x52] sm:$0xff] }
 0x149   : > { %v4756_v10 = vpop.f32.mrb[20].mxu1  ;;  %2777 = vperm.xlu1 %3865, %v2615_v21  }
 0x14a   : > { %v1739_v14 = vpop.f32.mrb[21].mxu1 }
 0x14b   : > { %v4761_v20 = vpop.f32.mrb[22].mxu1  ;;  %v891_v14 = vpack.c.bf16 %v865_v4, %v864_v0  ;;  %v878_v0 = vld [vmem:[%s4066_s12 + $0x133] sm:$0xff]  ;;  %v879_v4 = vld [vmem:[%s4066_s12 + $0x13b] sm:$0xff] }
 0x14c   : > { %v1742_v3 = vpop.f32.mrb[23].mxu1 }
 0x14d   : > { %2787 = vperm.xlu1 %3865, %v2617_v27   ;;  %v776_v27 = vld [vmem:[%s4066_s12 + $0x42] sm:$0xff] }
 0x14e   : > { %3600 = vmatmul.mubr.bf16.gmra.mrb[128].mxu1 %v885_v13 }
 0x14f   : > { %2162 = vmatmul.mubr.bf16.gmra.mrb[56].mxu0 %v608_v16  ;;  %3603 = vmatprep.mubr.bf16.mxu1 %v886_v18  ;;  %v611_v16 = vpack.c.bf16 %v593_v5, %v592_v63  ;;  %v892_v18 = vpack.c.bf16 %v867_v9, %v866_v8  ;;  %v877_v63 = vld [vmem:[%s4066_s12 + $0x12b] sm:$0xff]  ;;  %v780_v5 = vld [vmem:[%s4066_s12 + $0x62] sm:$0xff] }
 0x150   : > { %2169 = vmatprep.mubr.bf16.mxu0 %v4634_v35  ;;  %v609_v35 = vpack.c.bf16 %v589_v28, %v588_v24  ;;  %v868_v24 = vld [vmem:[%s4066_s12 + $0xe3] sm:$0xff] }
 0x151   : > { %v4779_v31 = vpop.f32.mrb[24].mxu1  ;;  %2797 = vperm.xlu1 %3865, %v2619_v33   ;;  %v777_v28 = vld [vmem:[%s4066_s12 + $0x4a] sm:$0xff]  ;;  %v893_v30 = vpack.c.bf16 %v869_v22, %v868_v24  ;;  %v896_v33 = vpack.c.bf16 %v875_v52, %v874_v47  ;;  %v783_v24 = vld [vmem:[%s4066_s12 + $0x7a] sm:$0xff] }
 0x152   : > { %v1747_v40 = vpop.f32.mrb[25].mxu1  ;;  %v781_v8 = vld [vmem:[%s4066_s12 + $0x6a] sm:$0xff] }
 0x153   : > { %v4784_v44 = vpop.f32.mrb[26].mxu1  ;;  %v894_v40 = vpack.c.bf16 %v871_v26, %v870_v25 }
 0x154   : > { %v1750_v45 = vpop.f32.mrb[27].mxu1 }
 0x155   : > { %v872_v45 = vld [vmem:[%s4066_s12 + $0x103] sm:$0xff] }
 0x156   : > { %3604 = vmatmul.mubr.bf16.gmra.mrb[132].mxu1 %v887_v39 }
 0x157   : > { %2170 = vmatmul.mubr.bf16.gmra.mrb[60].mxu0 %v609_v35  ;;  %3607 = vmatprep.mubr.bf16.mxu1 %v888_v19  ;;  %v811_v35 = vpack.c.bf16 %v777_v28, %v776_v27 }
 0x158   : > { %2177 = vmatprep.mubr.bf16.mxu0 %v4660_v60  ;;  %v890_v60 = vpack.c.bf16 %v863_v50, %v862_v53  ;;  %v779_v53 = vld [vmem:[%s4066_s12 + $0x5a] sm:$0xff] }
 0x159   : > { %v4793_v56 = vpop.f32.mrb[28].mxu1 }
 0x15a   : > { %v1755_v59 = vpop.f32.mrb[29].mxu1 }
 0x15b   : > { %v4798_v55 = vpop.f32.mrb[30].mxu1 }
 0x15c   : > { %v1758_v62 = vpop.f32.mrb[31].mxu1 }
 0x15d   : > { %v876_v62 = vld [vmem:[%s4066_s12 + $0x123] sm:$0xff] }
 0x15e   : > { %3608 = vmatmul.mubr.bf16.gmra.mrb[136].mxu1 %v889_v58  ;;  %v895_v58 = vpack.c.bf16 %v873_v46, %v872_v45 }
 0x15f   : > { %2178 = vmatmul.mubr.bf16.gmra.mrb[64].mxu0 %v610_v38  ;;  %3611 = vmatprep.mubr.bf16.mxu1 %v890_v60  ;;  %v812_v38 = vpack.c.bf16 %v779_v53, %v778_v51 }
 0x160   : > { %2185 = vmatprep.mubr.bf16.mxu0 %v4686_v12  ;;  %v810_v12 = vpack.c.bf16 %v775_v7, %v774_v48  ;;  %v897_v48 = vpack.c.bf16 %v877_v63, %v876_v62 }
 0x161   : > { %v4809_v13 = vpop.f32.mrb[32].mxu1 }
 0x162   : > { %v1763_v36 = vpop.f32.mrb[33].mxu1 }
 0x163   : > { %v4811_v21 = vpop.f32.mrb[34].mxu1 }
 0x164   : > { %v1766_v3 = vpop.f32.mrb[35].mxu1 }
 0x165   : > { %v782_v3 = vld [vmem:[%s4066_s12 + $0x72] sm:$0xff] }
 0x166   : > { %3612 = vmatmul.mubr.bf16.gmra.mrb[140].mxu1 %v891_v14  ;;  %v898_v14 = vpack.c.bf16 %v879_v4, %v878_v0  ;;  %v814_v28 = vpack.c.bf16 %v783_v24, %v782_v3 }
 0x167   : > { %2186 = vmatmul.mubr.bf16.gmra.mrb[68].mxu0 %v611_v16  ;;  %3615 = vmatprep.mubr.bf16.mxu1 %v892_v18  ;;  %v880_v18 = vld [vmem:[%s4066_s12 + $0x143] sm:$0xff] }
 0x168   : > { %2226 = vmatprep.mubr.bf16.mxu0 %v810_v12  ;;  %v881_v12 = vld [vmem:[%s4066_s12 + $0x14b] sm:$0xff]  ;;  %s3854_s12 = smul.u32 180, %s5550_s22 }
 0x169   : > { %v4819_v32 = vpop.f32.mrb[36].mxu1  ;;  %v899_v25 = vpack.c.bf16 %v881_v12, %v880_v18 }
 0x16a   : > { %v1771_v39 = vpop.f32.mrb[37].mxu1  ;;  %s4882_s9 = scalar_lea.vmem %s5496_s4, %s3854_s12 }
 0x16b   : > { %v4821_v29 = vpop.f32.mrb[38].mxu1  ;;  %2970 = vst [vmem:[%s4882_s9 + $0x38] sm:$0xf] %v3946_v1  ;;  %2971 = vst [vmem:[%s4882_s9 + $0x3c] sm:$0xf] %v3946_v1 }
 0x16c   : > { %v1774_v19 = vpop.f32.mrb[39].mxu1  ;;  %2956 = vst [vmem:[%s4882_s9] sm:$0xf] %v3946_v1  ;;  %2957 = vst [vmem:[%s4882_s9 + $0x4] sm:$0xf] %v3946_v1 }
 0x16d   : > { %2958 = vst [vmem:[%s4882_s9 + $0x8] sm:$0xf] %v3946_v1  ;;  %2959 = vst [vmem:[%s4882_s9 + $0xc] sm:$0xf] %v3946_v1 }
 0x16e   : > { %3616 = vmatmul.mubr.bf16.gmra.mrb[144].mxu1 %v893_v30  ;;  %2960 = vst [vmem:[%s4882_s9 + $0x10] sm:$0xf] %v3946_v1  ;;  %2961 = vst [vmem:[%s4882_s9 + $0x14] sm:$0xf] %v3946_v1 }
 0x16f   : > { %2227 = vmatmul.mubr.bf16.vlgmr.msra.gmra.mrb[0].mxu0 %v4443_v37  ;;  %3619 = vmatprep.mubr.bf16.mxu1 %v894_v40  ;;  %2962 = vst [vmem:[%s4882_s9 + $0x18] sm:$0xf] %v3946_v1  ;;  %2963 = vst [vmem:[%s4882_s9 + $0x1c] sm:$0xf] %v3946_v1 }
 0x170   : > { %2234 = vmatprep.mubr.bf16.mxu0 %v811_v35  ;;  %2964 = vst [vmem:[%s4882_s9 + $0x20] sm:$0xf] %v3946_v1  ;;  %2965 = vst [vmem:[%s4882_s9 + $0x24] sm:$0xf] %v3946_v1 }
 0x171   : > { %v4830_v50 = vpop.f32.mrb[40].mxu1  ;;  %2966 = vst [vmem:[%s4882_s9 + $0x28] sm:$0xf] %v3946_v1  ;;  %2967 = vst [vmem:[%s4882_s9 + $0x2c] sm:$0xf] %v3946_v1 }
 0x172   : > { %v1779_v59 = vpop.f32.mrb[41].mxu1  ;;  %2968 = vst [vmem:[%s4882_s9 + $0x30] sm:$0xf] %v3946_v1  ;;  %2969 = vst [vmem:[%s4882_s9 + $0x34] sm:$0xf] %v3946_v1 }
 0x173   : > { %v4832_v37 = vpop.f32.mrb[42].mxu1  ;;  %2972 = vst [vmem:[%s4882_s9 + $0x40] sm:$0xf] %v3946_v1  ;;  %2973 = vst [vmem:[%s4882_s9 + $0x44] sm:$0xf] %v3946_v1 }
 0x174   : > { %v1782_v60 = vpop.f32.mrb[43].mxu1  ;;  %2974 = vst [vmem:[%s4882_s9 + $0x48] sm:$0xf] %v3946_v1  ;;  %2975 = vst [vmem:[%s4882_s9 + $0x4c] sm:$0xf] %v3946_v1 }
 0x175   : > { %2976 = vst [vmem:[%s4882_s9 + $0x50] sm:$0xf] %v3946_v1  ;;  %2977 = vst [vmem:[%s4882_s9 + $0x54] sm:$0xf] %v3946_v1 }
 0x176   : > { %3620 = vmatmul.mubr.bf16.gmra.mrb[148].mxu1 %v895_v58  ;;  %2978 = vst [vmem:[%s4882_s9 + $0x58] sm:$0xf] %v3946_v1  ;;  %2979 = vst [vmem:[%s4882_s9 + $0x5c] sm:$0xf] %v3946_v1 }
 0x177   : > { %2235 = vmatmul.mubr.bf16.gmra.mrb[4].mxu0 %v4467_v54  ;;  %3623 = vmatprep.mubr.bf16.mxu1 %v896_v33  ;;  %v813_v54 = vpack.c.bf16 %v781_v8, %v780_v5  ;;  %2980 = vst [vmem:[%s4882_s9 + $0x60] sm:$0xf] %v3946_v1  ;;  %2981 = vst [vmem:[%s4882_s9 + $0x64] sm:$0xf] %v3946_v1 }
 0x178   : > { %2242 = vmatprep.mubr.bf16.mxu0 %v812_v38  ;;  %2982 = vst [vmem:[%s4882_s9 + $0x68] sm:$0xf] %v3946_v1  ;;  %2983 = vst [vmem:[%s4882_s9 + $0x6c] sm:$0xf] %v3946_v1 }
 0x179   : > { %v4841_v9 = vpop.f32.mrb[44].mxu1  ;;  %2984 = vst [vmem:[%s4882_s9 + $0x70] sm:$0xf] %v3946_v1  ;;  %2985 = vst [vmem:[%s4882_s9 + $0x74] sm:$0xf] %v3946_v1 }
 0x17a   : > { %v1787_v7 = vpop.f32.mrb[45].mxu1  ;;  %2986 = vst [vmem:[%s4882_s9 + $0x78] sm:$0xf] %v3946_v1  ;;  %2987 = vst [vmem:[%s4882_s9 + $0x7c] sm:$0xf] %v3946_v1 }
 0x17b   : > { %v4843_v36 = vpop.f32.mrb[46].mxu1  ;;  %2988 = vst [vmem:[%s4882_s9 + $0x80] sm:$0xf] %v3946_v1  ;;  %2989 = vst [vmem:[%s4882_s9 + $0x84] sm:$0xf] %v3946_v1 }
 0x17c   : > { %v1790_v16 = vpop.f32.mrb[47].mxu1  ;;  %2990 = vst [vmem:[%s4882_s9 + $0x88] sm:$0xf] %v3946_v1  ;;  %2991 = vst [vmem:[%s4882_s9 + $0x8c] sm:$0xf] %v3946_v1 }
 0x17d   : > { %2992 = vst [vmem:[%s4882_s9 + $0x90] sm:$0xf] %v3946_v1  ;;  %2993 = vst [vmem:[%s4882_s9 + $0x94] sm:$0xf] %v3946_v1 }
 0x17e   : > { %3624 = vmatmul.mubr.bf16.gmra.mrb[152].mxu1 %v897_v48  ;;  %2994 = vst [vmem:[%s4882_s9 + $0x98] sm:$0xf] %v3946_v1  ;;  %2995 = vst [vmem:[%s4882_s9 + $0x9c] sm:$0xf] %v3946_v1 }
 0x17f   : > { %2243 = vmatmul.mubr.bf16.gmra.mrb[8].mxu0 %v4490_v6  ;;  %3627 = vmatprep.mubr.bf16.mxu1 %v898_v14  ;;  %2996 = vst [vmem:[%s4882_s9 + $0xa0] sm:$0xf] %v3946_v1  ;;  %2997 = vst [vmem:[%s4882_s9 + $0xa4] sm:$0xf] %v3946_v1 }
 0x180   : > { %2250 = vmatprep.mubr.bf16.mxu0 %v813_v54  ;;  %2998 = vst [vmem:[%s4882_s9 + $0xa8] sm:$0xf] %v3946_v1  ;;  %2999 = vst [vmem:[%s4882_s9 + $0xac] sm:$0xf] %v3946_v1 }
 0x181   : > { %v4850_v22 = vpop.f32.mrb[48].mxu1 }
 0x182   : > { %v1795_v26 = vpop.f32.mrb[49].mxu1 }
 0x183   : > { %v4852_v27 = vpop.f32.mrb[50].mxu1 }
 0x184   : > { %v1798_v30 = vpop.f32.mrb[51].mxu1 }
 0x186   : > { %3628 = vmatmul.mubr.bf16.gmra.mrb[156].mxu1 %v899_v25 }
 0x187   : > { %2251 = vmatmul.mubr.bf16.gmra.mrb[12].mxu0 %v4514_v15 }
 0x188   : > { %2258 = vmatprep.mubr.bf16.mxu0 %v814_v28 }
 0x189   : > { %v4855_v39 = vpop.f32.mrb[52].mxu1 }
 0x18a   : > { %v1803_v6 = vpop.f32.mrb[53].mxu1 }
 0x18b   : > { %v4857_v40 = vpop.f32.mrb[54].mxu1 }
 0x18c   : > { %v1806_v35 = vpop.f32.mrb[55].mxu1 }
 0x18f   : > { %2259 = vmatmul.mubr.bf16.gmra.mrb[16].mxu0 %v4535_v41 }
 0x191   : > { %v4860_v19 = vpop.f32.mrb[56].mxu1 }
 0x192   : > { %v1811_v45 = vpop.f32.mrb[57].mxu1 }
 0x193   : > { %v4862_v46 = vpop.f32.mrb[58].mxu1  ;;  %v4985_v45 = vld [vmem:[%s5495_s3] ss:$0 sm:$0xff] }
 0x194   : > { %v1814_v47 = vpop.f32.mrb[59].mxu1 }
 0x195   : > { %v1738_v47 = vadd.f32 %v4985_v45, %v4756_v10 }
 0x199   : > { %v4864_v52 = vpop.f32.mrb[60].mxu1 }
 0x19a   : > { %v1819_v51 = vpop.f32.mrb[61].mxu1 }
 0x19b   : > { %v4866_v15 = vpop.f32.mrb[62].mxu1 }
 0x19c   : > { %v1822_v53 = vpop.f32.mrb[63].mxu1 }
 0x19d   : > { %v4991_v53 = vpop.permute.xlu0 %2622 }
 0x1a1   : > { %v4868_v58 = vpop.f32.mrb[64].mxu1 }
 0x1a2   : > { %v1827_v59 = vpop.f32.mrb[65].mxu1 }
 0x1a3   : > { %v4870_v33 = vpop.f32.mrb[66].mxu1 }
 0x1a4   : > { %v1830_v38 = vpop.f32.mrb[67].mxu1 }
 0x1a9   : > { %v4872_v41 = vpop.f32.mrb[68].mxu1 }
 0x1aa   : > { %v1835_v60 = vpop.f32.mrb[69].mxu1 }
 0x1ab   : > { %v4874_v62 = vpop.f32.mrb[70].mxu1  ;;  %v1741_v60 = vadd.f32 %v4985_v45, %v4761_v20 }
 0x1ac   : > { %v1838_v63 = vpop.f32.mrb[71].mxu1 }
 0x1b1   : > { %v4877_v0 = vpop.f32.mrb[72].mxu1 }
 0x1b2   : > { %v2270_v4 = vpop.f32.mrb[73].mxu1 }
 0x1b3   : > { %v4884_v5 = vpop.f32.mrb[74].mxu1 }
 0x1b4   : > { %v2273_v8 = vpop.f32.mrb[75].mxu1 }
 0x1b9   : > { %v2276_v48 = vpop.f32.mrb[76].mxu1 }
 0x1ba   : > { %v2278_v7 = vpop.f32.mrb[77].mxu1 }
 0x1bb   : > { %v2279_v14 = vpop.f32.mrb[78].mxu1 }
 0x1bc   : > { %v2281_v54 = vpop.f32.mrb[79].mxu1 }
 0x1c1   : > { %v2284_v16 = vpop.f32.mrb[80].mxu1 }
 0x1c2   : > { %v2286_v18 = vpop.f32.mrb[81].mxu1 }
 0x1c3   : > { %v2287_v12 = vpop.f32.mrb[82].mxu1 }
 0x1c4   : > { %v2289_v3 = vpop.f32.mrb[83].mxu1 }
 0x1c9   : > { %v4974_v24 = vpop.f32.mrb[84].mxu1 }
 0x1ca   : > { %v2294_v25 = vpop.f32.mrb[85].mxu1 }
 0x1cb   : > { %v4976_v26 = vpop.f32.mrb[86].mxu1 }
 0x1cc   : > { %v2297_v28 = vpop.f32.mrb[87].mxu1 }
 0x1cd   : > { %v5003_v28 = vpop.permute.xlu1 %2632 }
 0x1ce   : > { %5507 = vst [vmem:[#allocation9_spill] sm:$0xff] %v5003_v28 }
 0x1d1   : > { %v4978_v30 = vpop.f32.mrb[88].mxu1 }
 0x1d2   : > { %v2302_v6 = vpop.f32.mrb[89].mxu1 }
 0x1d3   : > { %v4980_v35 = vpop.f32.mrb[90].mxu1  ;;  %v1746_v6 = vadd.f32 %v4985_v45, %v4779_v31 }
 0x1d4   : > { %v2305_v1 = vpop.f32.mrb[91].mxu1 }
 0x1d5   : > { %v5009_v1 = vpop.permute.xlu0 %2627 }
 0x1d9   : > { %v4989_v51 = vpop.f32.mrb[92].mxu1 }
 0x1da   : > { %v2091_v59 = vpop.f32.mrb[20].mxu0  ;;  %v2310_v38 = vpop.f32.mrb[93].mxu1 }
 0x1db   : > { %v3684_v63 = vadd.f32 %v2091_v59, %v1738_v47  ;;  %v2093_v4 = vpop.f32.mrb[21].mxu0  ;;  %v4995_v8 = vpop.f32.mrb[94].mxu1  ;;  %v1749_v38 = vadd.f32 %v4985_v45, %v4784_v44 }
 0x1dc   : > { %v2094_v7 = vpop.f32.mrb[22].mxu0  ;;  %v2313_v54 = vpop.f32.mrb[95].mxu1 }
 0x1dd   : > { %v3687_v18 = vadd.f32 %v2094_v7, %v1741_v60  ;;  %v4998_v3 = vadd.f32 %v3684_v63, %v4877_v0  ;;  %v2096_v10 = vpop.f32.mrb[23].mxu0  ;;  %v5025_v44 = vpop.permute.xlu0 %2642 }
 0x1de   : > { %v5019_v10 = vpop.permute.xlu1 %2637  ;;  %5509 = vst [vmem:[#allocation11_spill] sm:$0xff] %v5025_v44 }
 0x1df   : > { %v5001_v25 = vadd.f32 %v3687_v18, %v4884_v5  ;;  %5508 = vst [vmem:[#allocation10_spill] sm:$0xff] %v5019_v10 }
 0x1e1   : > { %v5007_v20 = vpop.f32.mrb[96].mxu1 }
 0x1e2   : > { %v2099_v47 = vpop.f32.mrb[24].mxu0  ;;  %v2318_v59 = vpop.f32.mrb[97].mxu1 }
 0x1e3   : > { %v3690_v0 = vadd.f32 %v2099_v47, %v1746_v6  ;;  %v2101_v60 = vpop.f32.mrb[25].mxu0  ;;  %v5013_v63 = vpop.f32.mrb[98].mxu1  ;;  %v1754_v59 = vadd.f32 %v4985_v45, %v4793_v56 }
 0x1e4   : > { %v2102_v5 = vpop.f32.mrb[26].mxu0  ;;  %v2321_v4 = vpop.f32.mrb[99].mxu1  ;;  %v1757_v60 = vadd.f32 %v4985_v45, %v4798_v55 }
 0x1e5   : > { %v3693_v7 = vadd.f32 %v2102_v5, %v1749_v38  ;;  %v5015_v54 = vadd.f32 %v3690_v0, %v2276_v48  ;;  %v2104_v18 = vpop.f32.mrb[27].mxu0  ;;  %v5035_v43 = vpop.permute.xlu1 %2647 }
 0x1e6   : > { %5510 = vst [vmem:[#allocation12_spill] sm:$0xff] %v5035_v43  ;;  %v5041_v55 = vpop.permute.xlu0 %2652 }
 0x1e7   : > { %v5017_v31 = vadd.f32 %v3693_v7, %v2279_v14  ;;  %5511 = vst [vmem:[#allocation13_spill] sm:$0xff] %v5041_v55 }
 0x1e9   : > { %v5023_v2 = vpop.f32.mrb[100].mxu1  ;;  %v5053_v55 = vpop.permute.xlu1 %2657 }
 0x1ea   : > { %v2107_v6 = vpop.f32.mrb[28].mxu0  ;;  %v2326_v47 = vpop.f32.mrb[101].mxu1  ;;  %5512 = vst [vmem:[#allocation14_spill] sm:$0xff] %v5053_v55 }
 0x1eb   : > { %v3696_v38 = vadd.f32 %v2107_v6, %v1754_v59  ;;  %v2109_v48 = vpop.f32.mrb[29].mxu0  ;;  %v5029_v0 = vpop.f32.mrb[102].mxu1  ;;  %v1762_v47 = vadd.f32 %v4985_v45, %v4809_v13 }
 0x1ec   : > { %v2110_v14 = vpop.f32.mrb[30].mxu0  ;;  %v2329_v5 = vpop.f32.mrb[103].mxu1  ;;  %v1765_v48 = vadd.f32 %v4985_v45, %v4811_v21 }
 0x1ed   : > { %v3699_v4 = vadd.f32 %v2110_v14, %v1757_v60  ;;  %v5031_v7 = vadd.f32 %v3696_v38, %v2284_v16  ;;  %v2112_v18 = vpop.f32.mrb[31].mxu0 }
 0x1ef   : > { %v5033_v56 = vadd.f32 %v3699_v4, %v2287_v12 }
 0x1f1   : > { %v5039_v49 = vpop.f32.mrb[104].mxu1 }
 0x1f2   : > { %v2115_v59 = vpop.f32.mrb[32].mxu0  ;;  %v2334_v6 = vpop.f32.mrb[105].mxu1 }
 0x1f3   : > { %v3702_v60 = vadd.f32 %v2115_v59, %v1762_v47  ;;  %v2117_v16 = vpop.f32.mrb[33].mxu0  ;;  %v5045_v38 = vpop.f32.mrb[106].mxu1  ;;  %v1770_v6 = vadd.f32 %v4985_v45, %v4819_v32 }
 0x1f4   : > { %v2118_v12 = vpop.f32.mrb[34].mxu0  ;;  %v2337_v14 = vpop.f32.mrb[107].mxu1 }
 0x1f5   : > { %v3705_v5 = vadd.f32 %v2118_v12, %v1765_v48  ;;  %v5048_v4 = vadd.f32 %v3702_v60, %v4974_v24  ;;  %v2120_v13 = vpop.f32.mrb[35].mxu0  ;;  %v5059_v47 = vpop.permute.xlu0 %2662  ;;  %v1773_v48 = vadd.f32 %v4985_v45, %v4821_v29 }
 0x1f6   : > { %5513 = vst [vmem:[#allocation15_spill] sm:$0xff] %v5059_v47  ;;  %v5071_v47 = vpop.permute.xlu1 %2667 }
 0x1f7   : > { %v5051_v18 = vadd.f32 %v3705_v5, %v4976_v26  ;;  %5514 = vst [vmem:[#allocation16_spill] sm:$0xff] %v5071_v47 }
 0x1f9   : > { %v5057_v21 = vpop.f32.mrb[108].mxu1 }
 0x1fa   : > { %v2123_v59 = vpop.f32.mrb[36].mxu0  ;;  %v2342_v16 = vpop.f32.mrb[109].mxu1 }
 0x1fb   : > { %v3708_v24 = vadd.f32 %v2123_v59, %v1770_v6  ;;  %v2125_v60 = vpop.f32.mrb[37].mxu0  ;;  %v5063_v12 = vpop.f32.mrb[110].mxu1  ;;  %v1778_v16 = vadd.f32 %v4985_v45, %v4830_v50 }
 0x1fc   : > { %v2126_v26 = vpop.f32.mrb[38].mxu0  ;;  %v2345_v14 = vpop.f32.mrb[111].mxu1 }
 0x1fd   : > { %v3711_v5 = vadd.f32 %v2126_v26, %v1773_v48  ;;  %v5066_v13 = vadd.f32 %v3708_v24, %v4978_v30  ;;  %v2128_v32 = vpop.f32.mrb[39].mxu0  ;;  %v5077_v6 = vpop.permute.xlu0 %2672  ;;  %v1781_v48 = vadd.f32 %v4985_v45, %v4832_v37 }
 0x1fe   : > { %v5089_v43 = vpop.permute.xlu1 %2677 }
 0x1ff   : > { %v5069_v55 = vadd.f32 %v3711_v5, %v4980_v35 }
 0x201   : > { %v5075_v29 = vpop.f32.mrb[112].mxu1 }
 0x202   : > { %v2131_v59 = vpop.f32.mrb[40].mxu0  ;;  %v2350_v60 = vpop.f32.mrb[113].mxu1 }
 0x203   : > { %v3714_v30 = vadd.f32 %v2131_v59, %v1778_v16  ;;  %v2133_v24 = vpop.f32.mrb[41].mxu0  ;;  %v5081_v26 = vpop.f32.mrb[114].mxu1  ;;  %v1786_v60 = vadd.f32 %v4985_v45, %v4841_v9 }
 0x204   : > { %v2134_v35 = vpop.f32.mrb[42].mxu0  ;;  %v2353_v14 = vpop.f32.mrb[115].mxu1 }
 0x205   : > { %v5084_v5 = vadd.f32 %v3714_v30, %v4989_v51  ;;  %v3717_v32 = vadd.f32 %v2134_v35, %v1781_v48  ;;  %v2136_v50 = vpop.f32.mrb[43].mxu0  ;;  %v5095_v16 = vpop.permute.xlu0 %2682  ;;  %v1789_v51 = vadd.f32 %v4985_v45, %v4843_v36 }
 0x206   : > { %v5107_v23 = vpop.permute.xlu1 %2687 }
 0x207   : > { %v5087_v47 = vadd.f32 %v3717_v32, %v4995_v8 }
 0x209   : > { %v5093_v37 = vpop.f32.mrb[116].mxu1 }
 0x20a   : > { %v2139_v59 = vpop.f32.mrb[44].mxu0  ;;  %v2358_v24 = vpop.f32.mrb[117].mxu1 }
 0x20b   : > { %v3720_v30 = vadd.f32 %v2139_v59, %v1786_v60  ;;  %v2141_v48 = vpop.f32.mrb[45].mxu0  ;;  %v5099_v35 = vpop.f32.mrb[118].mxu1  ;;  %v1794_v24 = vadd.f32 %v4985_v45, %v4850_v22 }
 0x20c   : > { %v2142_v8 = vpop.f32.mrb[46].mxu0  ;;  %v2361_v14 = vpop.f32.mrb[119].mxu1 }
 0x20d   : > { %v3723_v32 = vadd.f32 %v2142_v8, %v1789_v51  ;;  %v2144_v50 = vpop.f32.mrb[47].mxu0  ;;  %v5102_v44 = vadd.f32 %v3720_v30, %v5007_v20  ;;  %v5113_v60 = vpop.permute.xlu0 %2692  ;;  %v1797_v51 = vadd.f32 %v4985_v45, %v4852_v27 }
 0x20e   : > { %v5125_v10 = vpop.permute.xlu1 %2697 }
 0x20f   : > { %v5105_v9 = vadd.f32 %v3723_v32, %v5013_v63 }
 0x211   : > { %v5111_v36 = vpop.f32.mrb[120].mxu1 }
 0x212   : > { %v2147_v59 = vpop.f32.mrb[48].mxu0  ;;  %v2366_v48 = vpop.f32.mrb[121].mxu1 }
 0x213   : > { %v3726_v8 = vadd.f32 %v2147_v59, %v1794_v24  ;;  %v2149_v20 = vpop.f32.mrb[49].mxu0  ;;  %v5117_v30 = vpop.f32.mrb[122].mxu1  ;;  %v1802_v48 = vadd.f32 %v4985_v45, %v4855_v39 }
 0x214   : > { %v2150_v63 = vpop.f32.mrb[50].mxu0  ;;  %v2369_v14 = vpop.f32.mrb[123].mxu1 }
 0x215   : > { %v3729_v32 = vadd.f32 %v2150_v63, %v1797_v51  ;;  %v2152_v50 = vpop.f32.mrb[51].mxu0  ;;  %v5120_v17 = vadd.f32 %v3726_v8, %v5023_v2  ;;  %v5131_v24 = vpop.permute.xlu0 %2702  ;;  %v1805_v51 = vadd.f32 %v4985_v45, %v4857_v40  ;;  %v1810_v40 = vadd.f32 %v4985_v45, %v4860_v19 }
 0x216   : > { %v5147_v11 = vpop.permute.xlu1 %2707 }
 0x217   : > { %v5123_v22 = vadd.f32 %v3729_v32, %v5029_v0 }
 0x219   : > { %5515 = vst [vmem:[#allocation17_spill] sm:$0xff] %v5123_v22  ;;  %v5129_v27 = vpop.f32.mrb[124].mxu1 }
 0x21a   : > { %5516 = vst [vmem:[#allocation18_spill] sm:$0xff] %v5129_v27  ;;  %v2155_v59 = vpop.f32.mrb[52].mxu0  ;;  %v5133_v20 = vpop.f32.mrb[125].mxu1 }
 0x21b   : > { %v3732_v2 = vadd.f32 %v2155_v59, %v1802_v48  ;;  %v2157_v8 = vpop.f32.mrb[53].mxu0  ;;  %v5137_v63 = vpop.f32.mrb[126].mxu1 }
 0x21c   : > { %5517 = vst [vmem:[#allocation19_spill] sm:$0xff] %v5137_v63  ;;  %v2158_v0 = vpop.f32.mrb[54].mxu0  ;;  %v5139_v14 = vpop.f32.mrb[127].mxu1 }
 0x21d   : > { %v3735_v32 = vadd.f32 %v2158_v0, %v1805_v51  ;;  %v2160_v50 = vpop.f32.mrb[55].mxu0  ;;  %v5142_v39 = vadd.f32 %v3732_v2, %v5039_v49  ;;  %v5153_v59 = vpop.permute.xlu0 %2712  ;;  %v1813_v51 = vadd.f32 %v4985_v45, %v4862_v46  ;;  %v1818_v46 = vadd.f32 %v4985_v45, %v4864_v52 }
 0x21e   : > { %v5169_v27 = vpop.permute.xlu1 %2717 }
 0x21f   : > { %v5145_v28 = vadd.f32 %v3735_v32, %v5045_v38 }
 0x221   : > { %v5151_v48 = vpop.f32.mrb[128].mxu1 }
 0x222   : > { %5518 = vst [vmem:[#allocation20_spill] sm:$0xff] %v5151_v48  ;;  %v2163_v8 = vpop.f32.mrb[56].mxu0  ;;  %v5155_v22 = vpop.f32.mrb[129].mxu1 }
 0x223   : > { %5519 = vst [vmem:[#allocation21_spill] sm:$0xff] %v5155_v22  ;;  %v3738_v49 = vadd.f32 %v2163_v8, %v1810_v40  ;;  %v2165_v2 = vpop.f32.mrb[57].mxu0  ;;  %v5159_v0 = vpop.f32.mrb[130].mxu1 }
 0x224   : > { %5520 = vst [vmem:[#allocation22_spill] sm:$0xff] %v5159_v0  ;;  %v2166_v38 = vpop.f32.mrb[58].mxu0  ;;  %v5161_v32 = vpop.f32.mrb[131].mxu1 }
 0x225   : > { %5521 = vst [vmem:[#allocation23_spill] sm:$0xff] %v5161_v32  ;;  %v3741_v50 = vadd.f32 %v2166_v38, %v1813_v51  ;;  %v2168_v63 = vpop.f32.mrb[59].mxu0  ;;  %v5164_v19 = vadd.f32 %v3738_v49, %v5057_v21  ;;  %v5173_v8 = vpop.permute.xlu0 %2722  ;;  %v1821_v21 = vadd.f32 %v4985_v45, %v4866_v15 }
 0x227   : > { %5522 = vst [vmem:[#allocation24_spill] sm:$0xff] %v5164_v19  ;;  %v5167_v48 = vadd.f32 %v3741_v50, %v5063_v12 }
 0x229   : > { %5523 = vst [vmem:[#allocation25_spill] sm:$0xff] %v5167_v48  ;;  %v3605_v40 = vpop.f32.mrb[132].mxu1 }
 0x22a   : > { %v2171_v2 = vpop.f32.mrb[60].mxu0  ;;  %v2446_v0 = vadd.f32 %v4998_v3, %v3605_v40  ;;  %v5176_v32 = vpop.f32.mrb[133].mxu1 }
 0x22b   : > { %v3744_v63 = vadd.f32 %v2171_v2, %v1818_v46  ;;  %v2173_v51 = vpop.f32.mrb[61].mxu0  ;;  %v3606_v12 = vpop.f32.mrb[134].mxu1 }
 0x22c   : > { %v2558_v49 = vmax.f32 %v2446_v0, 0.0  ;;  %v2174_v38 = vpop.f32.mrb[62].mxu0  ;;  %v2449_v50 = vadd.f32 %v5001_v25, %v3606_v12  ;;  %v5181_v48 = vpop.f32.mrb[135].mxu1  ;;  %v1826_v25 = vadd.f32 %v4985_v45, %v4868_v58  ;;  %v3003_v58 = vld [vmem:[%s4882_s9 + $0xb0] sm:$0x3] }
 0x22d   : > { %v3747_v52 = vadd.f32 %v2174_v38, %v1821_v21  ;;  %v2176_v22 = vpop.f32.mrb[63].mxu0  ;;  %v5184_v19 = vadd.f32 %v3744_v63, %v5075_v29  ;;  %v5195_v0 = vpop.permute.xlu1 %2727 }
 0x22e   : > { %v2559_v3 = vmax.f32 %v2449_v50, 0.0  ;;  %v5190_v15 = vmul.f32 %v5077_v6, %v2558_v49  ;;  %v5199_v29 = vpop.permute.xlu0 %2732 }
 0x22f   : > { %v5187_v40 = vadd.f32 %v3747_v52, %v5081_v26 }
 0x230   : > { %v5193_v46 = vmul.f32 %v5089_v43, %v2559_v3  ;;  %v1829_v43 = vadd.f32 %v4985_v45, %v4870_v33 }
 0x231   : > { %v3609_v22 = vpop.f32.mrb[136].mxu1 }
 0x232   : > { %5524 = vst [vmem:[#allocation26_spill] sm:$0xff] %v5193_v46  ;;  %v3473_v26 = vpack.c.bf16 %v5193_v46, %v5190_v15  ;;  %v2179_v2 = vpop.f32.mrb[64].mxu0  ;;  %v2462_v6 = vadd.f32 %v5031_v7, %v3609_v22  ;;  %v2453_v21 = vpop.f32.mrb[137].mxu1 }
 0x233   : > { %v3750_v63 = vadd.f32 %v2179_v2, %v1826_v25  ;;  %v2181_v51 = vpop.f32.mrb[65].mxu0  ;;  %v2454_v12 = vadd.f32 %v5015_v54, %v2453_v21  ;;  %v3610_v49 = vpop.f32.mrb[138].mxu1  ;;  %v3004_v2 = vsel %vm3002_vm2, 0, %v3003_v58 }
 0x234   : > { %3540 = vst [vmem:[%s4882_s9 + $0x38] sm:$0xff] %v3473_v26   ;;  %v2562_v38 = vmax.f32 %v2462_v6, 0.0  ;;  %v2182_v50 = vpop.f32.mrb[66].mxu0  ;;  %v2465_v52 = vadd.f32 %v5033_v56, %v3610_v49  ;;  %v2456_v3 = vpop.f32.mrb[139].mxu1  ;;  %3005 = vst [vmem:[%s4882_s9 + $0xb0] sm:$0x3] %v3004_v2 }
 0x235   : > { %v2560_v7 = vmax.f32 %v2454_v12, 0.0  ;;  %v3753_v22 = vadd.f32 %v2182_v50, %v1829_v43  ;;  %v2184_v46 = vpop.f32.mrb[67].mxu0  ;;  %v2457_v33 = vadd.f32 %v5017_v31, %v2456_v3  ;;  %v5212_v25 = vadd.f32 %v3750_v63, %v5093_v37  ;;  %v5224_v6 = vpop.permute.xlu1 %2737 }
 0x236   : > { %v2563_v54 = vmax.f32 %v2465_v52, 0.0  ;;  %v5219_v26 = vmul.f32 %v5113_v60, %v2562_v38  ;;  %v1834_v31 = vadd.f32 %v4985_v45, %v4872_v41  ;;  %v5234_v43 = vpop.permute.xlu0 %2742  ;;  %v1837_v41 = vadd.f32 %v4985_v45, %v4874_v62 }
 0x237   : > { %v2561_v21 = vmax.f32 %v2457_v33, 0.0  ;;  %v5215_v51 = vadd.f32 %v3753_v22, %v5099_v35  ;;  %v5229_v37 = vmul.f32 %v5095_v16, %v2560_v7 }
 0x238   : > { %v5222_v56 = vmul.f32 %v5125_v10, %v2563_v54 }
 0x239   : > { %v5232_v46 = vmul.f32 %v5107_v23, %v2561_v21  ;;  %v3613_v35 = vpop.f32.mrb[140].mxu1 }
 0x23a   : > { %v3483_v10 = vpack.c.bf16 %v5222_v56, %v5219_v26  ;;  %v2187_v60 = vpop.f32.mrb[68].mxu0  ;;  %v2478_v63 = vadd.f32 %v5066_v13, %v3613_v35  ;;  %v2469_v12 = vpop.f32.mrb[141].mxu1 }
 0x23b   : > { %v3478_v16 = vpack.c.bf16 %v5232_v46, %v5229_v37  ;;  %v3756_v49 = vadd.f32 %v2187_v60, %v1834_v31  ;;  %v2189_v23 = vpop.f32.mrb[69].mxu0  ;;  %v2470_v58 = vadd.f32 %v5048_v4, %v2469_v12  ;;  %v3614_v38 = vpop.f32.mrb[142].mxu1 }
 0x23c   : > { %3542 = vst [vmem:[%s4882_s9 + $0x48] sm:$0xff] %v3483_v10   ;;  %v2566_v50 = vmax.f32 %v2478_v63, 0.0  ;;  %v2190_v52 = vpop.f32.mrb[70].mxu0  ;;  %v2481_v3 = vadd.f32 %v5069_v55, %v3614_v38  ;;  %v2472_v7 = vpop.f32.mrb[143].mxu1 }
 0x23d   : > { %3541 = vst [vmem:[%s4882_s9 + $0x40] sm:$0xff] %v3478_v16   ;;  %v2564_v13 = vmax.f32 %v2470_v58, 0.0  ;;  %v3759_v22 = vadd.f32 %v2190_v52, %v1837_v41  ;;  %v2192_v33 = vpop.f32.mrb[71].mxu0  ;;  %v2473_v62 = vadd.f32 %v5051_v18, %v2472_v7  ;;  %v5249_v54 = vadd.f32 %v3756_v49, %v5111_v36  ;;  %v5260_v35 = vpop.permute.xlu1 %2747 }
 0x23e   : > { %v2567_v2 = vmax.f32 %v2481_v3, 0.0  ;;  %v5255_v31 = vmul.f32 %v5153_v59, %v2566_v50  ;;  %v1698_v18 = vadd.f32 %v4985_v45, %v4632_v34  ;;  %v5270_v60 = vpop.permute.xlu0 %2752  ;;  %v1701_v34 = vadd.f32 %v4985_v45, %v4639_v42 }
 0x23f   : > { %v2565_v21 = vmax.f32 %v2473_v62, 0.0  ;;  %v5252_v4 = vadd.f32 %v3759_v22, %v5117_v30  ;;  %v5265_v36 = vmul.f32 %v5131_v24, %v2564_v13 }
 0x240   : > { %v5258_v55 = vmul.f32 %v5169_v27, %v2567_v2 }
 0x241   : > { %v5268_v10 = vmul.f32 %v5147_v11, %v2565_v21  ;;  %v3617_v30 = vpop.f32.mrb[144].mxu1 }
 0x242   : > { %v3493_v27 = vpack.c.bf16 %v5258_v55, %v5255_v31  ;;  %v2228_v59 = vpop.f32.mrb[0].mxu0  ;;  %v2494_v63 = vadd.f32 %v5102_v44, %v3617_v30  ;;  %v2485_v12 = vpop.f32.mrb[145].mxu1 }
 0x243   : > { %v3488_v24 = vpack.c.bf16 %v5268_v10, %v5265_v36  ;;  %v3664_v41 = vadd.f32 %v2228_v59, %v1698_v18  ;;  %v2230_v11 = vpop.f32.mrb[1].mxu0  ;;  %v2486_v16 = vadd.f32 %v5084_v5, %v2485_v12  ;;  %v3618_v49 = vpop.f32.mrb[146].mxu1 }
 0x244   : > { %3544 = vst [vmem:[%s4882_s9 + $0x58] sm:$0xff] %v3493_v27   ;;  %v2570_v23 = vmax.f32 %v2494_v63, 0.0  ;;  %v2231_v58 = vpop.f32.mrb[2].mxu0  ;;  %v2497_v38 = vadd.f32 %v5105_v9, %v3618_v49  ;;  %v2488_v50 = vpop.f32.mrb[147].mxu1 }
 0x245   : > { %3543 = vst [vmem:[%s4882_s9 + $0x50] sm:$0xff] %v3488_v24   ;;  %v2406_v44 = vadd.f32 %v3664_v41, %v5133_v20  ;;  %v2568_v52 = vmax.f32 %v2486_v16, 0.0  ;;  %v3666_v3 = vadd.f32 %v2231_v58, %v1701_v34  ;;  %v2233_v42 = vpop.f32.mrb[3].mxu0  ;;  %v2489_v7 = vadd.f32 %v5087_v47, %v2488_v50  ;;  %v2758_v9 = vpop.permute.xlu1 %2757  ;;  %v5525_v50 = vld [vmem:[#allocation18_spill] sm:$0xff] }
 0x246   : > { %v2571_v13 = vmax.f32 %v2497_v38, 0.0  ;;  %v5287_v62 = vmul.f32 %v5199_v29, %v2570_v23  ;;  %v1706_v29 = vadd.f32 %v4985_v45, %v4658_v57 }
 0x247   : > { %v2548_v22 = vmax.f32 %v2406_v44, 0.0  ;;  %v2409_v33 = vadd.f32 %v3666_v3, %v5139_v14  ;;  %v2569_v5 = vmax.f32 %v2489_v7, 0.0  ;;  %v5294_v20 = vmul.f32 %v5173_v8, %v2568_v52  ;;  %v5299_v14 = vpop.permute.xlu0 %2762  ;;  %v5526_v7 = vld [vmem:[#allocation19_spill] sm:$0xff] }
 0x248   : > { %v5290_v2 = vmul.f32 %v5224_v6, %v2571_v13  ;;  %v1709_v8 = vadd.f32 %v4985_v45, %v4665_v61 }
 0x249   : > { %v2800_v21 = vmul.f32 %v4991_v53, %v2548_v22  ;;  %v2549_v18 = vmax.f32 %v2409_v33, 0.0  ;;  %v5297_v47 = vmul.f32 %v5195_v0, %v2569_v5  ;;  %v3621_v30 = vpop.f32.mrb[148].mxu1  ;;  %v5527_v22 = vld [vmem:[#allocation17_spill] sm:$0xff] }
 0x24a   : > { %v3503_v6 = vpack.c.bf16 %v5290_v2, %v5287_v62  ;;  %v2236_v27 = vpop.f32.mrb[4].mxu0  ;;  %v2510_v53 = vadd.f32 %v5142_v39, %v3621_v30  ;;  %v2501_v59 = vpop.f32.mrb[149].mxu1 }
 0x24b   : > { %v2878_v63 = vmul.f32 %v2800_v21, %v2800_v21  ;;  %v2801_v0 = vmul.f32 %v5009_v1, %v2549_v18  ;;  %v3498_v12 = vpack.c.bf16 %v5297_v47, %v5294_v20  ;;  %v2238_v34 = vpop.f32.mrb[5].mxu0  ;;  %v3622_v24 = vpop.f32.mrb[150].mxu1  ;;  %v3668_v57 = vadd.f32 %v2236_v27, %v1706_v29  ;;  %v5528_v18 = vld [vmem:[#allocation3_spill] sm:$0xff] }
 0x24c   : > { %3546 = vst [vmem:[%s4882_s9 + $0x68] sm:$0xff] %v3503_v6   ;;  %v2574_v41 = vmax.f32 %v2510_v53, 0.0  ;;  %v2502_v11 = vadd.f32 %v5120_v17, %v2501_v59  ;;  %v2239_v39 = vpop.f32.mrb[6].mxu0  ;;  %v2513_v16 = vadd.f32 %v5145_v28, %v3622_v24  ;;  %v2504_v49 = vpop.f32.mrb[151].mxu1  ;;  %v1714_v30 = vadd.f32 %v4985_v45, %v5528_v18  ;;  %v5529_v59 = vld [vmem:[#allocation9_spill] sm:$0xff] }
 0x24d   : > { %v2836_v61 = vadd.f32 %v2801_v0, %v2800_v21  ;;  %v2879_v23 = vmul.f32 %v2801_v0, %v2801_v0  ;;  %v3448_v58 = vpack.c.bf16 %v2801_v0, %v2800_v21  ;;  %3545 = vst [vmem:[%s4882_s9 + $0x60] sm:$0xff] %v3498_v12   ;;  %v3670_v1 = vadd.f32 %v2239_v39, %v1709_v8  ;;  %v2241_v38 = vpop.f32.mrb[7].mxu0  ;;  %v2768_v21 = vpop.permute.xlu1 %2767  ;;  %v5530_v12 = vld [vmem:[#allocation10_spill] sm:$0xff] }
 0x24e   : > { %v2414_v44 = vadd.f32 %v3668_v57, %v5525_v50  ;;  %v2572_v52 = vmax.f32 %v2502_v11, 0.0  ;;  %v2575_v3 = vmax.f32 %v2513_v16, 0.0  ;;  %v2505_v17 = vadd.f32 %v5527_v22, %v2504_v49  ;;  %v2773_v27 = vpop.permute.xlu0 %2772  ;;  %v5532_v50 = vld [vmem:[#allocation4_spill] sm:$0xff] }
 0x24f   : > { %v2914_v42 = vadd.f32 %v2879_v23, %v2878_v63  ;;  %3535 = vst [vmem:[%s4882_s9 + $0x10] sm:$0xff] %v3448_v58   ;;  %v2417_v13 = vadd.f32 %v3670_v1, %v5526_v7  ;;  %v5320_v28 = vmul.f32 %v5270_v60, %v2574_v41 }
 0x250   : > { %v2550_v33 = vmax.f32 %v2414_v44, 0.0  ;;  %v5322_v5 = vmul.f32 %v2758_v9, %v2575_v3  ;;  %v2573_v6 = vmax.f32 %v2505_v17, 0.0  ;;  %v5328_v63 = vmul.f32 %v5234_v43, %v2572_v52  ;;  %v5531_v43 = vld [vmem:[#allocation24_spill] sm:$0xff] }
 0x251   : > { %v2551_v29 = vmax.f32 %v2417_v13, 0.0  ;;  %v3625_v53 = vpop.f32.mrb[152].mxu1  ;;  %v5533_v13 = vld [vmem:[#allocation21_spill] sm:$0xff] }
 0x252   : > { %v2802_v8 = vmul.f32 %v5529_v59, %v2550_v33  ;;  %v3513_v60 = vpack.c.bf16 %v5322_v5, %v5320_v28  ;;  %v2244_v0 = vpop.f32.mrb[8].mxu0  ;;  %v2517_v9 = vpop.f32.mrb[153].mxu1  ;;  %v5334_v24 = vmul.f32 %v5260_v35, %v2573_v6  ;;  %v2526_v41 = vadd.f32 %v5184_v19, %v3625_v53 }
 0x253   : > { %v2803_v34 = vmul.f32 %v5530_v12, %v2551_v29  ;;  %v3672_v57 = vadd.f32 %v2244_v0, %v1714_v30  ;;  %v2246_v11 = vpop.f32.mrb[9].mxu0  ;;  %v3626_v39 = vpop.f32.mrb[154].mxu1  ;;  %v2518_v23 = vadd.f32 %v5531_v43, %v2517_v9  ;;  %v1717_v35 = vadd.f32 %v4985_v45, %v5532_v50  ;;  %v5534_v30 = vld [vmem:[#allocation25_spill] sm:$0xff]  ;;  %v5535_v0 = vld [vmem:[#allocation23_spill] sm:$0xff] }
 0x254   : > { %v2837_v16 = vadd.f32 %v2836_v61, %v2802_v8  ;;  %v2880_v49 = vmul.f32 %v2802_v8, %v2802_v8  ;;  %3548 = vst [vmem:[%s4882_s9 + $0x78] sm:$0xff] %v3513_v60   ;;  %v2247_v58 = vpop.f32.mrb[10].mxu0  ;;  %v2529_v1 = vadd.f32 %v5187_v40, %v3626_v39  ;;  %v2520_v38 = vpop.f32.mrb[155].mxu1  ;;  %v3508_v19 = vpack.c.bf16 %v5334_v24, %v5328_v63  ;;  %v5537_v11 = vld [vmem:[#allocation11_spill] sm:$0xff] }
 0x255   : > { %v2881_v44 = vmul.f32 %v2803_v34, %v2803_v34  ;;  %v3453_v52 = vpack.c.bf16 %v2803_v34, %v2802_v8  ;;  %v2249_v3 = vpop.f32.mrb[11].mxu0  ;;  %v2422_v22 = vadd.f32 %v3672_v57, %v5533_v13  ;;  %v2578_v17 = vmax.f32 %v2526_v41, 0.0  ;;  %v2778_v59 = vpop.permute.xlu1 %2777  ;;  %v5536_v57 = vld [vmem:[#allocation5_spill] sm:$0xff]  ;;  %v5539_v13 = vld [vmem:[#allocation12_spill] sm:$0xff] }
 0x256   : > { %v2915_v61 = vadd.f32 %v2914_v42, %v2880_v49  ;;  %v2838_v7 = vadd.f32 %v2837_v16, %v2803_v34  ;;  %3547 = vst [vmem:[%s4882_s9 + $0x70] sm:$0xff] %v3508_v19   ;;  %v2576_v33 = vmax.f32 %v2518_v23, 0.0  ;;  %v3674_v18 = vadd.f32 %v2247_v58, %v1717_v35  ;;  %v2783_v60 = vpop.permute.xlu0 %2782  ;;  %v5538_v23 = vld [vmem:[#allocation6_spill] sm:$0xff] }
 0x257   : > { %3536 = vst [vmem:[%s4882_s9 + $0x18] sm:$0xff] %v3453_v52   ;;  %v2579_v40 = vmax.f32 %v2529_v1, 0.0  ;;  %v2521_v29 = vadd.f32 %v5534_v30, %v2520_v38  ;;  %v2552_v53 = vmax.f32 %v2422_v22, 0.0  ;;  %v5348_v8 = vmul.f32 %v2773_v27, %v2578_v17  ;;  %v5540_v30 = vld [vmem:[#allocation20_spill] sm:$0xff] }
 0x258   : > { %v2916_v6 = vadd.f32 %v2915_v61, %v2881_v44  ;;  %v2425_v9 = vadd.f32 %v3674_v18, %v5535_v0  ;;  %v1722_v41 = vadd.f32 %v4985_v45, %v5536_v57  ;;  %v1725_v27 = vadd.f32 %v4985_v45, %v5538_v23  ;;  %v5543_v23 = vld [vmem:[#allocation13_spill] sm:$0xff] }
 0x259   : > { %v5351_v42 = vmul.f32 %v2778_v59, %v2579_v40  ;;  %v2577_v12 = vmax.f32 %v2521_v29, 0.0  ;;  %v3629_v34 = vpop.f32.mrb[156].mxu1  ;;  %v2804_v39 = vmul.f32 %v5537_v11, %v2552_v53  ;;  %v5360_v58 = vmul.f32 %v5299_v14, %v2576_v33 }
 0x25a   : > { %v2252_v16 = vpop.f32.mrb[12].mxu0  ;;  %v2542_v49 = vadd.f32 %v5249_v54, %v3629_v34  ;;  %v2533_v43 = vpop.f32.mrb[157].mxu1  ;;  %v2553_v1 = vmax.f32 %v2425_v9, 0.0  ;;  %v5541_v34 = vld [vmem:[#allocation22_spill] sm:$0xff] }
 0x25b   : > { %v3523_v38 = vpack.c.bf16 %v5351_v42, %v5348_v8  ;;  %v2254_v50 = vpop.f32.mrb[13].mxu0  ;;  %v3630_v35 = vpop.f32.mrb[158].mxu1  ;;  %v2839_v44 = vadd.f32 %v2838_v7, %v2804_v39  ;;  %v2882_v52 = vmul.f32 %v2804_v39, %v2804_v39  ;;  %v5364_v19 = vmul.f32 %v2768_v21, %v2577_v12 }
 0x25c   : > { %v3676_v3 = vadd.f32 %v2252_v16, %v1722_v41  ;;  %v2255_v54 = vpop.f32.mrb[14].mxu0  ;;  %v2536_v61 = vpop.f32.mrb[159].mxu1  ;;  %v2805_v22 = vmul.f32 %v5539_v13, %v2553_v1  ;;  %v2534_v14 = vadd.f32 %v5212_v25, %v2533_v43  ;;  %v2582_v0 = vmax.f32 %v2542_v49, 0.0  ;;  %v5542_v41 = vld [vmem:[#allocation7_spill] sm:$0xff] }
 0x25d   : > { %3550 = vst [vmem:[%s4882_s9 + $0x88] sm:$0xff] %v3523_v38   ;;  %v3678_v17 = vadd.f32 %v2255_v54, %v1725_v27  ;;  %v2257_v33 = vpop.f32.mrb[15].mxu0  ;;  %v2917_v18 = vadd.f32 %v2916_v6, %v2882_v52  ;;  %v3518_v40 = vpack.c.bf16 %v5364_v19, %v5360_v58  ;;  %v2788_v7 = vpop.permute.xlu1 %2787  ;;  %v2545_v25 = vadd.f32 %v5252_v4, %v3630_v35  ;;  %v5544_v38 = vld [vmem:[#allocation8_spill] sm:$0xff] }
 0x25e   : > { %v2430_v21 = vadd.f32 %v3676_v3, %v5540_v30  ;;  %v2840_v29 = vadd.f32 %v2839_v44, %v2805_v22  ;;  %v2883_v53 = vmul.f32 %v2805_v22, %v2805_v22  ;;  %v3458_v59 = vpack.c.bf16 %v2805_v22, %v2804_v39  ;;  %v2793_v43 = vpop.permute.xlu0 %2792 }
 0x25f   : > { %3549 = vst [vmem:[%s4882_s9 + $0x80] sm:$0xff] %v3518_v40   ;;  %v2580_v12 = vmax.f32 %v2534_v14, 0.0  ;;  %v2433_v57 = vadd.f32 %v3678_v17, %v5541_v34  ;;  %v1730_v6 = vadd.f32 %v4985_v45, %v5542_v41  ;;  %v2537_v16 = vadd.f32 %v5215_v51, %v2536_v61  ;;  %v5545_v51 = vld [vmem:[#allocation14_spill] sm:$0xff]  ;;  %v5547_v41 = vld [vmem:[#allocation16_spill] sm:$0xff] }
 0x260   : > { %v2554_v9 = vmax.f32 %v2430_v21, 0.0  ;;  %v2918_v11 = vadd.f32 %v2917_v18, %v2883_v53  ;;  %3537 = vst [vmem:[%s4882_s9 + $0x20] sm:$0xff] %v3458_v59   ;;  %v2583_v39 = vmax.f32 %v2545_v25, 0.0  ;;  %v1733_v50 = vadd.f32 %v4985_v45, %v5544_v38 }
 0x261   : > { %v2555_v1 = vmax.f32 %v2433_v57, 0.0  ;;  %v5382_v44 = vmul.f32 %v2793_v43, %v2582_v0  ;;  %v2581_v52 = vmax.f32 %v2537_v16, 0.0  ;;  %v2798_v13 = vpop.permute.xlu1 %2797  ;;  %v5384_v22 = vmul.f32 %v2783_v60, %v2580_v12 }
 0x262   : > { %v2806_v27 = vmul.f32 %v5543_v23, %v2554_v9  ;;  %v2260_v49 = vpop.f32.mrb[16].mxu0  ;;  %v5387_v17 = vmul.f32 %v2798_v13, %v2583_v39  ;;  %v2892_v13 = vmul.f32 %v5219_v26, %v5219_v26 }
 0x263   : > { %v3680_v4 = vadd.f32 %v2260_v49, %v1730_v6  ;;  %v2262_v35 = vpop.f32.mrb[17].mxu0  ;;  %v2807_v61 = vmul.f32 %v5545_v51, %v2555_v1  ;;  %v5389_v33 = vmul.f32 %v2788_v7, %v2581_v52  ;;  %v2890_v52 = vmul.f32 %v5229_v37, %v5229_v37 }
 0x264   : > { %v2841_v3 = vadd.f32 %v2840_v29, %v2806_v27  ;;  %v2884_v54 = vmul.f32 %v2806_v27, %v2806_v27  ;;  %v2263_v14 = vpop.f32.mrb[18].mxu0  ;;  %v3533_v60 = vpack.c.bf16 %v5387_v17, %v5382_v44 }
 0x265   : > { %v2438_v45 = vadd.f32 %v3680_v4, %v5176_v32  ;;  %v3682_v18 = vadd.f32 %v2263_v14, %v1733_v50  ;;  %v2265_v40 = vpop.f32.mrb[19].mxu0  ;;  %v2885_v29 = vmul.f32 %v2807_v61, %v2807_v61  ;;  %v3463_v53 = vpack.c.bf16 %v2807_v61, %v2806_v27  ;;  %v5546_v32 = vld [vmem:[#allocation15_spill] sm:$0xff] }
 0x266   : > { %v2919_v30 = vadd.f32 %v2918_v11, %v2884_v54  ;;  %v2842_v21 = vadd.f32 %v2841_v3, %v2807_v61  ;;  %v3528_v59 = vpack.c.bf16 %v5389_v33, %v5384_v22  ;;  %3552 = vst [vmem:[%s4882_s9 + $0x98] sm:$0xff] %v3533_v60   ;;  %v2888_v27 = vmul.f32 %v5190_v15, %v5190_v15 }
 0x267   : > { %3538 = vst [vmem:[%s4882_s9 + $0x28] sm:$0xff] %v3463_v53   ;;  %v2556_v9 = vmax.f32 %v2438_v45, 0.0  ;;  %v2441_v7 = vadd.f32 %v3682_v18, %v5181_v48  ;;  %v5548_v48 = vld [vmem:[#allocation26_spill] sm:$0xff]  ;;  %v2891_v3 = vmul.f32 %v5232_v46, %v5232_v46  ;;  %v2893_v14 = vmul.f32 %v5222_v56, %v5222_v56 }
 0x268   : > { %v2920_v0 = vadd.f32 %v2919_v30, %v2885_v29  ;;  %3551 = vst [vmem:[%s4882_s9 + $0x90] sm:$0xff] %v3528_v59   ;;  %v2889_v49 = vmul.f32 %v5548_v48, %v5548_v48 }
 0x269   : > { %v2808_v12 = vmul.f32 %v5546_v32, %v2556_v9  ;;  %v2557_v34 = vmax.f32 %v2441_v7, 0.0 }
 0x26b   : > { %v2843_v57 = vadd.f32 %v2842_v21, %v2808_v12  ;;  %v2886_v25 = vmul.f32 %v2808_v12, %v2808_v12  ;;  %v2809_v6 = vmul.f32 %v5547_v41, %v2557_v34 }
 0x26d   : > { %v2921_v11 = vadd.f32 %v2920_v0, %v2886_v25  ;;  %v2844_v16 = vadd.f32 %v2843_v57, %v2809_v6  ;;  %v2887_v43 = vmul.f32 %v2809_v6, %v2809_v6  ;;  %v3468_v23 = vpack.c.bf16 %v2809_v6, %v2808_v12 }
 0x26f   : > { %v2845_v1 = vadd.f32 %v2844_v16, %v5190_v15  ;;  %v2922_v39 = vadd.f32 %v2921_v11, %v2887_v43  ;;  %3539 = vst [vmem:[%s4882_s9 + $0x30] sm:$0xff] %v3468_v23  }
 0x271   : > { %v2846_v38 = vadd.f32 %v2845_v1, %v5548_v48  ;;  %v2923_v50 = vadd.f32 %v2922_v39, %v2888_v27 }
 0x273   : > { %v2847_v4 = vadd.f32 %v2846_v38, %v5229_v37  ;;  %v2924_v35 = vadd.f32 %v2923_v50, %v2889_v49  ;;  %v2894_v37 = vmul.f32 %v5265_v36, %v5265_v36 }
 0x275   : > { %v2848_v54 = vadd.f32 %v2847_v4, %v5232_v46  ;;  %v2925_v15 = vadd.f32 %v2924_v35, %v2890_v52  ;;  %v2895_v46 = vmul.f32 %v5268_v10, %v5268_v10 }
 0x277   : > { %v2849_v51 = vadd.f32 %v2848_v54, %v5219_v26  ;;  %v2926_v61 = vadd.f32 %v2925_v15, %v2891_v3  ;;  %v2896_v26 = vmul.f32 %v5255_v31, %v5255_v31 }
 0x279   : > { %v2850_v45 = vadd.f32 %v2849_v51, %v5222_v56  ;;  %v2927_v18 = vadd.f32 %v2926_v61, %v2892_v13  ;;  %v2897_v56 = vmul.f32 %v5258_v55, %v5258_v55 }
 0x27b   : > { %v2851_v40 = vadd.f32 %v2850_v45, %v5265_v36  ;;  %v2928_v30 = vadd.f32 %v2927_v18, %v2893_v14  ;;  %v2898_v36 = vmul.f32 %v5294_v20, %v5294_v20  ;;  %v2913_v14 = vmul.f32 %v5387_v17, %v5387_v17 }
 0x27d   : > { %v2852_v21 = vadd.f32 %v2851_v40, %v5268_v10  ;;  %v2929_v29 = vadd.f32 %v2928_v30, %v2894_v37  ;;  %v2899_v10 = vmul.f32 %v5297_v47, %v5297_v47 }
 0x27f   : > { %v2853_v53 = vadd.f32 %v2852_v21, %v5255_v31  ;;  %v2930_v60 = vadd.f32 %v2929_v29, %v2895_v46  ;;  %v2900_v31 = vmul.f32 %v5287_v62, %v5287_v62 }
 0x281   : > { %v2854_v59 = vadd.f32 %v2853_v53, %v5258_v55  ;;  %v2931_v0 = vadd.f32 %v2930_v60, %v2896_v26  ;;  %v2901_v55 = vmul.f32 %v5290_v2, %v5290_v2 }
 0x283   : > { %v2855_v9 = vadd.f32 %v2854_v59, %v5294_v20  ;;  %v2932_v7 = vadd.f32 %v2931_v0, %v2897_v56  ;;  %v2902_v20 = vmul.f32 %v5328_v63, %v5328_v63 }
 0x285   : > { %v2856_v32 = vadd.f32 %v2855_v9, %v5297_v47  ;;  %v2933_v12 = vadd.f32 %v2932_v7, %v2898_v36  ;;  %v2903_v47 = vmul.f32 %v5334_v24, %v5334_v24 }
 0x287   : > { %v2857_v34 = vadd.f32 %v2856_v32, %v5287_v62  ;;  %v2934_v57 = vadd.f32 %v2933_v12, %v2899_v10  ;;  %v2904_v62 = vmul.f32 %v5320_v28, %v5320_v28 }
 0x289   : > { %v2858_v25 = vadd.f32 %v2857_v34, %v5290_v2  ;;  %v2935_v41 = vadd.f32 %v2934_v57, %v2900_v31  ;;  %v2905_v2 = vmul.f32 %v5322_v5, %v5322_v5 }
 0x28b   : > { %v2859_v6 = vadd.f32 %v2858_v25, %v5328_v63  ;;  %v2936_v11 = vadd.f32 %v2935_v41, %v2901_v55  ;;  %v2906_v63 = vmul.f32 %v5360_v58, %v5360_v58 }
 0x28d   : > { %v2860_v16 = vadd.f32 %v2859_v6, %v5334_v24  ;;  %v2937_v43 = vadd.f32 %v2936_v11, %v2902_v20  ;;  %v2907_v24 = vmul.f32 %v5364_v19, %v5364_v19 }
 0x28f   : > { %v2861_v23 = vadd.f32 %v2860_v16, %v5320_v28  ;;  %v2938_v27 = vadd.f32 %v2937_v43, %v2903_v47  ;;  %v2908_v28 = vmul.f32 %v5348_v8, %v5348_v8 }
 0x291   : > { %v2862_v1 = vadd.f32 %v2861_v23, %v5322_v5  ;;  %v2939_v39 = vadd.f32 %v2938_v27, %v2904_v62  ;;  %v2909_v5 = vmul.f32 %v5351_v42, %v5351_v42 }
 0x293   : > { %v2863_v48 = vadd.f32 %v2862_v1, %v5360_v58  ;;  %v2940_v49 = vadd.f32 %v2939_v39, %v2905_v2  ;;  %v2910_v58 = vmul.f32 %v5384_v22, %v5384_v22 }
 0x295   : > { %v2864_v38 = vadd.f32 %v2863_v48, %v5364_v19  ;;  %v2941_v50 = vadd.f32 %v2940_v49, %v2906_v63  ;;  %v2911_v19 = vmul.f32 %v5389_v33, %v5389_v33 }
 0x297   : > { %v2865_v52 = vadd.f32 %v2864_v38, %v5348_v8  ;;  %v2942_v4 = vadd.f32 %v2941_v50, %v2907_v24  ;;  %v2912_v8 = vmul.f32 %v5382_v44, %v5382_v44 }
 0x299   : > { %v2866_v35 = vadd.f32 %v2865_v52, %v5351_v42  ;;  %v2943_v3 = vadd.f32 %v2942_v4, %v2908_v28 }
 0x29b   : > { %v2867_v54 = vadd.f32 %v2866_v35, %v5384_v22  ;;  %v2944_v15 = vadd.f32 %v2943_v3, %v2909_v5 }
 0x29d   : > { %v2868_v13 = vadd.f32 %v2867_v54, %v5389_v33  ;;  %v2945_v51 = vadd.f32 %v2944_v15, %v2910_v58 }
 0x29f   : > { %v2869_v61 = vadd.f32 %v2868_v13, %v5382_v44  ;;  %v2946_v42 = vadd.f32 %v2945_v51, %v2911_v19 }
 0x2a1   : > { %v2870_v22 = vadd.f32 %v2869_v61, %v5387_v17  ;;  %v2947_v45 = vadd.f32 %v2946_v42, %v2912_v8 }
 0x2a3   : > { %v2871_v18 = vrot.slane %v2870_v22, 4  ;;  %v2948_v37 = vadd.f32 %v2947_v45, %v2913_v14 }
 0x2a5   : > { %v2872_v40 = vadd.f32 %v2871_v18, %v2870_v22  ;;  %v2949_v30 = vrot.slane %v2948_v37, 4 }
 0x2a7   : > { %v2873_v33 = vrot.slane %v2872_v40, 2  ;;  %v2950_v46 = vadd.f32 %v2949_v30, %v2948_v37 }
 0x2a9   : > { %v2874_v21 = vadd.f32 %v2873_v33, %v2872_v40  ;;  %v2951_v29 = vrot.slane %v2950_v46, 2 }
 0x2ab   : > { %v2875_v26 = vrot.slane %v2874_v21, 1  ;;  %v2952_v53 = vadd.f32 %v2951_v29, %v2950_v46 }
 0x2ad   : > { %v2876_v44 = vadd.f32 %v2875_v26, %v2874_v21  ;;  %v2953_v60 = vrot.slane %v2952_v53, 1 }
 0x2af   : > { %2877 = vst [vmem:[%s265_s15] sm:$0x1] %v2876_v44  ;;  %v2954_v17 = vadd.f32 %v2953_v60, %v2952_v53 }
 0x2b1   : > { %2955 = vst [vmem:[%s268_s18] sm:$0x1] %v2954_v17 }
 0x2b2 PF: > { %s17_s21 = sadd.s32 1, %s3944_s21  }
 0x2b3   : > { %p14_p4 = scmp.ge.s32.totalorder %s17_s21, 4  }
 0x2b5   :  { %16 = sbr.rel (!%p14_p4) target bundleno = 1 (0x1), region = 90 }

// kernel: res_block_forward.3
= control target key start
LH: loop header
LB: loop body
LE: loop exit
PB: predicated region body
PF: predicated region fallthrough
CT: control target
= control target key end

     0   :  { %s6438_s24 = smov 0   ;;  %s7957_s0 = inlined_call_operand.vmem [shape: bf16[2,355,128], index: 0, kind: input, shape index: {}]   ;;  %s7958_s1 = inlined_call_operand.vmem [shape: f32[2,355,128], index: 1, kind: input, shape index: {}]   ;;  %s7959_s2 = inlined_call_operand.vmem [shape: f32[288,1], index: 2, kind: input, shape index: {}]   ;;  %s7960_s3 = inlined_call_operand.vmem [shape: f32[1,128], index: 3, kind: input, shape index: {}]   ;;  %s7961_s4 = inlined_call_operand.vmem [shape: f32[1,128], index: 4, kind: input, shape index: {}]   ;;  %s7962_s5 = inlined_call_operand.vmem [shape: bf16[1152,128], index: 5, kind: input, shape index: {}]   ;;  %s7963_s6 = inlined_call_operand.vmem [shape: f32[1,128], index: 6, kind: input, shape index: {}]   ;;  %s7964_s7 = inlined_call_operand.vmem [shape: f32[2,288,128], index: 7, kind: output, shape index: {}]  }
   0x1 LB: > { %s5291_s25 = sadd.s32 4294967295, %s6395_s24   ;;  %p5295_p0 = scmp.ge.s32.totalorder %s6395_s24, 1  ;;  %s6395_s24 = sphi %s6438_s24, %s17_s24  }
   0x2   : > { %p247_p1 = scmp.lt.s32.totalorder %s6395_s24, 3 }
   0x4   : > { %p248_p2 = pnand %p5295_p0, %p247_p1 }
   0x6   : > { %251 = sbr.rel (%p248_p2) target bundleno = 713 (0x2c9), region = 48 }
   0xd   : > { %v460_v0 = vld [vmem:[%s7959_s2 + $0x10] sm:$0xff]  ;;  %v458_v1 = vld [vmem:[%s7959_s2] sm:$0xff]  ;;  %v6397_v2 = vmov 0   ;;  %v461_v3 = vld [vmem:[%s7959_s2 + $0x18] sm:$0xff]  ;;  %vm754_vm0 = vcmask 1041408   ;;  %p284_p3 = scmp.lt.s32.totalorder %s5291_s25, 1 }
   0xe   : > { %6129 = vset.pattern.permute.xlu1 %v6397_v2  ;;  %711 = vst [vmem:[#allocation2 + $0x4] sm:$0xf] %v6397_v2  ;;  %712 = vst [vmem:[#allocation2 + $0x8] sm:$0xf] %v6397_v2  ;;  %6128 = vset.pattern.permute.xlu0 %v6397_v2  ;;  %v459_v4 = vld [vmem:[%s7959_s2 + $0x8] sm:$0xff]  ;;  %v462_v6 = vld [vmem:[%s7959_s2 + $0x20] sm:$0xff] }
   0xf   : > { %713 = vst [vmem:[#allocation2 + $0xc] sm:$0xf] %v6397_v2  ;;  %714 = vst [vmem:[#allocation2 + $0x10] sm:$0xf] %v6397_v2  ;;  %506 = vperm.xlu1 %6129, %v460_v0   ;;  %496 = vperm.xlu0 %6128, %v458_v1   ;;  %v463_v5 = vld [vmem:[%s7959_s2 + $0x28] sm:$0xff]  ;;  %v465_v7 = vld [vmem:[%s7959_s2 + $0x38] sm:$0xff] }
  0x10   : > { %715 = vst [vmem:[#allocation2 + $0x14] sm:$0xf] %v6397_v2  ;;  %716 = vst [vmem:[#allocation2 + $0x18] sm:$0xf] %v6397_v2  ;;  %4231 = vmatprep.subr.bf16.mxu1 %v6397_v2  ;;  %4408 = vmatprep.subr.bf16.mxu0 %v6397_v2  ;;  %vm755_vm1 = vsmask.f32 1280 }
  0x11   : > { %717 = vst [vmem:[#allocation2 + $0x1c] sm:$0xf] %v6397_v2  ;;  %718 = vst [vmem:[#allocation2 + $0x20] sm:$0xf] %v6397_v2  ;;  %v464_v8 = vld [vmem:[%s7959_s2 + $0x30] sm:$0xff]  ;;  %v467_v10 = vld [vmem:[%s7959_s2 + $0x48] sm:$0xff] }
  0x12   : > { %719 = vst [vmem:[#allocation2 + $0x24] sm:$0xf] %v6397_v2  ;;  %720 = vst [vmem:[#allocation2 + $0x28] sm:$0xf] %v6397_v2  ;;  %v757_v9 = vld [vmem:[#allocation2 + $0xb0] sm:$0x3] }
  0x13   : > { %721 = vst [vmem:[#allocation2 + $0x2c] sm:$0xf] %v6397_v2  ;;  %722 = vst [vmem:[#allocation2 + $0x30] sm:$0xf] %v6397_v2  ;;  %511 = vperm.xlu1 %6129, %v461_v3   ;;  %501 = vperm.xlu0 %6128, %v459_v4   ;;  %v466_v11 = vld [vmem:[%s7959_s2 + $0x40] sm:$0xff]  ;;  %v6132_v15 = vld [vmem:[%s7962_s5 + $0x8] sm:$0xff]  }
  0x14   : > { %723 = vst [vmem:[#allocation2 + $0x34] sm:$0xf] %v6397_v2  ;;  %724 = vst [vmem:[#allocation2 + $0x38] sm:$0xf] %v6397_v2  ;;  %v6130_v13 = vld [vmem:[%s7962_s5] sm:$0xff]   ;;  %v6133_v16 = vld [vmem:[%s7962_s5 + $0x88] sm:$0xff]  }
  0x15   : > { %725 = vst [vmem:[#allocation2 + $0x3c] sm:$0xf] %v6397_v2  ;;  %726 = vst [vmem:[#allocation2 + $0x40] sm:$0xf] %v6397_v2  ;;  %v6131_v14 = vld [vmem:[%s7962_s5 + $0x80] sm:$0xff]   ;;  %4232 = vmatpush1.bf16.msra.mxu1 %v6130_v13  ;;  %v469_v17 = vld [vmem:[%s7959_s2 + $0x58] sm:$0xff] }
  0x16   : > { %727 = vst [vmem:[#allocation2 + $0x44] sm:$0xf] %v6397_v2  ;;  %728 = vst [vmem:[#allocation2 + $0x48] sm:$0xf] %v6397_v2  ;;  %4409 = vmatpush1.bf16.msra.mxu0 %v6131_v14  ;;  %4233 = vmatprep.subr.bf16.mxu1 %v6397_v2  ;;  %v468_v18 = vld [vmem:[%s7959_s2 + $0x50] sm:$0xff]  ;;  %v471_v21 = vld [vmem:[%s7959_s2 + $0x68] sm:$0xff] }
  0x17   : > { %729 = vst [vmem:[#allocation2 + $0x4c] sm:$0xf] %v6397_v2  ;;  %730 = vst [vmem:[#allocation2 + $0x50] sm:$0xf] %v6397_v2  ;;  %521 = vperm.xlu1 %6129, %v463_v5   ;;  %516 = vperm.xlu0 %6128, %v462_v6   ;;  %v6134_v19 = vld [vmem:[%s7962_s5 + $0x10] sm:$0xff]   ;;  %v470_v22 = vld [vmem:[%s7959_s2 + $0x60] sm:$0xff] }
  0x18   : > { %731 = vst [vmem:[#allocation2 + $0x54] sm:$0xf] %v6397_v2  ;;  %732 = vst [vmem:[#allocation2 + $0x58] sm:$0xf] %v6397_v2  ;;  %4410 = vmatprep.subr.bf16.mxu0 %v6397_v2  ;;  %v6135_v20 = vld [vmem:[%s7962_s5 + $0x90] sm:$0xff]   ;;  %v6136_v23 = vld [vmem:[%s7962_s5 + $0x18] sm:$0xff]  }
  0x19   : > { %733 = vst [vmem:[#allocation2 + $0x5c] sm:$0xf] %v6397_v2  ;;  %734 = vst [vmem:[#allocation2 + $0x60] sm:$0xf] %v6397_v2  ;;  %4234 = vmatpush1.bf16.msra.mxu1 %v6132_v15  ;;  %v6137_v24 = vld [vmem:[%s7962_s5 + $0x98] sm:$0xff]   ;;  %v472_v26 = vld [vmem:[%s7959_s2 + $0x70] sm:$0xff] }
  0x1a   : > { %735 = vst [vmem:[#allocation2 + $0x64] sm:$0xf] %v6397_v2  ;;  %736 = vst [vmem:[#allocation2 + $0x68] sm:$0xf] %v6397_v2  ;;  %4411 = vmatpush1.bf16.msra.mxu0 %v6133_v16  ;;  %4235 = vmatprep.subr.bf16.mxu1 %v6397_v2  ;;  %v473_v25 = vld [vmem:[%s7959_s2 + $0x78] sm:$0xff]  ;;  %v6138_v27 = vld [vmem:[%s7962_s5 + $0x20] sm:$0xff]  }
  0x1b   : > { %737 = vst [vmem:[#allocation2 + $0x6c] sm:$0xf] %v6397_v2  ;;  %738 = vst [vmem:[#allocation2 + $0x70] sm:$0xf] %v6397_v2  ;;  %531 = vperm.xlu1 %6129, %v465_v7   ;;  %526 = vperm.xlu0 %6128, %v464_v8   ;;  %v6139_v28 = vld [vmem:[%s7962_s5 + $0xa0] sm:$0xff]   ;;  %v475_v29 = vld [vmem:[%s7959_s2 + $0x88] sm:$0xff] }
  0x1c   : > { %739 = vst [vmem:[#allocation2 + $0x74] sm:$0xf] %v6397_v2  ;;  %740 = vst [vmem:[#allocation2 + $0x78] sm:$0xf] %v6397_v2  ;;  %4412 = vmatprep.subr.bf16.mxu0 %v6397_v2  ;;  %v474_v30 = vld [vmem:[%s7959_s2 + $0x80] sm:$0xff]  ;;  %v6140_v31 = vld [vmem:[%s7962_s5 + $0x28] sm:$0xff]  }
  0x1d   : > { %741 = vst [vmem:[#allocation2 + $0x7c] sm:$0xf] %v6397_v2  ;;  %742 = vst [vmem:[#allocation2 + $0x80] sm:$0xf] %v6397_v2  ;;  %4236 = vmatpush1.bf16.msra.mxu1 %v6134_v19  ;;  %v6141_v32 = vld [vmem:[%s7962_s5 + $0xa8] sm:$0xff]   ;;  %v477_v33 = vld [vmem:[%s7959_s2 + $0x98] sm:$0xff] }
  0x1e   : > { %743 = vst [vmem:[#allocation2 + $0x84] sm:$0xf] %v6397_v2  ;;  %744 = vst [vmem:[#allocation2 + $0x88] sm:$0xf] %v6397_v2  ;;  %4413 = vmatpush1.bf16.msra.mxu0 %v6135_v20  ;;  %4237 = vmatprep.subr.bf16.mxu1 %v6397_v2  ;;  %v476_v34 = vld [vmem:[%s7959_s2 + $0x90] sm:$0xff]  ;;  %v479_v37 = vld [vmem:[%s7959_s2 + $0xa8] sm:$0xff] }
  0x1f   : > { %745 = vst [vmem:[#allocation2 + $0x8c] sm:$0xf] %v6397_v2  ;;  %746 = vst [vmem:[#allocation2 + $0x90] sm:$0xf] %v6397_v2  ;;  %541 = vperm.xlu1 %6129, %v467_v10   ;;  %536 = vperm.xlu0 %6128, %v466_v11   ;;  %v6142_v35 = vld [vmem:[%s7962_s5 + $0x30] sm:$0xff]   ;;  %v478_v38 = vld [vmem:[%s7959_s2 + $0xa0] sm:$0xff] }
  0x20   : > { %747 = vst [vmem:[#allocation2 + $0x94] sm:$0xf] %v6397_v2  ;;  %748 = vst [vmem:[#allocation2 + $0x98] sm:$0xf] %v6397_v2  ;;  %4414 = vmatprep.subr.bf16.mxu0 %v6397_v2  ;;  %v6143_v36 = vld [vmem:[%s7962_s5 + $0xb0] sm:$0xff]   ;;  %v6144_v39 = vld [vmem:[%s7962_s5 + $0x38] sm:$0xff]  }
  0x21   : > { %749 = vst [vmem:[#allocation2 + $0x9c] sm:$0xf] %v6397_v2  ;;  %750 = vst [vmem:[#allocation2 + $0xa0] sm:$0xf] %v6397_v2  ;;  %4238 = vmatpush1.bf16.msra.mxu1 %v6136_v23  ;;  %v6145_v40 = vld [vmem:[%s7962_s5 + $0xb8] sm:$0xff]   ;;  %v480_v42 = vld [vmem:[%s7959_s2 + $0xb0] sm:$0xff] }
  0x22   : > { %751 = vst [vmem:[#allocation2 + $0xa4] sm:$0xf] %v6397_v2  ;;  %752 = vst [vmem:[#allocation2 + $0xa8] sm:$0xf] %v6397_v2  ;;  %4415 = vmatpush1.bf16.msra.mxu0 %v6137_v24  ;;  %4239 = vmatprep.subr.bf16.mxu1 %v6397_v2  ;;  %v481_v41 = vld [vmem:[%s7959_s2 + $0xb8] sm:$0xff]  ;;  %v6146_v43 = vld [vmem:[%s7962_s5 + $0x40] sm:$0xff]  }
  0x23   : > { %vm756_vm2 = vmand %vm754_vm0, %vm755_vm1  ;;  %551 = vperm.xlu1 %6129, %v469_v17   ;;  %546 = vperm.xlu0 %6128, %v468_v18   ;;  %v6147_v44 = vld [vmem:[%s7962_s5 + $0xc0] sm:$0xff]   ;;  %v483_v45 = vld [vmem:[%s7959_s2 + $0xc8] sm:$0xff]  ;;  %s7972_s25 = smov (!%p284_p3, %s5291_s25), 1  ;;  %vm1407_vm3 = vcmask 1044480   ;;  %vm1070_vm4 = vsmask.f32 5376 }
  0x24   : > { %v758_v12 = vsel %vm756_vm2, 0, %v757_v9  ;;  %4416 = vmatprep.subr.bf16.mxu0 %v6397_v2  ;;  %v482_v46 = vld [vmem:[%s7959_s2 + $0xc0] sm:$0xff]  ;;  %v6148_v47 = vld [vmem:[%s7962_s5 + $0x48] sm:$0xff]   ;;  %v485_v49 = vld [vmem:[%s7959_s2 + $0xd8] sm:$0xff]  ;;  %s6116_s28 = smul.u32 180, %s7972_s25  ;;  %vm3075_vm6 = vcmask 1046528  }
  0x25   : > { %759 = vst [vmem:[#allocation2 + $0xb0] sm:$0x3] %v758_v12  ;;  %4240 = vmatpush1.bf16.msra.mxu1 %v6138_v27  ;;  %v6149_v48 = vld [vmem:[%s7962_s5 + $0xc8] sm:$0xff]   ;;  %v484_v50 = vld [vmem:[%s7959_s2 + $0xd0] sm:$0xff]  ;;  %v486_v54 = vld [vmem:[%s7959_s2 + $0xe0] sm:$0xff]  ;;  %s6117_s11 = smul.u32 360, %s7972_s25 }
  0x26   : > { %4417 = vmatpush1.bf16.msra.mxu0 %v6139_v28  ;;  %4241 = vmatprep.subr.bf16.mxu1 %v6397_v2  ;;  %v6150_v51 = vld [vmem:[%s7962_s5 + $0x50] sm:$0xff]   ;;  %v487_v53 = vld [vmem:[%s7959_s2 + $0xe8] sm:$0xff]  ;;  %v6152_v55 = vld [vmem:[%s7962_s5 + $0x58] sm:$0xff]   ;;  %s6734_s16 = scalar_lea.vmem %s7957_s0, %s6116_s28  ;;  %vm1611_vm5 = vsmask.f32 4352  ;;  %s6118_s15 = smul.u32 288, %s7972_s25 }
  0x27   : > { %561 = vperm.xlu1 %6129, %v471_v21   ;;  %556 = vperm.xlu0 %6128, %v470_v22   ;;  %v6151_v52 = vld [vmem:[%s7962_s5 + $0xd0] sm:$0xff]   ;;  %v6153_v56 = vld [vmem:[%s7962_s5 + $0xd8] sm:$0xff]   ;;  %v6154_v59 = vld [vmem:[%s7962_s5 + $0x60] sm:$0xff]   ;;  %vm2446_vm7 = vsmask.f32 7424  ;;  %s7778_s14 = scalar_lea.vmem %s7958_s1, %s6117_s11 }
  0x28   : > { %4418 = vmatprep.subr.bf16.mxu0 %v6397_v2  ;;  %v489_v57 = vld [vmem:[%s7959_s2 + $0xf8] sm:$0xff]  ;;  %v488_v58 = vld [vmem:[%s7959_s2 + $0xf0] sm:$0xff]  ;;  %v6155_v60 = vld [vmem:[%s7962_s5 + $0xe0] sm:$0xff]   ;;  %vm3279_vm8 = vsmask.f32 6400  ;;  %s7794_s18 = scalar_lea.vmem %s7964_s7, %s6118_s15 }
  0x29   : > { %4242 = vmatpush1.bf16.msra.mxu1 %v6140_v31  ;;  %v491_v61 = vld [vmem:[%s7959_s2 + $0x108] sm:$0xff]  ;;  %v490_v62 = vld [vmem:[%s7959_s2 + $0x100] sm:$0xff]  ;;  %v493_v1 = vld [vmem:[%s7959_s2 + $0x118] sm:$0xff] }
  0x2a   : > { %4419 = vmatpush1.bf16.msra.mxu0 %v6141_v32  ;;  %4243 = vmatprep.subr.bf16.mxu1 %v6397_v2  ;;  %v6156_v63 = vld [vmem:[%s7962_s5 + $0x68] sm:$0xff]   ;;  %v492_v3 = vld [vmem:[%s7959_s2 + $0x110] sm:$0xff]  ;;  %v6162_v6 = vld [vmem:[%s7962_s5 + $0x78] sm:$0xff]  }
  0x2b   : > { %571 = vperm.xlu1 %6129, %v473_v25   ;;  %566 = vperm.xlu0 %6128, %v472_v26   ;;  %v6157_v0 = vld [vmem:[%s7962_s5 + $0xe8] sm:$0xff]   ;;  %v6158_v4 = vld [vmem:[%s7962_s5 + $0x70] sm:$0xff]   ;;  %v6163_v7 = vld [vmem:[%s7962_s5 + $0xf8] sm:$0xff]  }
  0x2c   : > { %4420 = vmatprep.subr.bf16.mxu0 %v6397_v2  ;;  %v6159_v5 = vld [vmem:[%s7962_s5 + $0xf0] sm:$0xff]   ;;  %v5797_v8 = vld [vmem:[%s6734_s16 + $0x98] sm:$0xff]   ;;  %v6742_v11 = vld [vmem:[%s7960_s3] ss:$0 sm:$0xff] }
  0x2d   : > { %4244 = vmatpush1.bf16.msra.mxu1 %v6142_v35  ;;  %v5689_v9 = vunpack.c.h.bf16 %v5797_v8  ;;  %v5688_v10 = vunpack.c.l.bf16 %v5797_v8  ;;  %v6747_v12 = vld [vmem:[%s7961_s4] ss:$0 sm:$0xff]  ;;  %v5781_v17 = vld [vmem:[%s6734_s16 + $0x18] sm:$0xff]   ;;  %v5780_v20 = vld [vmem:[%s6734_s16 + $0x10] sm:$0xff]  }
  0x2e   : > { %4421 = vmatpush1.bf16.msra.mxu0 %v6143_v36  ;;  %4245 = vmatprep.subr.bf16.mxu1 %v6397_v2  ;;  %v5624_v18 = vunpack.c.l.bf16 %v5781_v17  ;;  %v5625_v19 = vunpack.c.h.bf16 %v5781_v17  ;;  %v5782_v21 = vld [vmem:[%s6734_s16 + $0x20] sm:$0xff]   ;;  %v5620_v23 = vunpack.c.l.bf16 %v5780_v20  ;;  %v5621_v25 = vunpack.c.h.bf16 %v5780_v20  ;;  %v5783_v26 = vld [vmem:[%s6734_s16 + $0x28] sm:$0xff]   ;;  %v5784_v27 = vld [vmem:[%s6734_s16 + $0x30] sm:$0xff]  }
  0x2f   : > { %581 = vperm.xlu1 %6129, %v475_v29   ;;  %576 = vperm.xlu0 %6128, %v474_v30   ;;  %v414_v13 = vmul.f32 %v5689_v9, %v6742_v11  ;;  %v413_v14 = vmul.f32 %v5688_v10, %v6742_v11  ;;  %v5629_v28 = vunpack.c.h.bf16 %v5782_v21  ;;  %v5628_v29 = vunpack.c.l.bf16 %v5782_v21  ;;  %v5785_v30 = vld [vmem:[%s6734_s16 + $0x38] sm:$0xff]   ;;  %v5786_v31 = vld [vmem:[%s6734_s16 + $0x40] sm:$0xff]  }
  0x30   : > { %4422 = vmatprep.subr.bf16.mxu0 %v6397_v2  ;;  %v381_v22 = vmul.f32 %v5624_v18, %v6742_v11  ;;  %v382_v24 = vmul.f32 %v5625_v19, %v6742_v11  ;;  %v6164_v32 = vld [vmem:[#allocation2 + $0x4] sm:$0xfc]   ;;  %v5637_v35 = vunpack.c.h.bf16 %v5784_v27  ;;  %v5636_v36 = vunpack.c.l.bf16 %v5784_v27 }
  0x31   : > { %4246 = vmatpush1.bf16.msra.mxu1 %v6144_v39  ;;  %v6754_v15 = vadd.f32 %v6747_v12, %v414_v13  ;;  %v6757_v16 = vadd.f32 %v6747_v12, %v413_v14  ;;  %v5788_v13 = vld [vmem:[%s6734_s16 + $0x50] sm:$0xff]  }
  0x32   : > { %4423 = vmatpush1.bf16.msra.mxu0 %v6145_v40  ;;  %4247 = vmatprep.subr.bf16.mxu1 %v6397_v2  ;;  %v425_v39 = vadd.f32 %v6747_v12, %v382_v24  ;;  %v380_v40 = vmul.f32 %v5621_v25, %v6742_v11  ;;  %v5789_v24 = vld [vmem:[%s6734_s16 + $0x58] sm:$0xff]  }
  0x33   : > { %591 = vperm.xlu1 %6129, %v477_v33   ;;  %586 = vperm.xlu0 %6128, %v476_v34   ;;  %v5633_v33 = vunpack.c.h.bf16 %v5783_v26  ;;  %v5632_v34 = vunpack.c.l.bf16 %v5783_v26 }
  0x34   : > { %4424 = vmatprep.subr.bf16.mxu0 %v6397_v2 }
  0x35   : > { %4248 = vmatpush1.bf16.msra.mxu1 %v6146_v43  ;;  %v5641_v43 = vunpack.c.h.bf16 %v5785_v30 }
  0x36   : > { %4425 = vmatpush1.bf16.msra.mxu0 %v6147_v44  ;;  %4249 = vmatprep.subr.bf16.mxu1 %v6397_v2  ;;  %v5640_v44 = vunpack.c.l.bf16 %v5785_v30  ;;  %v5652_v30 = vunpack.c.l.bf16 %v5788_v13 }
  0x37   : > { %601 = vperm.xlu1 %6129, %v479_v37   ;;  %596 = vperm.xlu0 %6128, %v478_v38   ;;  %v424_v37 = vadd.f32 %v6747_v12, %v381_v22  ;;  %v379_v38 = vmul.f32 %v5620_v23, %v6742_v11 }
  0x38   : > { %4426 = vmatprep.subr.bf16.mxu0 %v6397_v2 }
  0x39   : > { %4250 = vmatpush1.bf16.msra.mxu1 %v6148_v47  ;;  %v5644_v47 = vunpack.c.l.bf16 %v5786_v31 }
  0x3a   : > { %4427 = vmatpush1.bf16.msra.mxu0 %v6149_v48  ;;  %4251 = vmatprep.subr.bf16.mxu1 %v6397_v2  ;;  %v1072_v48 = vshrl.u32 %v6164_v32, 16 }
  0x3b   : > { %611 = vperm.xlu1 %6129, %v481_v41   ;;  %606 = vperm.xlu0 %6128, %v480_v42   ;;  %v6169_v41 = vld [vmem:[#allocation2 + $0x4] sm:$0xf8]   ;;  %v384_v42 = vmul.f32 %v5629_v28, %v6742_v11 }
  0x3c   : > { %4428 = vmatprep.subr.bf16.mxu0 %v6397_v2 }
  0x3d   : > { %4252 = vmatpush1.bf16.msra.mxu1 %v6150_v51  ;;  %v385_v51 = vmul.f32 %v5632_v34, %v6742_v11 }
  0x3e   : > { %4429 = vmatpush1.bf16.msra.mxu0 %v6151_v52  ;;  %4253 = vmatprep.subr.bf16.mxu1 %v6397_v2  ;;  %v388_v52 = vmul.f32 %v5637_v35, %v6742_v11 }
  0x3f   : > { %621 = vperm.xlu1 %6129, %v483_v45   ;;  %616 = vperm.xlu0 %6128, %v482_v46   ;;  %v5645_v45 = vunpack.c.h.bf16 %v5786_v31  ;;  %v383_v46 = vmul.f32 %v5628_v29, %v6742_v11  ;;  %v6797_v8 = vadd.f32 %v6747_v12, %v385_v51  ;;  %v5653_v29 = vunpack.c.h.bf16 %v5788_v13  ;;  %v5790_v31 = vld [vmem:[%s6734_s16 + $0x60] sm:$0xff]  }
  0x40   : > { %4430 = vmatprep.subr.bf16.mxu0 %v6397_v2  ;;  %v6800_v9 = vadd.f32 %v6747_v12, %v388_v52 }
  0x41   : > { %4254 = vmatpush1.bf16.msra.mxu1 %v6152_v55  ;;  %v423_v55 = vadd.f32 %v6747_v12, %v380_v40 }
  0x42   : > { %4431 = vmatpush1.bf16.msra.mxu0 %v6153_v56  ;;  %4255 = vmatprep.subr.bf16.mxu1 %v6397_v2  ;;  %v1613_v56 = vshrl.u32 %v6169_v41, 16 }
  0x43   : > { %631 = vperm.xlu1 %6129, %v485_v49   ;;  %626 = vperm.xlu0 %6128, %v484_v50   ;;  %v1075_v49 = vshll.u32 %v6164_v32, 16  ;;  %v386_v50 = vmul.f32 %v5633_v33, %v6742_v11 }
  0x44   : > { %4432 = vmatprep.subr.bf16.mxu0 %v6397_v2  ;;  %v6806_v14 = vrot.slane %v1613_v56, 3 }
  0x45   : > { %4256 = vmatpush1.bf16.msra.mxu1 %v6154_v59  ;;  %v390_v59 = vmul.f32 %v5641_v43, %v6742_v11  ;;  %v5657_v43 = vunpack.c.h.bf16 %v5789_v24 }
  0x46   : > { %4433 = vmatpush1.bf16.msra.mxu0 %v6155_v60  ;;  %4257 = vmatprep.subr.bf16.mxu1 %v6397_v2  ;;  %v389_v60 = vmul.f32 %v5640_v44, %v6742_v11 }
  0x47   : > { %641 = vperm.xlu1 %6129, %v487_v53   ;;  %636 = vperm.xlu0 %6128, %v486_v54   ;;  %v387_v53 = vmul.f32 %v5636_v36, %v6742_v11  ;;  %v422_v54 = vadd.f32 %v6747_v12, %v379_v38  ;;  %v6811_v20 = vadd.f32 %v6747_v12, %v390_v59  ;;  %v5791_v36 = vld [vmem:[%s6734_s16 + $0x68] sm:$0xff]   ;;  %v5792_v38 = vld [vmem:[%s6734_s16 + $0x70] sm:$0xff]  }
  0x48   : > { %4434 = vmatprep.subr.bf16.mxu0 %v6397_v2  ;;  %v6814_v21 = vadd.f32 %v6747_v12, %v389_v60  ;;  %v5664_v51 = vunpack.c.l.bf16 %v5791_v36  ;;  %v5669_v52 = vunpack.c.h.bf16 %v5792_v38  ;;  %v5668_v56 = vunpack.c.l.bf16 %v5792_v38 }
  0x49   : > { %4258 = vmatpush1.bf16.msra.mxu1 %v6156_v63  ;;  %v5787_v63 = vld [vmem:[%s6734_s16 + $0x48] sm:$0xff]   ;;  %v6803_v10 = vadd.f32 %v6747_v12, %v387_v53  ;;  %v395_v60 = vmul.f32 %v5652_v30, %v6742_v11 }
  0x4a   : > { %4435 = vmatpush1.bf16.msra.mxu0 %v6157_v0  ;;  %4259 = vmatprep.subr.bf16.mxu1 %v6397_v2  ;;  %v5649_v18 = vunpack.c.h.bf16 %v5787_v63  ;;  %v5648_v19 = vunpack.c.l.bf16 %v5787_v63  ;;  %v403_v30 = vmul.f32 %v5668_v56, %v6742_v11 }
  0x4b   : > { %651 = vperm.xlu1 %6129, %v489_v57   ;;  %646 = vperm.xlu0 %6128, %v488_v58   ;;  %v1616_v57 = vshll.u32 %v6169_v41, 16  ;;  %v427_v58 = vadd.f32 %v6747_v12, %v384_v42 }
  0x4c   : > { %4436 = vmatprep.subr.bf16.mxu0 %v6397_v2  ;;  %v394_v41 = vmul.f32 %v5649_v18, %v6742_v11  ;;  %v393_v42 = vmul.f32 %v5648_v19, %v6742_v11 }
  0x4d   : > { %4260 = vmatpush1.bf16.msra.mxu1 %v6158_v4  ;;  %v391_v4 = vmul.f32 %v5644_v47, %v6742_v11  ;;  %v6808_v17 = vrot.slane %v1616_v57, 4  ;;  %v5661_v47 = vunpack.c.h.bf16 %v5790_v31 }
  0x4e   : > { %4437 = vmatpush1.bf16.msra.mxu0 %v6159_v5  ;;  %4261 = vmatprep.subr.bf16.mxu1 %v6397_v2  ;;  %v6789_v5 = vrot.slane %v1072_v48, 2  ;;  %v5793_v48 = vld [vmem:[%s6734_s16 + $0x78] sm:$0xff]   ;;  %v6836_v57 = vadd.f32 %v6747_v12, %v394_v41  ;;  %v6839_v59 = vadd.f32 %v6747_v12, %v393_v42  ;;  %v6873_v41 = vld [vmem:[%s6734_s16 + $0x88] sm:$0xff]  }
  0x4f   : > { %661 = vperm.xlu1 %6129, %v491_v61   ;;  %656 = vperm.xlu0 %6128, %v490_v62   ;;  %v6783_v61 = vld [vmem:[#allocation2 + $0x4] sm:$0xf8]   ;;  %v392_v62 = vmul.f32 %v5645_v45, %v6742_v11  ;;  %v6822_v27 = vadd.f32 %v6747_v12, %v391_v4  ;;  %v1619_v40 = vor.u32 %v6808_v17, %v6806_v14 }
  0x50   : > { %4438 = vmatprep.subr.bf16.mxu0 %v6397_v2  ;;  %v1408_v22 = vrot.slane %v6783_v61, 3  ;;  %v6178_v61 = vld [vmem:[%s7962_s5 + $0x180] sm:$0xff]  }
  0x51   : > { %4262 = vmatpush1.bf16.msra.mxu1 %v6162_v6  ;;  %v6791_v6 = vrot.slane %v1075_v49, 3  ;;  %v6818_v23 = vadd.f32 %v6747_v12, %v392_v62  ;;  %v5673_v62 = vunpack.c.h.bf16 %v5793_v48 }
  0x52   : > { %4439 = vmatpush1.bf16.msra.mxu0 %v6163_v7  ;;  %5894 = vmatprep.subr.bf16.mxu1 %v6397_v2  ;;  %v6794_v7 = vadd.f32 %v6747_v12, %v386_v50  ;;  %v5660_v50 = vunpack.c.l.bf16 %v5790_v31  ;;  %v5672_v31 = vunpack.c.l.bf16 %v5793_v48 }
  0x53   : > { %671 = vperm.xlu1 %6129, %v493_v1   ;;  %666 = vperm.xlu0 %6128, %v492_v3   ;;  %v426_v3 = vadd.f32 %v6747_v12, %v383_v46  ;;  %v1078_v28 = vor.u32 %v6791_v6, %v6789_v5  ;;  %v5656_v46 = vunpack.c.l.bf16 %v5789_v24  ;;  %v401_v24 = vmul.f32 %v5664_v51, %v6742_v11  ;;  %v6171_v5 = vld [vmem:[%s7962_s5 + $0x100] sm:$0xff]  }
  0x54   : > { %4585 = vmatprep.subr.bf16.mxu0 %v6397_v2  ;;  %v399_v18 = vmul.f32 %v5660_v50, %v6742_v11  ;;  %v6893_v51 = vmul.f32 %v5672_v31, %v6742_v11 }
  0x8e   : > { %v507_v0 = vpop.permute.xlu1 %506  ;;  %v497_v1 = vpop.permute.xlu0 %496 }
  0x8f   : > { %v676_v32 = vmul.f32 %v507_v0, %v424_v37  ;;  %v674_v33 = vmul.f32 %v497_v1, %v422_v54  ;;  %v398_v0 = vmul.f32 %v5657_v43, %v6742_v11  ;;  %v397_v1 = vmul.f32 %v5656_v46, %v6742_v11 }
  0x91   : > { %v6864_v38 = vadd.f32 %v6747_v12, %v398_v0 }
  0x92   : > { %v512_v25 = vpop.permute.xlu1 %511  ;;  %v502_v26 = vpop.permute.xlu0 %501 }
  0x93   : > { %v677_v34 = vmul.f32 %v512_v25, %v425_v39  ;;  %v675_v35 = vmul.f32 %v502_v26, %v423_v55  ;;  %v5665_v39 = vunpack.c.h.bf16 %v5791_v36  ;;  %v396_v55 = vmul.f32 %v5653_v29, %v6742_v11 }
  0x94   : > { %v404_v25 = vmul.f32 %v5669_v52, %v6742_v11 }
  0x95   : > { %v5698_v44 = vpack.c.bf16 %v677_v34, %v676_v32  ;;  %v5693_v45 = vpack.c.bf16 %v675_v35, %v674_v33  ;;  %v402_v19 = vmul.f32 %v5665_v39, %v6742_v11  ;;  %v6856_v32 = vadd.f32 %v6747_v12, %v396_v55 }
  0x96   : > { %v522_v49 = vpop.permute.xlu1 %521  ;;  %v517_v37 = vpop.permute.xlu0 %516  ;;  %v6859_v33 = vadd.f32 %v6747_v12, %v395_v60  ;;  %v406_v34 = vmul.f32 %v5673_v62, %v6742_v11  ;;  %v6885_v48 = vadd.f32 %v6747_v12, %v404_v25  ;;  %v6890_v39 = vadd.f32 %v6747_v12, %v403_v30 }
  0x97   : > { %5799 = vst [vmem:[#allocation2 + $0x18] sm:$0xff] %v5698_v44   ;;  %5798 = vst [vmem:[#allocation2 + $0x10] sm:$0xff] %v5693_v45   ;;  %v679_v53 = vmul.f32 %v522_v49, %v427_v58  ;;  %v678_v54 = vmul.f32 %v517_v37, %v426_v3  ;;  %v400_v58 = vmul.f32 %v5661_v47, %v6742_v11  ;;  %v6846_v3 = vld [vmem:[%s6734_s16 + $0x80] sm:$0xff]  }
  0x98   : > { %v5677_v35 = vunpack.c.h.bf16 %v6846_v3  ;;  %v6876_v45 = vadd.f32 %v6747_v12, %v399_v18  ;;  %v6879_v46 = vadd.f32 %v6747_v12, %v402_v19  ;;  %v6882_v47 = vadd.f32 %v6747_v12, %v401_v24 }
  0x99   : > { %v5703_v63 = vpack.c.bf16 %v679_v53, %v678_v54  ;;  %v6896_v55 = vadd.f32 %v6747_v12, %v406_v34 }
  0x9a   : > { %v532_v4 = vpop.permute.xlu1 %531  ;;  %v527_v13 = vpop.permute.xlu0 %526  ;;  %v6899_v56 = vmul.f32 %v5677_v35, %v6742_v11 }
  0x9b   : > { %5800 = vst [vmem:[#allocation2 + $0x20] sm:$0xff] %v5703_v63   ;;  %v681_v26 = vmul.f32 %v532_v4, %v6794_v7  ;;  %v680_v29 = vmul.f32 %v527_v13, %v6797_v8  ;;  %v6867_v7 = vadd.f32 %v6747_v12, %v397_v1  ;;  %v6870_v8 = vadd.f32 %v6747_v12, %v400_v58 }
  0x9c   : > { %v5681_v63 = vunpack.c.h.bf16 %v6873_v41 }
  0x9d   : > { %v5708_v36 = vpack.c.bf16 %v681_v26, %v680_v29 }
  0x9e   : > { %v542_v42 = vpop.permute.xlu1 %541  ;;  %v537_v43 = vpop.permute.xlu0 %536  ;;  %v6161_v44 = vld [vmem:[#allocation2 + $0xc] sm:$0xff]   ;;  %v6167_v54 = vld [vmem:[#allocation2 + $0x14] sm:$0xff]  }
  0x9f   : > { %5801 = vst [vmem:[#allocation2 + $0x28] sm:$0xff] %v5708_v36   ;;  %v683_v49 = vmul.f32 %v542_v42, %v6800_v9  ;;  %v682_v37 = vmul.f32 %v537_v43, %v6803_v10  ;;  %v6165_v50 = vld [vmem:[#allocation2 + $0xc] sm:$0xff]   ;;  %v1409_v52 = vrot.slane %v6161_v44, 3  ;;  %v5676_v9 = vunpack.c.l.bf16 %v6846_v3  ;;  %v6906_v19 = vld [vmem:[#allocation2 + $0x14] sm:$0xff]  }
  0xa0   : > { %v6166_v53 = vld [vmem:[#allocation2 + $0xc] sm:$0xf8]   ;;  %v1080_v60 = vshrl.u32 %v6165_v50, 16  ;;  %v1083_v62 = vshll.u32 %v6165_v50, 16  ;;  %v1957_v18 = vshrl.u32 %v6167_v54, 16  ;;  %v1960_v36 = vshll.u32 %v6167_v54, 16 }
  0xa1   : > { %v5713_v10 = vpack.c.bf16 %v683_v49, %v682_v37  ;;  %v1410_v58 = vsel %vm1407_vm3, %v1408_v22, %v1409_v52  ;;  %v1949_v4 = vshrl.u32 %v6166_v53, 16  ;;  %v1952_v13 = vshll.u32 %v6166_v53, 16  ;;  %v6170_v30 = vld [vmem:[#allocation2 + $0xc] sm:$0xff]  }
  0xa2   : > { %v552_v0 = vpop.permute.xlu1 %551  ;;  %v547_v1 = vpop.permute.xlu0 %546  ;;  %4263 = vmatprep.mubr.bf16.mxu1 %v1410_v58  ;;  %v1082_v26 = vrot.slane %v1080_v60, 2  ;;  %v1085_v29 = vrot.slane %v1083_v62, 3  ;;  %v6172_v31 = vld [vmem:[#allocation2 + $0x1c] sm:$0xff]   ;;  %v1959_v35 = vrot.slane %v1957_v18, 3  ;;  %v1621_v44 = vshrl.u32 %v6170_v30, 16  ;;  %v6173_v60 = vld [vmem:[#allocation2 + $0x14] sm:$0xff]  }
  0xa3   : > { %5802 = vst [vmem:[#allocation2 + $0x30] sm:$0xff] %v5713_v10   ;;  %v685_v24 = vmul.f32 %v552_v0, %v6811_v20  ;;  %v684_v25 = vmul.f32 %v547_v1, %v6814_v21  ;;  %v1951_v22 = vrot.slane %v1949_v4, 3  ;;  %v1954_v34 = vrot.slane %v1952_v13, 4  ;;  %v6926_v58 = vld [vmem:[#allocation2 + $0x1c] sm:$0xff]   ;;  %v6184_v4 = vld [vmem:[%s7962_s5 + $0x188] sm:$0xff]  }
  0xa4   : > { %v6913_v43 = vor.u32 %v1085_v29, %v1082_v26  ;;  %v1411_v20 = vrot.slane %v6906_v19, 3  ;;  %v1962_v50 = vrot.slane %v1960_v36, 4  ;;  %v1624_v53 = vshll.u32 %v6170_v30, 16 }
  0xa5   : > { %v5718_v42 = vpack.c.bf16 %v685_v24, %v684_v25  ;;  %v1955_v37 = vor.u32 %v1954_v34, %v1951_v22  ;;  %v1966_v10 = vshrl.u32 %v6172_v31, 16  ;;  %v1623_v13 = vrot.slane %v1621_v44, 3 }
  0xa6   : > { %v562_v21 = vpop.permute.xlu1 %561  ;;  %v557_v49 = vpop.permute.xlu0 %556  ;;  %v1087_v54 = vsel %vm1070_vm4, %v1078_v28, %v6913_v43  ;;  %v1412_v1 = vsel %vm1407_vm3, %v1409_v52, %v1411_v20  ;;  %v6175_v28 = vld [vmem:[#allocation2 + $0x14] sm:$0xff]   ;;  %v1969_v24 = vshll.u32 %v6172_v31, 16  ;;  %v1089_v52 = vshrl.u32 %v6173_v60, 16  ;;  %v6176_v26 = vld [vmem:[#allocation2 + $0x24] sm:$0xff]  }
  0xa7   : > { %5803 = vst [vmem:[#allocation2 + $0x38] sm:$0xff] %v5718_v42   ;;  %v687_v62 = vmul.f32 %v562_v21, %v6818_v23  ;;  %v686_v0 = vmul.f32 %v557_v49, %v6822_v27  ;;  %4264 = vmatmul.mubr.bf16.vlgmr.msra.gmra.mrb[0].mxu1 %v1087_v54  ;;  %v1963_v23 = vor.u32 %v1962_v50, %v1959_v35  ;;  %v1626_v27 = vrot.slane %v1624_v53, 4  ;;  %v6177_v53 = vld [vmem:[%s7962_s5 + $0x108] sm:$0xff]  }
  0xa8   : > { %v1968_v6 = vrot.slane %v1966_v10, 3  ;;  %4271 = vmatprep.mubr.bf16.mxu1 %v1412_v1  ;;  %v1092_v25 = vshll.u32 %v6173_v60, 16  ;;  %5910 = vmatpush1.bf16.msra.mxu1 %v6178_v61  ;;  %v1413_v35 = vrot.slane %v6926_v58, 3  ;;  %v1630_v36 = vshrl.u32 %v6175_v28, 16  ;;  %v6179_v61 = vld [vmem:[#allocation2 + $0x1c] sm:$0xff]   ;;  %v6185_v19 = vld [vmem:[#allocation2 + $0x24] sm:$0xff]  }
  0xa9   : > { %v5723_v18 = vpack.c.bf16 %v687_v62, %v686_v0  ;;  %v1964_v29 = vsel %vm1611_vm5, %v1955_v37, %v1963_v23  ;;  %v6935_v30 = vor.u32 %v1626_v27, %v1623_v13  ;;  %5895 = vmatprep.subr.bf16.mxu1 %v6397_v2  ;;  %v1971_v44 = vrot.slane %v1969_v24, 4  ;;  %v6950_v0 = vld [vmem:[#allocation2 + $0x24] sm:$0xff]   ;;  %v6181_v27 = vld [vmem:[#allocation2 + $0x1c] sm:$0xff]  }
  0xaa   : > { %v572_v22 = vpop.permute.xlu1 %571  ;;  %v567_v34 = vpop.permute.xlu0 %566  ;;  %4440 = vmatprep.mubr.bf16.mxu0 %v1964_v29  ;;  %v1091_v21 = vrot.slane %v1089_v52, 2  ;;  %v1094_v37 = vrot.slane %v1092_v25, 3  ;;  %v1632_v50 = vrot.slane %v1630_v36, 3  ;;  %v5680_v10 = vunpack.c.l.bf16 %v6873_v41 }
  0xab   : > { %5804 = vst [vmem:[#allocation2 + $0x40] sm:$0xff] %v5723_v18   ;;  %v689_v42 = vmul.f32 %v572_v22, %v6836_v57  ;;  %v688_v31 = vmul.f32 %v567_v34, %v6839_v59  ;;  %v1628_v49 = vsel %vm1611_vm5, %v1619_v40, %v6935_v30  ;;  %v1972_v59 = vor.u32 %v1971_v44, %v1968_v6 }
  0xac   : > { %4441 = vmatmul.mubr.bf16.vlgmr.msra.gmra.mrb[0].mxu0 %v1628_v49  ;;  %v1633_v60 = vshll.u32 %v6175_v28, 16  ;;  %v1975_v62 = vshrl.u32 %v6176_v26, 16  ;;  %5911 = vmatpush1.bf16.msra.mxu1 %v6184_v4  ;;  %v6952_v40 = vor.u32 %v1094_v37, %v1091_v21  ;;  %v1978_v54 = vshll.u32 %v6176_v26, 16  ;;  %v6182_v4 = vld [vmem:[#allocation2 + $0x2c] sm:$0xff]   ;;  %v6981_v37 = vld [vmem:[#allocation2 + $0x24] sm:$0xff]  }
  0xad   : > { %v5728_v57 = vpack.c.bf16 %v689_v42, %v688_v31  ;;  %4586 = vmatpush1.bf16.msra.mxu0 %v6171_v5  ;;  %v1098_v1 = vshrl.u32 %v6179_v61, 16  ;;  %v1101_v13 = vshll.u32 %v6179_v61, 16  ;;  %5896 = vmatprep.subr.bf16.mxu1 %v6397_v2  ;;  %v1973_v18 = vsel %vm1611_vm5, %v1963_v23, %v1972_v59  ;;  %v6190_v23 = vld [vmem:[%s7962_s5 + $0x190] sm:$0xff]  }
  0xae   : > { %v582_v14 = vpop.permute.xlu1 %581  ;;  %v577_v17 = vpop.permute.xlu0 %576  ;;  %v1635_v24 = vrot.slane %v1633_v60, 4  ;;  %4587 = vmatprep.subr.bf16.mxu0 %v6397_v2  ;;  %4448 = vmatprep.mubr.bf16.mxu0 %v1973_v18  ;;  %v1096_v5 = vsel %vm1070_vm4, %v6913_v43, %v6952_v40  ;;  %v1977_v52 = vrot.slane %v1975_v62, 3  ;;  %v1980_v25 = vrot.slane %v1978_v54, 4  ;;  %v6183_v43 = vld [vmem:[%s7962_s5 + $0x110] sm:$0xff]   ;;  %v6196_v62 = vld [vmem:[%s7962_s5 + $0x198] sm:$0xff]  }
  0xaf   : > { %5805 = vst [vmem:[#allocation2 + $0x48] sm:$0xff] %v5728_v57   ;;  %v691_v6 = vmul.f32 %v582_v14, %v6856_v32  ;;  %v690_v28 = vmul.f32 %v577_v17, %v6859_v33  ;;  %v1100_v26 = vrot.slane %v1098_v1, 2  ;;  %4272 = vmatmul.mubr.bf16.gmra.mrb[4].mxu1 %v1096_v5  ;;  %v1414_v32 = vsel %vm1407_vm3, %v1411_v20, %v1413_v35  ;;  %v6999_v14 = vld [vmem:[%s6734_s16 + $0x90] sm:$0xff]  }
  0xb0   : > { %v6970_v33 = vor.u32 %v1635_v24, %v1632_v50  ;;  %v1103_v22 = vrot.slane %v1101_v13, 3  ;;  %4279 = vmatprep.mubr.bf16.mxu1 %v1414_v32  ;;  %v6975_v42 = vor.u32 %v1980_v25, %v1977_v52  ;;  %v1639_v31 = vshrl.u32 %v6181_v27, 16  ;;  %5912 = vmatpush1.bf16.msra.mxu1 %v6190_v23  ;;  %v6188_v24 = vld [vmem:[#allocation2 + $0x34] sm:$0xff]   ;;  %v6191_v32 = vld [vmem:[#allocation2 + $0x2c] sm:$0xff]  }
  0xb1   : > { %v5733_v29 = vpack.c.bf16 %v691_v6, %v690_v28  ;;  %4588 = vmatpush1.bf16.msra.mxu0 %v6177_v53  ;;  %v1642_v44 = vshll.u32 %v6181_v27, 16  ;;  %v1984_v21 = vshrl.u32 %v6182_v4, 16  ;;  %v1415_v49 = vrot.slane %v6950_v0, 3  ;;  %5897 = vmatprep.subr.bf16.mxu1 %v6397_v2  ;;  %v7006_v28 = vld [vmem:[#allocation2 + $0x2c] sm:$0xff]  }
  0xb2   : > { %v592_v34 = vpop.permute.xlu1 %591  ;;  %v587_v36 = vpop.permute.xlu0 %586  ;;  %4589 = vmatprep.subr.bf16.mxu0 %v6397_v2  ;;  %v6985_v50 = vadd.f32 %v6747_v12, %v6893_v51  ;;  %v1637_v53 = vsel %vm1611_vm5, %v6935_v30, %v6970_v33  ;;  %v6990_v57 = vor.u32 %v1103_v22, %v1100_v26  ;;  %v1641_v60 = vrot.slane %v1639_v31, 3  ;;  %v6215_v0 = vld [vmem:[%s7962_s5 + $0x1b0] sm:$0xff]  }
  0xb3   : > { %5806 = vst [vmem:[#allocation2 + $0x50] sm:$0xff] %v5733_v29   ;;  %v693_v20 = vmul.f32 %v592_v34, %v6864_v38  ;;  %v692_v61 = vmul.f32 %v587_v36, %v6867_v7  ;;  %v1644_v38 = vrot.slane %v1642_v44, 4  ;;  %v6189_v7 = vld [vmem:[%s7962_s5 + $0x118] sm:$0xff]   ;;  %v1982_v30 = vsel %vm1611_vm5, %v1972_v59, %v6975_v42 }
  0xb4   : > { %4449 = vmatmul.mubr.bf16.gmra.mrb[4].mxu0 %v1637_v53  ;;  %v1986_v17 = vrot.slane %v1984_v21, 3  ;;  %v1987_v54 = vshll.u32 %v6182_v4, 16  ;;  %v1107_v18 = vshrl.u32 %v6185_v19, 16  ;;  %v1110_v6 = vshll.u32 %v6185_v19, 16  ;;  %5913 = vmatpush1.bf16.msra.mxu1 %v6196_v62  ;;  %v6193_v53 = vld [vmem:[#allocation2 + $0x2c] sm:$0xff]   ;;  %v7052_v62 = vld [vmem:[#allocation2 + $0x3c] sm:$0xff]  }
  0xb5   : > { %v5738_v51 = vpack.c.bf16 %v693_v20, %v692_v61  ;;  %4456 = vmatprep.mubr.bf16.mxu0 %v1982_v30  ;;  %v7004_v27 = vor.u32 %v1644_v38, %v1641_v60  ;;  %4590 = vmatpush1.bf16.msra.mxu0 %v6183_v43  ;;  %v7011_v5 = vmul.f32 %v5676_v9, %v6742_v11  ;;  %v1648_v25 = vshrl.u32 %v6981_v37, 16  ;;  %v6195_v43 = vld [vmem:[%s7962_s5 + $0x120] sm:$0xff]  }
  0xb6   : > { %v602_v1 = vpop.permute.xlu1 %601  ;;  %v597_v13 = vpop.permute.xlu0 %596  ;;  %v1989_v52 = vrot.slane %v1987_v54, 4  ;;  %4591 = vmatprep.subr.bf16.mxu0 %v6397_v2  ;;  %v1105_v26 = vsel %vm1070_vm4, %v6952_v40, %v6990_v57  ;;  %v1109_v23 = vrot.slane %v1107_v18, 2  ;;  %v1112_v29 = vrot.slane %v1110_v6, 3  ;;  %5898 = vmatprep.subr.bf16.mxu1 %v6397_v2 }
  0xb7   : > { %5807 = vst [vmem:[#allocation2 + $0x58] sm:$0xff] %v5738_v51   ;;  %v695_v59 = vmul.f32 %v602_v1, %v6870_v8  ;;  %v694_v4 = vmul.f32 %v597_v13, %v6876_v45  ;;  %v5685_v3 = vunpack.c.h.bf16 %v6999_v14  ;;  %v6202_v8 = vld [vmem:[%s7962_s5 + $0x1a0] sm:$0xff]   ;;  %4280 = vmatmul.mubr.bf16.gmra.mrb[8].mxu1 %v1105_v26  ;;  %v1416_v9 = vsel %vm1407_vm3, %v1413_v35, %v1415_v49  ;;  %v6208_v35 = vld [vmem:[%s7962_s5 + $0x1a8] sm:$0xff]   ;;  %v7066_v13 = vld [vmem:[#allocation2 + $0x34] sm:$0xff]  }
  0xb8   : > { %v7029_v22 = vor.u32 %v1989_v52, %v1986_v17  ;;  %v1651_v40 = vshll.u32 %v6981_v37, 16  ;;  %4287 = vmatprep.mubr.bf16.mxu1 %v1416_v9  ;;  %v1417_v31 = vrot.slane %v7006_v28, 3  ;;  %v1993_v44 = vshrl.u32 %v6188_v24, 16  ;;  %v6201_v51 = vld [vmem:[%s7962_s5 + $0x128] sm:$0xff]   ;;  %5914 = vmatpush1.bf16.msra.mxu1 %v6202_v8 }
  0xb9   : > { %v5743_v45 = vpack.c.bf16 %v695_v59, %v694_v4  ;;  %v1996_v21 = vshll.u32 %v6188_v24, 16  ;;  %4592 = vmatpush1.bf16.msra.mxu0 %v6189_v7  ;;  %v7039_v58 = vadd.f32 %v6747_v12, %v6899_v56  ;;  %v1646_v19 = vsel %vm1611_vm5, %v6970_v33, %v7004_v27  ;;  %5899 = vmatprep.subr.bf16.mxu1 %v6397_v2  ;;  %v7075_v24 = vld [vmem:[#allocation2 + $0x34] sm:$0xff]  }
  0xba   : > { %v612_v34 = vpop.permute.xlu1 %611  ;;  %v607_v36 = vpop.permute.xlu0 %606  ;;  %v1650_v37 = vrot.slane %v1648_v25, 3  ;;  %4593 = vmatprep.subr.bf16.mxu0 %v6397_v2  ;;  %v7050_v60 = vor.u32 %v1112_v29, %v1109_v23  ;;  %v1653_v56 = vrot.slane %v1651_v40, 4  ;;  %v1995_v38 = vrot.slane %v1993_v44, 3  ;;  %v6207_v29 = vld [vmem:[%s7962_s5 + $0x130] sm:$0xff]  }
  0xbb   : > { %5808 = vst [vmem:[#allocation2 + $0x60] sm:$0xff] %v5743_v45   ;;  %v697_v20 = vmul.f32 %v612_v34, %v6879_v46  ;;  %v696_v61 = vmul.f32 %v607_v36, %v6882_v47  ;;  %v1116_v7 = vshrl.u32 %v6191_v32, 16  ;;  %v1991_v47 = vsel %vm1611_vm5, %v6975_v42, %v7029_v22  ;;  %v6223_v34 = vld [vmem:[%s7962_s5 + $0x1b8] sm:$0xff]  }
  0xbc   : > { %4457 = vmatmul.mubr.bf16.gmra.mrb[8].mxu0 %v1646_v19  ;;  %v1998_v33 = vrot.slane %v1996_v21, 4  ;;  %v1119_v30 = vshll.u32 %v6191_v32, 16  ;;  %v1418_v1 = vsel %vm1407_vm3, %v1415_v49, %v1417_v31  ;;  %v410_v18 = vmul.f32 %v5681_v63, %v6742_v11  ;;  %5915 = vmatpush1.bf16.msra.mxu1 %v6208_v35  ;;  %v7110_v21 = vld [vmem:[#allocation2 + $0x44] sm:$0xff]  }
  0xbd   : > { %v5748_v46 = vpack.c.bf16 %v697_v20, %v696_v61  ;;  %4464 = vmatprep.mubr.bf16.mxu0 %v1991_v47  ;;  %v409_v42 = vmul.f32 %v5680_v10, %v6742_v11  ;;  %4594 = vmatpush1.bf16.msra.mxu0 %v6195_v43  ;;  %v5684_v6 = vunpack.c.l.bf16 %v6999_v14  ;;  %v1657_v4 = vshrl.u32 %v6193_v53, 16  ;;  %v7103_v43 = vld [vmem:[#allocation2 + $0x34] sm:$0xff]  }
  0xbe   : > { %v622_v17 = vpop.permute.xlu1 %621  ;;  %v617_v54 = vpop.permute.xlu0 %616  ;;  %v1660_v63 = vshll.u32 %v6193_v53, 16  ;;  %4595 = vmatprep.subr.bf16.mxu0 %v6397_v2  ;;  %v1114_v41 = vsel %vm1070_vm4, %v6990_v57, %v7050_v60  ;;  %v7086_v10 = vor.u32 %v1653_v56, %v1650_v37  ;;  %v1118_v52 = vrot.slane %v1116_v7, 2  ;;  %5900 = vmatprep.subr.bf16.mxu1 %v6397_v2  ;;  %v6372_v53 = vld [vmem:[%s7961_s4] ss:$0 sm:$0xff]  ;;  %v6214_v7 = vld [vmem:[%s7962_s5 + $0x138] sm:$0xff]  }
  0xbf   : > { %5809 = vst [vmem:[#allocation2 + $0x68] sm:$0xff] %v5748_v46   ;;  %v699_v49 = vmul.f32 %v622_v17, %v6885_v48  ;;  %v698_v59 = vmul.f32 %v617_v54, %v6890_v39  ;;  %v1121_v25 = vrot.slane %v1119_v30, 3  ;;  %4288 = vmatmul.mubr.bf16.gmra.mrb[12].mxu1 %v1114_v41  ;;  %v7088_v23 = vor.u32 %v1998_v33, %v1995_v38  ;;  %v6203_v46 = vld [vmem:[#allocation2 + $0x3c] sm:$0xff]  }
  0xc0   : > { %v2002_v48 = vshrl.u32 %v7052_v62, 16  ;;  %v2005_v39 = vshll.u32 %v7052_v62, 16  ;;  %4295 = vmatprep.mubr.bf16.mxu1 %v1418_v1  ;;  %v450_v8 = vadd.f32 %v6747_v12, %v7011_v5  ;;  %v1419_v45 = vrot.slane %v7066_v13, 3  ;;  %5916 = vmatpush1.bf16.msra.mxu1 %v6215_v0 }
  0xc1   : > { %v5753_v26 = vpack.c.bf16 %v699_v49, %v698_v59  ;;  %v412_v9 = vmul.f32 %v5685_v3, %v6742_v11  ;;  %v411_v40 = vmul.f32 %v5684_v6, %v6742_v11  ;;  %4596 = vmatpush1.bf16.msra.mxu0 %v6201_v51  ;;  %v1659_v5 = vrot.slane %v1657_v4, 3  ;;  %5901 = vmatprep.subr.bf16.mxu1 %v6397_v2  ;;  %v6205_v4 = vld [vmem:[#allocation2 + $0x3c] sm:$0xff]  }
  0xc2   : > { %v632_v57 = vpop.permute.xlu1 %631  ;;  %v627_v32 = vpop.permute.xlu0 %626  ;;  %v1662_v44 = vrot.slane %v1660_v63, 4  ;;  %4597 = vmatprep.subr.bf16.mxu0 %v6397_v2  ;;  %v1655_v11 = vsel %vm1611_vm5, %v7004_v27, %v7086_v10  ;;  %v7116_v14 = vor.u32 %v1121_v25, %v1118_v52  ;;  %v1125_v3 = vshrl.u32 %v7075_v24, 16  ;;  %v6236_v63 = vld [vmem:[%s7962_s5 + $0x1c8] sm:$0xff]  }
  0xc3   : > { %5810 = vst [vmem:[#allocation2 + $0x70] sm:$0xff] %v5753_v26   ;;  %v701_v36 = vmul.f32 %v632_v57, %v6896_v55  ;;  %v700_v12 = vmul.f32 %v627_v32, %v6985_v50  ;;  %v1128_v35 = vshll.u32 %v7075_v24, 16  ;;  %v2000_v50 = vsel %vm1611_vm5, %v7029_v22, %v7088_v23  ;;  %v7132_v22 = vld [vmem:[#allocation2 + $0x3c] sm:$0xff]  }
  0xc4   : > { %4465 = vmatmul.mubr.bf16.gmra.mrb[12].mxu0 %v1655_v11  ;;  %v2004_v19 = vrot.slane %v2002_v48, 3  ;;  %v2007_v20 = vrot.slane %v2005_v39, 4  ;;  %v1420_v37 = vsel %vm1407_vm3, %v1417_v31, %v1419_v45  ;;  %v453_v56 = vadd.f32 %v6372_v53, %v410_v18  ;;  %5917 = vmatpush1.bf16.msra.mxu1 %v6223_v34 }
  0xc5   : > { %v5758_v55 = vpack.c.bf16 %v701_v36, %v700_v12  ;;  %4472 = vmatprep.mubr.bf16.mxu0 %v2000_v50  ;;  %v452_v38 = vadd.f32 %v6372_v53, %v409_v42  ;;  %4598 = vmatpush1.bf16.msra.mxu0 %v6207_v29  ;;  %v7138_v28 = vor.u32 %v1662_v44, %v1659_v5  ;;  %v1666_v31 = vshrl.u32 %v7103_v43, 16  ;;  %v7176_v12 = vld [vmem:[#allocation2 + $0x44] sm:$0xff]   ;;  %v6235_v50 = vld [vmem:[%s7962_s5 + $0x150] sm:$0xff]  }
  0xc6   : > { %v642_v61 = vpop.permute.xlu1 %641  ;;  %v637_v27 = vpop.permute.xlu0 %636  ;;  %4599 = vmatprep.subr.bf16.mxu0 %v6397_v2  ;;  %v1123_v47 = vsel %vm1070_vm4, %v7050_v60, %v7116_v14  ;;  %v1127_v33 = vrot.slane %v1125_v3, 2  ;;  %v1130_v30 = vrot.slane %v1128_v35, 3  ;;  %v1669_v17 = vshll.u32 %v7103_v43, 16  ;;  %v6222_v60 = vld [vmem:[%s7962_s5 + $0x140] sm:$0xff]   ;;  %5902 = vmatprep.subr.bf16.mxu1 %v6397_v2  ;;  %v6206_v43 = vld [vmem:[#allocation2 + $0x4c] sm:$0xff]  }
  0xc7   : > { %5811 = vst [vmem:[#allocation2 + $0x78] sm:$0xff] %v5758_v55   ;;  %v703_v62 = vmul.f32 %v642_v61, %v7039_v58  ;;  %v702_v51 = vmul.f32 %v637_v27, %v450_v8  ;;  %v6230_v58 = vld [vmem:[%s7962_s5 + $0x1c0] sm:$0xff]   ;;  %4296 = vmatmul.mubr.bf16.gmra.mrb[16].mxu1 %v1123_v47  ;;  %v7149_v1 = vor.u32 %v2007_v20, %v2004_v19  ;;  %v2011_v18 = vshrl.u32 %v7110_v21, 16  ;;  %v6242_v19 = vld [vmem:[%s7962_s5 + $0x1d0] sm:$0xff]  }
  0xc8   : > { %v2014_v42 = vshll.u32 %v7110_v21, 16  ;;  %4303 = vmatprep.mubr.bf16.mxu1 %v1420_v37  ;;  %v455_v0 = vadd.f32 %v6372_v53, %v412_v9  ;;  %v454_v49 = vadd.f32 %v6372_v53, %v411_v40  ;;  %v1421_v59 = vrot.slane %v7132_v22, 3  ;;  %5918 = vmatpush1.bf16.msra.mxu1 %v6230_v58  ;;  %v6209_v55 = vld [vmem:[#allocation2 + $0x44] sm:$0xff]   ;;  %v6212_v47 = vld [vmem:[#allocation2 + $0x54] sm:$0xff]  }
  0xc9   : > { %v5763_v54 = vpack.c.bf16 %v703_v62, %v702_v51  ;;  %4600 = vmatpush1.bf16.msra.mxu0 %v6214_v7  ;;  %v1668_v25 = vrot.slane %v1666_v31, 3  ;;  %v1134_v26 = vshrl.u32 %v6203_v46, 16  ;;  %v1664_v48 = vsel %vm1611_vm5, %v7086_v10, %v7138_v28  ;;  %5903 = vmatprep.subr.bf16.mxu1 %v6397_v2 }
  0xca   : > { %v652_v6 = vpop.permute.xlu1 %651  ;;  %v647_v24 = vpop.permute.xlu0 %646  ;;  %4601 = vmatprep.subr.bf16.mxu0 %v6397_v2  ;;  %v7165_v39 = vor.u32 %v1130_v30, %v1127_v33  ;;  %v1671_v29 = vrot.slane %v1669_v17, 4  ;;  %v1137_v57 = vshll.u32 %v6203_v46, 16  ;;  %v2009_v8 = vsel %vm1611_vm5, %v7088_v23, %v7149_v1  ;;  %v6229_v23 = vld [vmem:[%s7962_s5 + $0x148] sm:$0xff]  }
  0xcb   : > { %5812 = vst [vmem:[#allocation2 + $0x80] sm:$0xff] %v5763_v54   ;;  %v705_v41 = vmul.f32 %v652_v6, %v453_v56  ;;  %v704_v52 = vmul.f32 %v647_v24, %v452_v38  ;;  %v2013_v9 = vrot.slane %v2011_v18, 3  ;;  %v2016_v40 = vrot.slane %v2014_v42, 4  ;;  %v6248_v38 = vld [vmem:[%s7962_s5 + $0x1d8] sm:$0xff]   ;;  %v6211_v46 = vld [vmem:[#allocation2 + $0x44] sm:$0xff]   ;;  %v6213_v6 = vld [vmem:[#allocation2 + $0x4c] sm:$0xff]  }
  0xcc   : > { %4473 = vmatmul.mubr.bf16.gmra.mrb[16].mxu0 %v1664_v48  ;;  %v1422_v10 = vsel %vm1407_vm3, %v1419_v45, %v1421_v59  ;;  %v1675_v21 = vshrl.u32 %v6205_v4, 16  ;;  %v1678_v11 = vshll.u32 %v6205_v4, 16  ;;  %v1132_v13 = vsel %vm1070_vm4, %v7116_v14, %v7165_v39  ;;  %5919 = vmatpush1.bf16.msra.mxu1 %v6236_v63  ;;  %v6241_v42 = vld [vmem:[%s7962_s5 + $0x158] sm:$0xff]  }
  0xcd   : > { %v5768_v32 = vpack.c.bf16 %v705_v41, %v704_v52  ;;  %4480 = vmatprep.mubr.bf16.mxu0 %v2009_v8  ;;  %4602 = vmatpush1.bf16.msra.mxu0 %v6222_v60  ;;  %v7185_v3 = vor.u32 %v1671_v29, %v1668_v25  ;;  %v1136_v45 = vrot.slane %v1134_v26, 2  ;;  %v1139_v35 = vrot.slane %v1137_v57, 3  ;;  %v6210_v41 = vld [vmem:[#allocation2 + $0x4c] sm:$0xff]   ;;  %v6247_v26 = vld [vmem:[%s7962_s5 + $0x160] sm:$0xff]  }
  0xce   : > { %v662_v34 = vpop.permute.xlu1 %661  ;;  %v657_v36 = vpop.permute.xlu0 %656  ;;  %4603 = vmatprep.subr.bf16.mxu0 %v6397_v2  ;;  %v2017_v61 = vor.u32 %v2016_v40, %v2013_v9  ;;  %v2020_v27 = vshrl.u32 %v6206_v43, 16  ;;  %v2023_v37 = vshll.u32 %v6206_v43, 16  ;;  %5904 = vmatprep.subr.bf16.mxu1 %v6397_v2  ;;  %v1423_v56 = vrot.slane %v7176_v12, 3  ;;  %v6217_v29 = vld [vmem:[#allocation2 + $0x4c] sm:$0xff]  }
  0xcf   : > { %5813 = vst [vmem:[#allocation2 + $0x88] sm:$0xff] %v5768_v32   ;;  %v707_v5 = vmul.f32 %v662_v34, %v455_v0  ;;  %v706_v44 = vmul.f32 %v657_v36, %v454_v49  ;;  %4304 = vmatmul.mubr.bf16.gmra.mrb[20].mxu1 %v1132_v13  ;;  %v1677_v51 = vrot.slane %v1675_v21, 3  ;;  %v1680_v31 = vrot.slane %v1678_v11, 4  ;;  %v6218_v34 = vld [vmem:[#allocation2 + $0x5c] sm:$0xff]   ;;  %v7228_v11 = vld [vmem:[#allocation2 + $0x54] sm:$0xff]  }
  0xd0   : > { %4311 = vmatprep.mubr.bf16.mxu1 %v1422_v10  ;;  %v1673_v33 = vsel %vm1611_vm5, %v7138_v28, %v7185_v3  ;;  %v1140_v30 = vor.u32 %v1139_v35, %v1136_v45  ;;  %v1143_v17 = vshrl.u32 %v6209_v55, 16  ;;  %v1146_v58 = vshll.u32 %v6209_v55, 16  ;;  %5920 = vmatpush1.bf16.msra.mxu1 %v6242_v19  ;;  %v6219_v13 = vld [vmem:[#allocation2 + $0x54] sm:$0xff]  }
  0xd1   : > { %v5773_v20 = vpack.c.bf16 %v707_v5, %v706_v44  ;;  %4604 = vmatpush1.bf16.msra.mxu0 %v6229_v23  ;;  %v2025_v18 = vrot.slane %v2023_v37, 4  ;;  %5905 = vmatprep.subr.bf16.mxu1 %v6397_v2  ;;  %v1684_v28 = vshrl.u32 %v6211_v46, 16  ;;  %v1687_v60 = vshll.u32 %v6211_v46, 16 }
  0xd2   : > { %v672_v14 = vpop.permute.xlu1 %671  ;;  %v667_v53 = vpop.permute.xlu0 %666  ;;  %4605 = vmatprep.subr.bf16.mxu0 %v6397_v2  ;;  %v1141_v24 = vsel %vm1070_vm4, %v7165_v39, %v1140_v30  ;;  %v1145_v0 = vrot.slane %v1143_v17, 2  ;;  %v1148_v49 = vrot.slane %v1146_v58, 3  ;;  %v1424_v4 = vsel %vm1407_vm3, %v1421_v59, %v1423_v56 }
  0xd3   : > { %5814 = vst [vmem:[#allocation2 + $0x90] sm:$0xff] %v5773_v20   ;;  %v709_v7 = vmul.f32 %v672_v14, %v6754_v15  ;;  %v708_v62 = vmul.f32 %v667_v53, %v6757_v16  ;;  %v2018_v15 = vsel %vm1611_vm5, %v7149_v1, %v2017_v61  ;;  %v2022_v16 = vrot.slane %v2020_v27, 3  ;;  %v6221_v20 = vld [vmem:[#allocation2 + $0x54] sm:$0xff]  }
  0xd4   : > { %4481 = vmatmul.mubr.bf16.gmra.mrb[20].mxu0 %v1673_v33  ;;  %v1681_v1 = vor.u32 %v1680_v31, %v1677_v51  ;;  %5921 = vmatpush1.bf16.msra.mxu1 %v6248_v38  ;;  %v2029_v52 = vshrl.u32 %v6212_v47, 16  ;;  %v2032_v25 = vshll.u32 %v6212_v47, 16  ;;  %v1686_v48 = vrot.slane %v1684_v28, 3  ;;  %v6225_v31 = vld [vmem:[#allocation2 + $0x5c] sm:$0xff]  }
  0xd5   : > { %v5778_v54 = vpack.c.bf16 %v709_v7, %v708_v62  ;;  %4488 = vmatprep.mubr.bf16.mxu0 %v2018_v15  ;;  %4606 = vmatpush1.bf16.msra.mxu0 %v6235_v50  ;;  %v2026_v63 = vor.u32 %v2025_v18, %v2022_v16  ;;  %v1689_v39 = vrot.slane %v1687_v60, 4  ;;  %v1149_v59 = vor.u32 %v1148_v49, %v1145_v0  ;;  %v6227_v28 = vld [vmem:[#allocation2 + $0x5c] sm:$0xff]  }
  0xd6   : > { %4607 = vmatprep.subr.bf16.mxu0 %v6397_v2  ;;  %5906 = vmatprep.subr.bf16.mxu1 %v6397_v2  ;;  %v1682_v22 = vsel %vm1611_vm5, %v7185_v3, %v1681_v1  ;;  %v1152_v57 = vshrl.u32 %v6213_v6, 16  ;;  %v1155_v32 = vshll.u32 %v6213_v6, 16  ;;  %v1425_v9 = vrot.slane %v6210_v41, 3  ;;  %v6228_v41 = vld [vmem:[#allocation2 + $0x6c] sm:$0xff]  }
  0xd7   : > { %5815 = vst [vmem:[#allocation2 + $0x98] sm:$0xff] %v5778_v54   ;;  %4312 = vmatmul.mubr.bf16.gmra.mrb[24].mxu1 %v1141_v24  ;;  %v2027_v8 = vsel %vm1611_vm5, %v2017_v61, %v2026_v63  ;;  %v2031_v40 = vrot.slane %v2029_v52, 3  ;;  %v2034_v43 = vrot.slane %v2032_v25, 4  ;;  %v1693_v36 = vshrl.u32 %v6217_v29, 16  ;;  %v7238_v54 = vld [vmem:[#allocation2 + $0x5c] sm:$0xff]   ;;  %v6253_v52 = vld [vmem:[%s7962_s5 + $0x168] sm:$0xff]  }
  0xd8   : > { %4319 = vmatprep.mubr.bf16.mxu1 %v1424_v4  ;;  %v1696_v10 = vshll.u32 %v6217_v29, 16  ;;  %v1150_v23 = vsel %vm1070_vm4, %v1140_v30, %v1149_v59  ;;  %v1690_v5 = vor.u32 %v1689_v39, %v1686_v48  ;;  %v1154_v44 = vrot.slane %v1152_v57, 2  ;;  %v6231_v48 = vld [vmem:[#allocation2 + $0x64] sm:$0xff]  }
  0xd9   : > { %4608 = vmatpush1.bf16.msra.mxu0 %v6241_v42  ;;  %v1157_v21 = vrot.slane %v1155_v32, 3  ;;  %v1426_v3 = vsel %vm1407_vm3, %v1423_v56, %v1425_v9  ;;  %v2035_v45 = vor.u32 %v2034_v43, %v2031_v40  ;;  %v2038_v35 = vshrl.u32 %v6218_v34, 16  ;;  %v6224_v56 = vld [vmem:[#allocation2 + $0x64] sm:$0xff]  }
  0xda   : > { %4609 = vmatprep.subr.bf16.mxu0 %v6397_v2  ;;  %v2041_v55 = vshll.u32 %v6218_v34, 16  ;;  %v1695_v50 = vrot.slane %v1693_v36, 3  ;;  %v1698_v19 = vrot.slane %v1696_v10, 4  ;;  %v1691_v61 = vsel %vm1611_vm5, %v1681_v1, %v1690_v5  ;;  %v6254_v39 = vld [vmem:[%s7962_s5 + $0x1e0] sm:$0xff]  }
  0xdb   : > { %v1158_v27 = vor.u32 %v1157_v21, %v1154_v44  ;;  %v1161_v37 = vshrl.u32 %v6219_v13, 16  ;;  %v1164_v14 = vshll.u32 %v6219_v13, 16  ;;  %v2036_v53 = vsel %vm1611_vm5, %v2026_v63, %v2035_v45  ;;  %v6233_v34 = vld [vmem:[#allocation2 + $0x64] sm:$0xff]   ;;  %5922 = vmatpush1.bf16.msra.mxu1 %v6254_v39 }
  0xdc   : > { %4489 = vmatmul.mubr.bf16.gmra.mrb[24].mxu0 %v1682_v22  ;;  %v1427_v38 = vrot.slane %v7228_v11, 3  ;;  %v2040_v12 = vrot.slane %v2038_v35, 3  ;;  %v2043_v7 = vrot.slane %v2041_v55, 4  ;;  %v1699_v62 = vor.u32 %v1698_v19, %v1695_v50  ;;  %5907 = vmatprep.subr.bf16.mxu1 %v6397_v2  ;;  %v6234_v35 = vld [vmem:[#allocation2 + $0x74] sm:$0xff]  }
  0xdd   : > { %4496 = vmatprep.mubr.bf16.mxu0 %v2027_v8  ;;  %4610 = vmatpush1.bf16.msra.mxu0 %v6247_v26  ;;  %v1702_v51 = vshrl.u32 %v6221_v20, 16  ;;  %v1159_v46 = vsel %vm1070_vm4, %v1149_v59, %v1158_v27  ;;  %v1163_v47 = vrot.slane %v1161_v37, 2  ;;  %v1166_v33 = vrot.slane %v1164_v14, 3  ;;  %v6259_v55 = vld [vmem:[%s7962_s5 + $0x170] sm:$0xff]  }
  0xde   : > { %4611 = vmatprep.subr.bf16.mxu0 %v6397_v2  ;;  %v1705_v30 = vshll.u32 %v6221_v20, 16  ;;  %v1428_v17 = vsel %vm1407_vm3, %v1425_v9, %v1427_v38  ;;  %v2044_v58 = vor.u32 %v2043_v7, %v2040_v12  ;;  %v2047_v15 = vshrl.u32 %v6224_v56, 16  ;;  %v7251_v9 = vld [vmem:[#allocation2 + $0x64] sm:$0xff]   ;;  %v7266_v7 = vld [vmem:[#allocation2 + $0x6c] sm:$0xff]  }
  0xdf   : > { %4320 = vmatmul.mubr.bf16.gmra.mrb[28].mxu1 %v1150_v23  ;;  %v2050_v16 = vshll.u32 %v6224_v56, 16  ;;  %v1704_v18 = vrot.slane %v1702_v51, 3  ;;  %v1170_v42 = vshrl.u32 %v6225_v31, 16  ;;  %v1700_v60 = vsel %vm1611_vm5, %v1690_v5, %v1699_v62  ;;  %v6260_v20 = vld [vmem:[%s7962_s5 + $0x1e8] sm:$0xff]   ;;  %v6266_v51 = vld [vmem:[%s7962_s5 + $0x178] sm:$0xff]  }
  0xe0   : > { %4327 = vmatprep.mubr.bf16.mxu1 %v1426_v3  ;;  %v1167_v6 = vor.u32 %v1166_v33, %v1163_v47  ;;  %v1707_v24 = vrot.slane %v1705_v30, 4  ;;  %v1173_v1 = vshll.u32 %v6225_v31, 16  ;;  %v2045_v0 = vsel %vm1611_vm5, %v2035_v45, %v2044_v58  ;;  %5923 = vmatpush1.bf16.msra.mxu1 %v6260_v20  ;;  %v6239_v47 = vld [vmem:[#allocation2 + $0x6c] sm:$0xff]  }
  0xe1   : > { %v1429_v49 = vrot.slane %v7238_v54, 3  ;;  %v2049_v4 = vrot.slane %v2047_v15, 3  ;;  %v2052_v63 = vrot.slane %v2050_v16, 4  ;;  %v1172_v25 = vrot.slane %v1170_v42, 2  ;;  %4612 = vmatpush1.bf16.msra.mxu0 %v6253_v52  ;;  %5908 = vmatprep.subr.bf16.mxu1 %v6397_v2  ;;  %v6267_v54 = vld [vmem:[%s7962_s5 + $0x1f0] sm:$0xff]  }
  0xe2   : > { %v1711_v26 = vshrl.u32 %v6227_v28, 16  ;;  %v1168_v29 = vsel %vm1070_vm4, %v1158_v27, %v1167_v6  ;;  %v1708_v22 = vor.u32 %v1707_v24, %v1704_v18  ;;  %v1175_v59 = vrot.slane %v1173_v1, 3  ;;  %4613 = vmatprep.subr.bf16.mxu0 %v6397_v2 }
  0xe3   : > { %v1714_v57 = vshll.u32 %v6227_v28, 16  ;;  %v1430_v32 = vsel %vm1407_vm3, %v1427_v38, %v1429_v49  ;;  %v2053_v8 = vor.u32 %v2052_v63, %v2049_v4  ;;  %v2056_v40 = vshrl.u32 %v6228_v41, 16  ;;  %v6240_v28 = vld [vmem:[#allocation2 + $0x7c] sm:$0xff]   ;;  %v6243_v63 = vld [vmem:[#allocation2 + $0x74] sm:$0xff]  }
  0xe4   : > { %4497 = vmatmul.mubr.bf16.gmra.mrb[28].mxu0 %v1691_v61  ;;  %v2059_v43 = vshll.u32 %v6228_v41, 16  ;;  %v1713_v36 = vrot.slane %v1711_v26, 3  ;;  %v1179_v10 = vshrl.u32 %v6231_v48, 16  ;;  %v1709_v23 = vsel %vm1611_vm5, %v1699_v62, %v1708_v22  ;;  %5924 = vmatpush1.bf16.msra.mxu1 %v6267_v54 }
  0xe5   : > { %4504 = vmatprep.mubr.bf16.mxu0 %v2036_v53  ;;  %v1176_v5 = vor.u32 %v1175_v59, %v1172_v25  ;;  %v1716_v44 = vrot.slane %v1714_v57, 4  ;;  %v1182_v21 = vshll.u32 %v6231_v48, 16  ;;  %v2054_v11 = vsel %vm1611_vm5, %v2044_v58, %v2053_v8  ;;  %v6237_v53 = vld [vmem:[#allocation2 + $0x6c] sm:$0xff]   ;;  %4614 = vmatpush1.bf16.msra.mxu0 %v6259_v55  ;;  %v6245_v48 = vld [vmem:[#allocation2 + $0x74] sm:$0xff]  }
  0xe6   : > { %v1431_v13 = vrot.slane %v7251_v9, 3  ;;  %v2058_v3 = vrot.slane %v2056_v40, 3  ;;  %v2061_v45 = vrot.slane %v2059_v43, 4  ;;  %v1720_v50 = vshrl.u32 %v6233_v34, 16  ;;  %4615 = vmatprep.subr.bf16.mxu0 %v6397_v2  ;;  %5909 = vmatprep.subr.bf16.mxu1 %v6397_v2  ;;  %v6273_v59 = vld [vmem:[%s7962_s5 + $0x1f8] sm:$0xff]   ;;  %v6246_v40 = vld [vmem:[#allocation2 + $0x84] sm:$0xff]  }
  0xe7   : > { %4328 = vmatmul.mubr.bf16.gmra.mrb[32].mxu1 %v1159_v46  ;;  %v1723_v19 = vshll.u32 %v6233_v34, 16  ;;  %v1177_v61 = vsel %vm1070_vm4, %v1167_v6, %v1176_v5  ;;  %v1717_v27 = vor.u32 %v1716_v44, %v1713_v36  ;;  %v1181_v37 = vrot.slane %v1179_v10, 2  ;;  %v7280_v6 = vld [vmem:[#allocation2 + $0x74] sm:$0xff]  }
  0xe8   : > { %4335 = vmatprep.mubr.bf16.mxu1 %v1428_v17  ;;  %v1184_v14 = vrot.slane %v1182_v21, 3  ;;  %v1432_v38 = vsel %vm1407_vm3, %v1429_v49, %v1431_v13  ;;  %v2062_v12 = vor.u32 %v2061_v45, %v2058_v3  ;;  %v2065_v56 = vshrl.u32 %v6234_v35, 16  ;;  %5925 = vmatpush1.bf16.msra.mxu1 %v6273_v59 }
  0xe9   : > { %v2068_v62 = vshll.u32 %v6234_v35, 16  ;;  %v1722_v31 = vrot.slane %v1720_v50, 3  ;;  %v1725_v46 = vrot.slane %v1723_v19, 4  ;;  %v1718_v33 = vsel %vm1611_vm5, %v1708_v22, %v1717_v27  ;;  %4616 = vmatpush1.bf16.msra.mxu0 %v6266_v51  ;;  %v6244_v35 = vld [vmem:[#allocation2 + $0x7c] sm:$0xff]  }
  0xea   : > { %v1185_v30 = vor.u32 %v1184_v14, %v1181_v37  ;;  %v1188_v17 = vshrl.u32 %v6237_v53, 16  ;;  %v1191_v58 = vshll.u32 %v6237_v53, 16  ;;  %v2063_v15 = vsel %vm1611_vm5, %v2053_v8, %v2062_v12  ;;  %4762 = vmatprep.subr.bf16.mxu0 %v6397_v2 }
  0xeb   : > { %v1433_v16 = vrot.slane %v7266_v7, 3  ;;  %v2067_v18 = vrot.slane %v2065_v56, 3  ;;  %v2070_v42 = vrot.slane %v2068_v62, 4  ;;  %v1729_v24 = vshrl.u32 %v6239_v47, 16 }
  0xec   : > { %4505 = vmatmul.mubr.bf16.gmra.mrb[32].mxu0 %v1700_v60  ;;  %v1726_v60 = vor.u32 %v1725_v46, %v1722_v31  ;;  %v1186_v1 = vsel %vm1070_vm4, %v1176_v5, %v1185_v30  ;;  %v1193_v49 = vrot.slane %v1191_v58, 3  ;;  %v1732_v4 = vshll.u32 %v6239_v47, 16  ;;  %v6249_v5 = vld [vmem:[#allocation2 + $0x7c] sm:$0xff]   ;;  %v6255_v31 = vld [vmem:[#allocation2 + $0x84] sm:$0xff]  }
  0xed   : > { %4512 = vmatprep.mubr.bf16.mxu0 %v2045_v0  ;;  %v1190_v0 = vrot.slane %v1188_v17, 2  ;;  %v1434_v41 = vsel %vm1407_vm3, %v1431_v13, %v1433_v16  ;;  %v2071_v52 = vor.u32 %v2070_v42, %v2067_v18  ;;  %v2074_v25 = vshrl.u32 %v6240_v28, 16 }
  0xee   : > { %v2077_v26 = vshll.u32 %v6240_v28, 16  ;;  %v1727_v39 = vsel %vm1611_vm5, %v1717_v27, %v1726_v60  ;;  %v1731_v22 = vrot.slane %v1729_v24, 3  ;;  %v1197_v8 = vshrl.u32 %v6243_v63, 16  ;;  %v6258_v24 = vld [vmem:[#allocation2 + $0x94] sm:$0xff]  }
  0xef   : > { %4336 = vmatmul.mubr.bf16.gmra.mrb[36].mxu1 %v1168_v29  ;;  %v1435_v29 = vrot.slane %v7280_v6, 3  ;;  %v1194_v57 = vor.u32 %v1193_v49, %v1190_v0  ;;  %v1200_v9 = vshll.u32 %v6243_v63, 16  ;;  %v2072_v43 = vsel %vm1611_vm5, %v2062_v12, %v2071_v52  ;;  %v6252_v12 = vld [vmem:[#allocation2 + $0x8c] sm:$0xff]   ;;  %v6257_v6 = vld [vmem:[#allocation2 + $0x84] sm:$0xff]  }
  0xf0   : > { %4343 = vmatprep.mubr.bf16.mxu1 %v1430_v32  ;;  %v1734_v32 = vrot.slane %v1732_v4, 4  ;;  %v2076_v34 = vrot.slane %v2074_v25, 3  ;;  %v2079_v36 = vrot.slane %v2077_v26, 4  ;;  %v1738_v10 = vshrl.u32 %v6245_v48, 16 }
  0xf1   : > { %v1195_v44 = vsel %vm1070_vm4, %v1185_v30, %v1194_v57  ;;  %v1202_v13 = vrot.slane %v1200_v9, 3  ;;  %v1436_v3 = vsel %vm1407_vm3, %v1433_v16, %v1435_v29  ;;  %v2083_v55 = vshrl.u32 %v6246_v40, 16  ;;  %v7300_v30 = vld [vmem:[%s7962_s5 + $0x200] sm:$0xff]  }
  0xf2   : > { %v1735_v21 = vor.u32 %v1734_v32, %v1731_v22  ;;  %v2080_v45 = vor.u32 %v2079_v36, %v2076_v34  ;;  %v2086_v50 = vshll.u32 %v6246_v40, 16  ;;  %v1740_v19 = vrot.slane %v1738_v10, 3  ;;  %5842 = vmatprep.subr.bf16.mxu1 %v7300_v30  ;;  %v6261_v22 = vld [vmem:[#allocation2 + $0x8c] sm:$0xff]   ;;  %v6262_v36 = vld [vmem:[#allocation2 + $0x94] ss:$0 sps:$4 sm:$0x77]  }
  0xf3   : > { %v1206_v27 = vshrl.u32 %v6249_v5, 16  ;;  %v1209_v37 = vshll.u32 %v6249_v5, 16  ;;  %v1437_v56 = vrot.slane %v6244_v35, 3  ;;  %v2085_v62 = vrot.slane %v2083_v55, 3  ;;  %v6263_v40 = vld [vmem:[#allocation2 + $0x8c] sm:$0xff]  }
  0xf4   : > { %4513 = vmatmul.mubr.bf16.gmra.mrb[36].mxu0 %v1709_v23  ;;  %v1741_v23 = vshll.u32 %v6245_v48, 16  ;;  %v1736_v14 = vsel %vm1611_vm5, %v1726_v60, %v1735_v21  ;;  %v2081_v7 = vsel %vm1611_vm5, %v2071_v52, %v2080_v45  ;;  %v2088_v51 = vrot.slane %v2086_v50, 4  ;;  %v6264_v50 = vld [vmem:[#allocation2 + $0x9c] ss:$0 sps:$4 sm:$0xff]  }
  0xf5   : > { %4520 = vmatprep.mubr.bf16.mxu0 %v2054_v11  ;;  %v1199_v11 = vrot.slane %v1197_v8, 2  ;;  %v1208_v47 = vrot.slane %v1206_v27, 2  ;;  %v2092_v18 = vshrl.u32 %v6252_v12, 16  ;;  %v2095_v42 = vshll.u32 %v6252_v12, 16 }
  0xf6   : > { %v1743_v20 = vrot.slane %v1741_v23, 4  ;;  %v2089_v16 = vor.u32 %v2088_v51, %v2085_v62  ;;  %v1215_v60 = vshrl.u32 %v6255_v31, 16  ;;  %v1218_v63 = vshll.u32 %v6255_v31, 16  ;;  %v6268_v31 = vld [vmem:[#allocation2 + $0x94] ss:$0 sps:$4 sm:$0xff]  }
  0xf7   : > { %4344 = vmatmul.mubr.bf16.gmra.mrb[40].mxu1 %v1177_v61  ;;  %v6251_v61 = vld [vmem:[#allocation2 + $0x7c] sm:$0xff]   ;;  %v1203_v53 = vor.u32 %v1202_v13, %v1199_v11  ;;  %v2094_v25 = vrot.slane %v2092_v18, 3  ;;  %v2097_v26 = vrot.slane %v2095_v42, 4  ;;  %v2101_v59 = vshrl.u32 %v6258_v24, 16 }
  0xf8   : > { %4351 = vmatprep.mubr.bf16.mxu1 %v1432_v38  ;;  %v7294_v38 = vld [vmem:[#allocation2 + $0x84] sm:$0xff]   ;;  %v1744_v46 = vor.u32 %v1743_v20, %v1740_v19  ;;  %v1747_v58 = vshrl.u32 %v6251_v61, 16  ;;  %v1750_v54 = vshll.u32 %v6251_v61, 16  ;;  %v2090_v52 = vsel %vm1611_vm5, %v2080_v45, %v2089_v16  ;;  %v6265_v20 = vld [vmem:[#allocation2 + $0x94] ss:$0 sps:$4 sm:$0x77]  }
  0xf9   : > { %v1204_v17 = vsel %vm1070_vm4, %v1194_v57, %v1203_v53  ;;  %v1439_v28 = vrot.slane %v7294_v38, 3  ;;  %v1217_v48 = vrot.slane %v1215_v60, 2  ;;  %v2104_v57 = vshll.u32 %v6258_v24, 16 }
  0xfa   : > { %v1749_v49 = vrot.slane %v1747_v58, 3  ;;  %v1752_v4 = vrot.slane %v1750_v54, 4  ;;  %v1220_v9 = vrot.slane %v1218_v63, 3  ;;  %v2098_v34 = vor.u32 %v2097_v26, %v2094_v25  ;;  %v6271_v58 = vld [vmem:[#allocation2 + $0x10] sm:$0xff]  }
  0xfb   : > { %v1224_v11 = vshrl.u32 %v6261_v22, 16  ;;  %v1227_v45 = vshll.u32 %v6261_v22, 16  ;;  %v1765_v35 = vshrl.u32 %v6263_v40, 16  ;;  %v1768_v19 = vshll.u32 %v6263_v40, 16 }
  0xfc   : > { %4521 = vmatmul.mubr.bf16.gmra.mrb[40].mxu0 %v1718_v33  ;;  %v1211_v33 = vrot.slane %v1209_v37, 3  ;;  %v1753_v8 = vor.u32 %v1752_v4, %v1749_v49  ;;  %v2099_v55 = vsel %vm1611_vm5, %v2089_v16, %v2098_v34  ;;  %v1443_v61 = vrot.slane %v6262_v36, 3  ;;  %v6270_v4 = vld [vmem:[#allocation2 + $0x48] sm:$0xff]  }
  0xfd   : > { %4528 = vmatprep.mubr.bf16.mxu0 %v2063_v15  ;;  %v1438_v15 = vsel %vm1407_vm3, %v1435_v29, %v1437_v56  ;;  %v1759_v29 = vshll.u32 %v6257_v6, 16  ;;  %v1767_v62 = vrot.slane %v1765_v35, 3  ;;  %v1770_v51 = vrot.slane %v1768_v19, 4  ;;  %v7333_v35 = vld [vmem:[#allocation2 + $0x50] sm:$0xff]  }
  0xfe   : > { %v1212_v0 = vor.u32 %v1211_v33, %v1208_v47  ;;  %v1754_v13 = vsel %vm1611_vm5, %v1744_v46, %v1753_v8  ;;  %v1233_v33 = vshrl.u32 %v6265_v20, 16  ;;  %v1774_v42 = vshrl.u32 %v6268_v31, 16 }
  0xff   : > { %4352 = vmatmul.mubr.bf16.gmra.mrb[44].mxu1 %v1186_v1  ;;  %v1745_v1 = vsel %vm1611_vm5, %v1735_v21, %v1744_v46  ;;  %v1761_v5 = vrot.slane %v1759_v29, 4  ;;  %v2106_v21 = vrot.slane %v2104_v57, 4  ;;  %v1771_v18 = vor.u32 %v1770_v51, %v1767_v62  ;;  %v6275_v29 = vld [vmem:[#allocation2 + $0x48] sm:$0xff]  }
 0x100   : > { %4359 = vmatprep.mubr.bf16.mxu1 %v1434_v41  ;;  %v7307_v41 = vld [vmem:[#allocation2 + $0x8c] sm:$0xff]   ;;  %v1213_v32 = vsel %vm1070_vm4, %v1203_v53, %v1212_v0  ;;  %v1229_v53 = vrot.slane %v1227_v45, 3  ;;  %v1235_v60 = vrot.slane %v1233_v33, 2  ;;  %v1777_v24 = vshll.u32 %v6268_v31, 16  ;;  %v7348_v31 = vld [vmem:[#allocation2 + $0x58] sm:$0xff]  }
 0x101   : > { %v1441_v10 = vrot.slane %v7307_v41, 3  ;;  %v2450_v63 = vshll.u32 %v6271_v58, 16  ;;  %v6274_v41 = vld [vmem:[#allocation2 + $0x40] sm:$0xff]   ;;  %v2809_v36 = vshll.u32 %v6275_v29, 16  ;;  %v2813_v51 = vshrl.u32 %v6275_v29, 16 }
 0x103   : > { %v1442_v38 = vsel %vm1407_vm3, %v1439_v28, %v1441_v10  ;;  %v2452_v57 = vrot.slane %v2450_v63, 1  ;;  %v2811_v45 = vrot.slane %v2809_v36, 1  ;;  %v2821_v63 = vshrl.u32 %v7333_v35, 16  ;;  %v7394_v36 = vld [vmem:[#allocation2 + $0x38] sm:$0xff]  }
 0x104   : > { %4529 = vmatmul.mubr.bf16.gmra.mrb[44].mxu0 %v1727_v39  ;;  %v1756_v39 = vshrl.u32 %v6257_v6, 16 }
 0x105   : > { %4536 = vmatprep.mubr.bf16.mxu0 %v2072_v43  ;;  %v1440_v43 = vsel %vm1407_vm3, %v1437_v56, %v1439_v28  ;;  %v2113_v56 = vshll.u32 %v6264_v50, 16 }
 0x106   : > { %v1758_v23 = vrot.slane %v1756_v39, 3  ;;  %v1779_v39 = vrot.slane %v1777_v24, 4  ;;  %v7368_v24 = vld [vmem:[#allocation2 + $0x30] sm:$0xff]  }
 0x107   : > { %4360 = vmatmul.mubr.bf16.gmra.mrb[48].mxu1 %v1195_v44  ;;  %v2103_v44 = vrot.slane %v2101_v59, 3  ;;  %v2115_v16 = vrot.slane %v2113_v56, 4  ;;  %v3087_v59 = vrot.slane %v6270_v4, 1  ;;  %v6276_v56 = vld [vmem:[#allocation2 + $0x10] sm:$0xff]  }
 0x108   : > { %4367 = vmatprep.mubr.bf16.mxu1 %v1436_v3  ;;  %v1221_v3 = vor.u32 %v1220_v9, %v1217_v48  ;;  %v1762_v37 = vor.u32 %v1761_v5, %v1758_v23  ;;  %v1776_v48 = vrot.slane %v1774_v42, 3  ;;  %v2448_v9 = vshrl.u32 %v6271_v58, 16  ;;  %v6277_v5 = vld [vmem:[#allocation2 + $0x50] sm:$0xff]  }
 0x109   : > { %v2107_v12 = vor.u32 %v2106_v21, %v2103_v44  ;;  %v6278_v44 = vld [vmem:[#allocation2 + $0x20] sm:$0xff]   ;;  %v2825_v42 = vshll.u32 %v7348_v31, 16 }
 0x10a   : > { %v1222_v27 = vsel %vm1070_vm4, %v1212_v0, %v1221_v3  ;;  %v1763_v46 = vsel %vm1611_vm5, %v1753_v8, %v1762_v37  ;;  %v1444_v0 = vsel %vm1407_vm3, %v1441_v10, %v1443_v61  ;;  %v1772_v25 = vsel %vm1611_vm5, %v1762_v37, %v1771_v18  ;;  %v6288_v61 = vld [vmem:[%s7962_s5 + $0x208] sm:$0xff]  }
 0x10b   : > { %v2108_v54 = vsel %vm1611_vm5, %v2098_v34, %v2107_v12  ;;  %v2801_v8 = vshll.u32 %v6274_v41, 16  ;;  %v1780_v34 = vor.u32 %v1779_v39, %v1776_v48  ;;  %v2453_v23 = vor.u32 %v2452_v57, %v2448_v9 }
 0x10c   : > { %4537 = vmatmul.mubr.bf16.gmra.mrb[48].mxu0 %v1736_v14  ;;  %v1226_v14 = vrot.slane %v1224_v11, 2  ;;  %v2463_v19 = vshll.u32 %v6278_v44, 16  ;;  %v2479_v39 = vshll.u32 %v7368_v24, 16 }
 0x10d   : > { %4544 = vmatprep.mubr.bf16.mxu0 %v2081_v7  ;;  %v2110_v7 = vshrl.u32 %v6264_v50, 16  ;;  %v7330_v21 = vrot.slane %v2801_v8, 1  ;;  %v3089_v50 = vrot.slane %v6277_v5, 1  ;;  %v6320_v8 = vld [vmem:[%s7962_s5 + $0x228] sm:$0xff]  }
 0x10e   : > { %v1230_v47 = vor.u32 %v1229_v53, %v1226_v14  ;;  %v2817_v14 = vshll.u32 %v7333_v35, 16  ;;  %v7342_v53 = vld [vmem:[#allocation2 + $0x58] sm:$0xff]  }
 0x10f   : > { %4368 = vmatmul.mubr.bf16.gmra.mrb[52].mxu1 %v1204_v17  ;;  %v1236_v17 = vshll.u32 %v6265_v20, 16 }
 0x110   : > { %4375 = vmatprep.mubr.bf16.mxu1 %v1438_v15  ;;  %v2112_v15 = vrot.slane %v2110_v7, 3  ;;  %v1231_v28 = vsel %vm1070_vm4, %v1221_v3, %v1230_v47  ;;  %v1781_v3 = vsel %vm1611_vm5, %v1771_v18, %v1780_v34  ;;  %v7345_v7 = vld [vmem:[#allocation2 + $0x28] sm:$0xff]  }
 0x111   : > { %v1238_v6 = vrot.slane %v1236_v17, 3  ;;  %v3091_v17 = vrot.slane %v7342_v53, 1  ;;  %v2471_v58 = vshll.u32 %v7345_v7, 16  ;;  %v6291_v34 = vld [vmem:[#allocation2 + $0x68] sm:$0xff]  }
 0x112   : > { %v2116_v49 = vor.u32 %v2115_v16, %v2112_v15  ;;  %v2467_v15 = vshrl.u32 %v6278_v44, 16  ;;  %v7360_v16 = vld [vmem:[#allocation2 + $0x60] sm:$0xff]   ;;  %v2829_v44 = vshrl.u32 %v7348_v31, 16  ;;  %v3095_v35 = vrot.slane %v6291_v34, 1 }
 0x113   : > { %v1239_v26 = vor.u32 %v1238_v6, %v1235_v60  ;;  %v3092_v60 = vsel %vm3075_vm6, %v3089_v50, %v3091_v17  ;;  %v2473_v6 = vrot.slane %v2471_v58, 1  ;;  %v3093_v48 = vrot.slane %v7360_v16, 1 }
 0x114   : > { %4545 = vmatmul.mubr.bf16.gmra.mrb[52].mxu0 %v1745_v1  ;;  %v7320_v1 = vld [vmem:[#allocation2 + $0x40] sm:$0xff]   ;;  %v2117_v22 = vsel %vm1611_vm5, %v2107_v12, %v2116_v49  ;;  %v2465_v12 = vrot.slane %v2463_v19, 1  ;;  %v6280_v49 = vld [vmem:[#allocation2 + $0x18] sm:$0xff]  }
 0x115   : > { %4552 = vmatprep.mubr.bf16.mxu0 %v2090_v52  ;;  %v6272_v52 = vld [vmem:[#allocation2 + $0x18] sm:$0xff]   ;;  %v3094_v9 = vsel %vm3075_vm6, %v3091_v17, %v3093_v48  ;;  %v6377_v19 = vld [vmem:[%s7962_s5 + $0x1a0] sm:$0xff]   ;;  %v3096_v53 = vsel %vm3075_vm6, %v3093_v48, %v3095_v35 }
 0x116   : > { %v2455_v40 = vshll.u32 %v6272_v52, 16  ;;  %v2459_v37 = vshrl.u32 %v6272_v52, 16  ;;  %v2469_v4 = vor.u32 %v2467_v15, %v2465_v12  ;;  %v7375_v52 = vld [vmem:[#allocation2 + $0x60] sm:$0xff]   ;;  %v2491_v15 = vshrl.u32 %v7394_v36, 16 }
 0x117   : > { %4376 = vmatmul.mubr.bf16.gmra.mrb[56].mxu1 %v1213_v32  ;;  %v3085_v32 = vrot.slane %v7320_v1, 1  ;;  %v2833_v57 = vshll.u32 %v7375_v52, 16  ;;  %v6381_v48 = vld [vmem:[%s7962_s5 + $0x1c0] sm:$0xff]  }
 0x118   : > { %4383 = vmatprep.mubr.bf16.mxu1 %v1440_v43  ;;  %v1240_v43 = vsel %vm1070_vm4, %v1230_v47, %v1239_v26  ;;  %v2457_v11 = vrot.slane %v2455_v40, 1  ;;  %v6297_v47 = vld [vmem:[%s7962_s5 + $0x210] sm:$0xff]   ;;  %v2474_v26 = vsel %vm2446_vm7, %v2469_v4, %v2473_v6  ;;  %v2475_v40 = vshrl.u32 %v7345_v7, 16  ;;  %v6378_v7 = vld [vmem:[%s7962_s5 + $0x1a8] sm:$0xff]  }
 0x119   : > { %v3088_v10 = vsel %vm3075_vm6, %v3085_v32, %v3087_v59 }
 0x11a   : > { %v2461_v62 = vor.u32 %v2459_v37, %v2457_v11  ;;  %v2477_v5 = vor.u32 %v2475_v40, %v2473_v6  ;;  %v6380_v6 = vld [vmem:[%s7962_s5 + $0x1b8] sm:$0xff]   ;;  %v6382_v40 = vld [vmem:[%s7962_s5 + $0x1c8] sm:$0xff]  }
 0x11c   : > { %4553 = vmatmul.mubr.bf16.gmra.mrb[56].mxu0 %v1754_v13  ;;  %v2805_v13 = vshrl.u32 %v6274_v41, 16  ;;  %v2466_v33 = vsel %vm2446_vm7, %v2461_v62, %v2465_v12  ;;  %v2827_v41 = vrot.slane %v2825_v42, 1  ;;  %v6296_v12 = vld [vmem:[#allocation2 + $0x40] sm:$0xff]  }
 0x11d   : > { %4560 = vmatprep.mubr.bf16.mxu0 %v2099_v55  ;;  %v2458_v55 = vsel %vm2446_vm7, %v2453_v23, %v2457_v11  ;;  %v6376_v23 = vld [vmem:[%s7962_s5 + $0x198] sm:$0xff]   ;;  %v7400_v11 = vld [vmem:[#allocation2 + $0x68] sm:$0xff]   ;;  %v2495_v17 = vshll.u32 %v6296_v12, 16 }
 0x11e   : > { %v2807_v20 = vor.u32 %v2805_v13, %v7330_v21  ;;  %v2835_v13 = vrot.slane %v2833_v57, 1  ;;  %v2841_v37 = vshll.u32 %v7400_v11, 16 }
 0x11f   : > { %4384 = vmatmul.mubr.bf16.gmra.mrb[60].mxu1 %v1222_v27 }
 0x120   : > { %4391 = vmatprep.mubr.bf16.mxu1 %v1442_v38  ;;  %v2812_v27 = vsel %vm2446_vm7, %v2807_v20, %v2811_v45  ;;  %v3090_v38 = vsel %vm3075_vm6, %v3087_v59, %v3089_v50  ;;  %v2831_v50 = vor.u32 %v2829_v44, %v2827_v41  ;;  %v2483_v20 = vshrl.u32 %v7368_v24, 16  ;;  %v6294_v24 = vld [vmem:[#allocation2 + $0x30] sm:$0xff]  }
 0x121   : > { %v2843_v31 = vrot.slane %v2841_v37, 1  ;;  %v6304_v37 = vld [vmem:[#allocation2 + $0x40] sm:$0xff]  }
 0x124   : > { %4561 = vmatmul.mubr.bf16.gmra.mrb[60].mxu0 %v1763_v46  ;;  %v2819_v46 = vrot.slane %v2817_v14, 1  ;;  %v6335_v14 = vld [vmem:[%s7962_s5 + $0x238] sm:$0xff]  }
 0x125   : > { %4568 = vmatprep.mubr.bf16.mxu0 %v2108_v54  ;;  %v2815_v54 = vor.u32 %v2813_v51, %v2811_v45  ;;  %v2837_v51 = vshrl.u32 %v7375_v52, 16 }
 0x126   : > { %v2823_v29 = vor.u32 %v2821_v63, %v2819_v46  ;;  %v6302_v63 = vld [vmem:[#allocation2 + $0x78] sm:$0xff]  }
 0x127   : > { %4392 = vmatmul.mubr.bf16.gmra.mrb[64].mxu1 %v1231_v28  ;;  %v2820_v18 = vsel %vm2446_vm7, %v2815_v54, %v2819_v46  ;;  %v6303_v28 = vld [vmem:[%s7962_s5 + $0x218] sm:$0xff]   ;;  %v6298_v46 = vld [vmem:[#allocation2 + $0x70] sm:$0xff]   ;;  %v2839_v58 = vor.u32 %v2837_v51, %v2835_v13 }
 0x128   : > { %4399 = vmatprep.mubr.bf16.mxu1 %v1444_v0  ;;  %v6374_v0 = vld [vmem:[%s7962_s5 + $0x188] sm:$0xff]   ;;  %v2828_v59 = vsel %vm2446_vm7, %v2823_v29, %v2827_v41  ;;  %v2849_v16 = vshll.u32 %v6298_v46, 16 }
 0x129   : > { %v2844_v54 = vsel %vm2446_vm7, %v2839_v58, %v2843_v31 }
 0x12a   : > { %v2851_v4 = vrot.slane %v2849_v16, 1  ;;  %v6308_v16 = vld [vmem:[#allocation2 + $0x48] sm:$0xff]  }
 0x12c   : > { %4569 = vmatmul.mubr.bf16.gmra.mrb[64].mxu0 %v1772_v25  ;;  %v6311_v25 = vld [vmem:[%s7962_s5 + $0x220] sm:$0xff]  }
 0x12d   : > { %4576 = vmatprep.mubr.bf16.mxu0 %v2117_v22  ;;  %v6375_v22 = vld [vmem:[%s7962_s5 + $0x190] sm:$0xff]  }
 0x12f   : > { %4400 = vmatmul.mubr.bf16.gmra.mrb[68].mxu1 %v1240_v43  ;;  %v2481_v43 = vrot.slane %v2479_v39, 1  ;;  %v2499_v39 = vshrl.u32 %v6296_v12, 16  ;;  %v6312_v12 = vld [vmem:[#allocation2 + $0x88] sm:$0xff]  }
 0x130   : > { %4834 = vmatprep.mubr.bf16.mxu1 %v3088_v10  ;;  %v6285_v10 = vld [vmem:[#allocation2 + $0x20] sm:$0xff]  }
 0x131   : > { %v2482_v45 = vsel %vm2446_vm7, %v2477_v5, %v2481_v43  ;;  %v2485_v62 = vor.u32 %v2483_v20, %v2481_v43  ;;  %v6299_v43 = vld [vmem:[#allocation2 + $0x38] sm:$0xff]  }
 0x134   : > { %4577 = vmatmul.mubr.bf16.gmra.mrb[68].mxu0 %v1781_v3  ;;  %v6325_v3 = vld [vmem:[%s7962_s5 + $0x230] sm:$0xff]  }
 0x135   : > { %4617 = vmatprep.mubr.bf16.mxu0 %v2458_v55  ;;  %v2487_v55 = vshll.u32 %v7394_v36, 16  ;;  %v2853_v36 = vshrl.u32 %v6298_v46, 16 }
 0x137   : > { %4835 = vmatmul.mubr.bf16.vlgmr.msra.gmra.mrb[72].mxu1 %v2812_v27  ;;  %v2836_v27 = vsel %vm2446_vm7, %v2831_v50, %v2835_v13  ;;  %v2855_v13 = vor.u32 %v2853_v36, %v2851_v4  ;;  %v6309_v50 = vld [vmem:[#allocation2 + $0x88] sm:$0xff]  }
 0x138   : > { %4842 = vmatprep.mubr.bf16.mxu1 %v3090_v38  ;;  %5843 = vmatpush3.bf16.msra.mxu1 %v7300_v30  ;;  %v6373_v30 = vld [vmem:[%s7962_s5 + $0x180] sm:$0xff]   ;;  %v2489_v38 = vrot.slane %v2487_v55, 1 }
 0x139   : > { %5844 = vmatprep.subr.bf16.mxu1 %v6288_v61 }
 0x13c   : > { %4618 = vmatmul.mubr.bf16.vlgmr.msra.gmra.mrb[0].mxu0 %v6276_v56  ;;  %5845 = vmatpush3.bf16.msra.mxu1 %v6288_v61  ;;  %v7412_v61 = vld [vmem:[#allocation2 + $0x70] sm:$0xff]   ;;  %v6290_v56 = vld [vmem:[#allocation2 + $0x28] sm:$0xff]  }
 0x13d   : > { %4763 = vmatpush1.bf16.msra.mxu0 %v6373_v30  ;;  %4625 = vmatprep.mubr.bf16.mxu0 %v2466_v33  ;;  %v3097_v33 = vrot.slane %v7412_v61, 1  ;;  %v6379_v30 = vld [vmem:[%s7962_s5 + $0x1b0] sm:$0xff]   ;;  %v6310_v61 = vld [vmem:[#allocation2 + $0x58] sm:$0xff]  }
 0x13e   : > { %4764 = vmatprep.subr.bf16.mxu0 %v6397_v2  ;;  %5846 = vmatprep.subr.bf16.mxu1 %v6297_v47 }
 0x13f   : > { %4843 = vmatmul.mubr.bf16.gmra.mrb[76].mxu1 %v2820_v18  ;;  %v6300_v18 = vld [vmem:[#allocation2 + $0x78] sm:$0xff]   ;;  %v3098_v42 = vsel %vm3075_vm6, %v3095_v35, %v3097_v33 }
 0x140   : > { %4850 = vmatprep.mubr.bf16.mxu1 %v3092_v60  ;;  %5847 = vmatpush3.bf16.msra.mxu1 %v6297_v47  ;;  %v2490_v47 = vsel %vm2446_vm7, %v2485_v62, %v2489_v38  ;;  %v6301_v60 = vld [vmem:[#allocation2 + $0x48] sm:$0xff]   ;;  %v3099_v52 = vrot.slane %v6300_v18, 1  ;;  %v2519_v62 = vshll.u32 %v6310_v61, 16 }
 0x141   : > { %4765 = vmatpush1.bf16.msra.mxu0 %v6374_v0  ;;  %5848 = vmatprep.subr.bf16.mxu1 %v6303_v28  ;;  %v2493_v0 = vor.u32 %v2491_v15, %v2489_v38  ;;  %v2507_v35 = vshrl.u32 %v6301_v60, 16  ;;  %v6386_v15 = vld [vmem:[%s7962_s5 + $0x1e8] sm:$0xff]  }
 0x142   : > { %4766 = vmatprep.subr.bf16.mxu0 %v6397_v2  ;;  %v3100_v57 = vsel %vm3075_vm6, %v3097_v33, %v3099_v52  ;;  %v2521_v58 = vrot.slane %v2519_v62, 1 }
 0x144   : > { %4626 = vmatmul.mubr.bf16.gmra.mrb[4].mxu0 %v6280_v49  ;;  %5849 = vmatpush3.bf16.msra.mxu1 %v6303_v28  ;;  %v2497_v28 = vrot.slane %v2495_v17, 1  ;;  %v2845_v49 = vshrl.u32 %v7400_v11, 16 }
 0x145   : > { %4633 = vmatprep.mubr.bf16.mxu0 %v2474_v26  ;;  %4767 = vmatpush1.bf16.msra.mxu0 %v6375_v22  ;;  %v2857_v22 = vshll.u32 %v6302_v63, 16 }
 0x146   : > { %4768 = vmatprep.subr.bf16.mxu0 %v6397_v2  ;;  %5850 = vmatprep.subr.bf16.mxu1 %v6311_v25  ;;  %v2498_v41 = vsel %vm2446_vm7, %v2493_v0, %v2497_v28  ;;  %v2847_v26 = vor.u32 %v2845_v49, %v2843_v31  ;;  %v2501_v34 = vor.u32 %v2499_v39, %v2497_v28  ;;  %v6385_v31 = vld [vmem:[%s7962_s5 + $0x1e0] sm:$0xff]   ;;  %v6319_v39 = vld [vmem:[#allocation2 + $0x68] sm:$0xff]  }
 0x147   : > { %4851 = vmatmul.mubr.bf16.gmra.mrb[80].mxu1 %v2828_v59  ;;  %v6305_v59 = vld [vmem:[#allocation2 + $0x80] sm:$0xff]  }
 0x148   : > { %4858 = vmatprep.mubr.bf16.mxu1 %v3094_v9  ;;  %5851 = vmatpush3.bf16.msra.mxu1 %v6311_v25  ;;  %v2503_v25 = vshll.u32 %v6301_v60, 16  ;;  %v2852_v29 = vsel %vm2446_vm7, %v2847_v26, %v2851_v4  ;;  %v6306_v9 = vld [vmem:[#allocation2 + $0x50] sm:$0xff]   ;;  %v3101_v44 = vrot.slane %v6305_v59, 1 }
 0x149   : > { %4769 = vmatpush1.bf16.msra.mxu0 %v6376_v23  ;;  %5852 = vmatprep.subr.bf16.mxu1 %v6320_v8  ;;  %v6307_v23 = vld [vmem:[#allocation2 + $0x80] sm:$0xff]   ;;  %v2511_v11 = vshll.u32 %v6306_v9, 16  ;;  %v2515_v17 = vshrl.u32 %v6306_v9, 16  ;;  %v6316_v60 = vld [vmem:[#allocation2 + $0x90] sm:$0xff]  }
 0x14a   : > { %4770 = vmatprep.subr.bf16.mxu0 %v6397_v2  ;;  %v2865_v55 = vshll.u32 %v6307_v23, 16  ;;  %v6387_v4 = vld [vmem:[%s7962_s5 + $0x1f0] sm:$0xff]  }
 0x14b   : > { %v2513_v20 = vrot.slane %v2511_v11, 1 }
 0x14c   : > { %4634 = vmatmul.mubr.bf16.gmra.mrb[8].mxu0 %v6285_v10  ;;  %5853 = vmatpush3.bf16.msra.mxu1 %v6320_v8  ;;  %v2505_v8 = vrot.slane %v2503_v25, 1  ;;  %v2859_v10 = vrot.slane %v2857_v22, 1  ;;  %v2867_v38 = vrot.slane %v2865_v55, 1  ;;  %v2523_v25 = vshrl.u32 %v6310_v61, 16  ;;  %v6313_v22 = vld [vmem:[#allocation2 + $0x50] sm:$0xff]  }
 0x14d   : > { %4641 = vmatprep.mubr.bf16.mxu0 %v2482_v45  ;;  %4771 = vmatpush1.bf16.msra.mxu0 %v6377_v19  ;;  %v3102_v19 = vsel %vm3075_vm6, %v3099_v52, %v3101_v44  ;;  %v2517_v18 = vor.u32 %v2515_v17, %v2513_v20  ;;  %v6324_v55 = vld [vmem:[#allocation2 + $0x70] sm:$0xff]   ;;  %v2885_v61 = vshrl.u32 %v6316_v60, 16  ;;  %v2539_v17 = vshrl.u32 %v6319_v39, 16 }
 0x14e   : > { %4772 = vmatprep.subr.bf16.mxu0 %v6397_v2  ;;  %5854 = vmatprep.subr.bf16.mxu1 %v6325_v3  ;;  %v2506_v5 = vsel %vm2446_vm7, %v2501_v34, %v2505_v8  ;;  %v2860_v45 = vsel %vm2446_vm7, %v2855_v13, %v2859_v10  ;;  %v2525_v59 = vor.u32 %v2523_v25, %v2521_v58 }
 0x14f   : > { %4859 = vmatmul.mubr.bf16.gmra.mrb[84].mxu1 %v2836_v27  ;;  %v6384_v27 = vld [vmem:[%s7962_s5 + $0x1d8] sm:$0xff]  }
 0x150   : > { %4866 = vmatprep.mubr.bf16.mxu1 %v3096_v53  ;;  %5855 = vmatpush3.bf16.msra.mxu1 %v6325_v3  ;;  %v6383_v3 = vld [vmem:[%s7962_s5 + $0x1d0] sm:$0xff]   ;;  %v2861_v53 = vshrl.u32 %v6302_v63, 16 }
 0x151   : > { %4773 = vmatpush1.bf16.msra.mxu0 %v6378_v7  ;;  %5856 = vmatprep.subr.bf16.mxu1 %v6335_v14 }
 0x152   : > { %4774 = vmatprep.subr.bf16.mxu0 %v6397_v2  ;;  %v2863_v51 = vor.u32 %v2861_v53, %v2859_v10  ;;  %v2535_v10 = vshll.u32 %v6319_v39, 16 }
 0x154   : > { %4642 = vmatmul.mubr.bf16.gmra.mrb[12].mxu0 %v6290_v56  ;;  %5857 = vmatpush3.bf16.msra.mxu1 %v6335_v14  ;;  %v2509_v14 = vor.u32 %v2507_v35, %v2505_v8  ;;  %v3103_v56 = vrot.slane %v6309_v50, 1  ;;  %v2868_v46 = vsel %vm2446_vm7, %v2863_v51, %v2867_v38  ;;  %v2877_v8 = vshrl.u32 %v6312_v12, 16  ;;  %v6323_v35 = vld [vmem:[#allocation2 + $0xa0] sm:$0xff]   ;;  %v6317_v50 = vld [vmem:[#allocation2 + $0x58] sm:$0xff]  }
 0x155   : > { %4649 = vmatprep.mubr.bf16.mxu0 %v2490_v47  ;;  %4775 = vmatpush1.bf16.msra.mxu0 %v6379_v30  ;;  %v2873_v47 = vshll.u32 %v6312_v12, 16  ;;  %v6314_v30 = vld [vmem:[#allocation2 + $0x90] sm:$0xff]   ;;  %v2543_v12 = vshll.u32 %v6324_v55, 16  ;;  %v6329_v51 = vld [vmem:[#allocation2 + $0xa8] ss:$0 sps:$4 sm:$0x11]  }
 0x156   : > { %4776 = vmatprep.subr.bf16.mxu0 %v6397_v2  ;;  %v2514_v7 = vsel %vm2446_vm7, %v2509_v14, %v2513_v20  ;;  %v3104_v33 = vsel %vm3075_vm6, %v3101_v44, %v3103_v56 }
 0x157   : > { %4867 = vmatmul.mubr.bf16.gmra.mrb[88].mxu1 %v2844_v54  ;;  %v6315_v54 = vld [vmem:[#allocation2 + $0x60] sm:$0xff]   ;;  %v2875_v28 = vrot.slane %v2873_v47, 1  ;;  %v7496_v47 = vld [vmem:[#allocation2 + $0x78] sm:$0xff]  }
 0x158   : > { %4874 = vmatprep.mubr.bf16.mxu1 %v3098_v42  ;;  %v2869_v42 = vshrl.u32 %v6307_v23, 16  ;;  %v2527_v0 = vshll.u32 %v6315_v54, 16 }
 0x159   : > { %4777 = vmatpush1.bf16.msra.mxu0 %v6380_v6  ;;  %v2522_v6 = vsel %vm2446_vm7, %v2517_v18, %v2521_v58  ;;  %v2545_v58 = vrot.slane %v2543_v12, 1 }
 0x15a   : > { %4778 = vmatprep.subr.bf16.mxu0 %v6397_v2  ;;  %v2871_v49 = vor.u32 %v2869_v42, %v2867_v38  ;;  %v2529_v26 = vrot.slane %v2527_v0, 1  ;;  %v3109_v38 = vrot.slane %v6323_v35, 1  ;;  %v3111_v42 = vrot.slane %v6329_v51, 1 }
 0x15b   : > { %v2551_v0 = vshll.u32 %v7496_v47, 16 }
 0x15c   : > { %4650 = vmatmul.mubr.bf16.gmra.mrb[16].mxu0 %v6294_v24  ;;  %v3105_v24 = vrot.slane %v6314_v30, 1  ;;  %v2876_v63 = vsel %vm2446_vm7, %v2871_v49, %v2875_v28  ;;  %v6333_v30 = vld [vmem:[#allocation2 + $0x20] sm:$0xff]   ;;  %v3112_v39 = vsel %vm3075_vm6, %v3109_v38, %v3111_v42 }
 0x15d   : > { %4657 = vmatprep.mubr.bf16.mxu0 %v2498_v41  ;;  %4779 = vmatpush1.bf16.msra.mxu0 %v6381_v48  ;;  %v2881_v41 = vshll.u32 %v6316_v60, 16  ;;  %v6318_v48 = vld [vmem:[#allocation2 + $0x98] sm:$0xff]  }
 0x15e   : > { %4780 = vmatprep.subr.bf16.mxu0 %v6397_v2  ;;  %v3106_v52 = vsel %vm3075_vm6, %v3103_v56, %v3105_v24  ;;  %v3107_v36 = vrot.slane %v6318_v48, 1 }
 0x15f   : > { %4875 = vmatmul.mubr.bf16.gmra.mrb[92].mxu1 %v2852_v29  ;;  %v6388_v29 = vld [vmem:[%s7962_s5 + $0x1f8] sm:$0xff]   ;;  %v2883_v9 = vrot.slane %v2881_v41, 1  ;;  %v3292_v41 = vshll.u32 %v6333_v30, 16 }
 0x160   : > { %4882 = vmatprep.mubr.bf16.mxu1 %v3100_v57  ;;  %v3108_v13 = vsel %vm3075_vm6, %v3105_v24, %v3107_v36 }
 0x161   : > { %4781 = vmatpush1.bf16.msra.mxu0 %v6382_v40  ;;  %v6321_v40 = vld [vmem:[#allocation2 + $0x98] sm:$0xff]   ;;  %v2887_v56 = vor.u32 %v2885_v61, %v2883_v9 }
 0x162   : > { %4782 = vmatprep.subr.bf16.mxu0 %v6397_v2  ;;  %v2889_v11 = vshll.u32 %v6321_v40, 16 }
 0x164   : > { %4658 = vmatmul.mubr.bf16.gmra.mrb[20].mxu0 %v6299_v43  ;;  %v2530_v43 = vsel %vm2446_vm7, %v2525_v59, %v2529_v26 }
 0x165   : > { %4665 = vmatprep.mubr.bf16.mxu0 %v2506_v5  ;;  %4783 = vmatpush1.bf16.msra.mxu0 %v6383_v3  ;;  %v2879_v5 = vor.u32 %v2877_v8, %v2875_v28  ;;  %v2531_v3 = vshrl.u32 %v6315_v54, 16  ;;  %v2893_v54 = vshrl.u32 %v6321_v40, 16  ;;  %v6332_v28 = vld [vmem:[#allocation2 + $0x18] sm:$0xfe]   ;;  %v2553_v8 = vrot.slane %v2551_v0, 1 }
 0x166   : > { %4784 = vmatprep.subr.bf16.mxu0 %v6397_v2 }
 0x167   : > { %4883 = vmatmul.mubr.bf16.gmra.mrb[96].mxu1 %v2860_v45  ;;  %v2884_v44 = vsel %vm2446_vm7, %v2879_v5, %v2883_v9  ;;  %v2537_v45 = vrot.slane %v2535_v10, 1  ;;  %v6336_v9 = vld [vmem:[#allocation2 + $0x28] sm:$0xff]   ;;  %v6338_v10 = vld [vmem:[#allocation2 + $0x30] sm:$0xff]  }
 0x168   : > { %4890 = vmatprep.mubr.bf16.mxu1 %v3102_v19  ;;  %v2533_v19 = vor.u32 %v2531_v3, %v2529_v26 }
 0x169   : > { %4785 = vmatpush1.bf16.msra.mxu0 %v6384_v27  ;;  %v2891_v27 = vrot.slane %v2889_v11, 1  ;;  %v2541_v18 = vor.u32 %v2539_v17, %v2537_v45  ;;  %v6327_v11 = vld [vmem:[#allocation2 + $0x68] sm:$0xff]  }
 0x16a   : > { %4786 = vmatprep.subr.bf16.mxu0 %v6397_v2  ;;  %v2538_v14 = vsel %vm2446_vm7, %v2533_v19, %v2537_v45 }
 0x16b   : > { %v2546_v49 = vsel %vm2446_vm7, %v2541_v18, %v2545_v58 }
 0x16c   : > { %4666 = vmatmul.mubr.bf16.gmra.mrb[24].mxu0 %v6304_v37  ;;  %v6326_v37 = vld [vmem:[#allocation2 + $0xa0] sm:$0xff]  }
 0x16d   : > { %4673 = vmatprep.mubr.bf16.mxu0 %v2514_v7  ;;  %4787 = vmatpush1.bf16.msra.mxu0 %v6385_v31  ;;  %v2892_v31 = vsel %vm2446_vm7, %v2887_v56, %v2891_v27  ;;  %v2901_v25 = vshrl.u32 %v6326_v37, 16 }
 0x16e   : > { %4788 = vmatprep.subr.bf16.mxu0 %v6397_v2 }
 0x16f   : > { %4891 = vmatmul.mubr.bf16.gmra.mrb[100].mxu1 %v2868_v46  ;;  %v2897_v46 = vshll.u32 %v6326_v37, 16  ;;  %v3307_v37 = vshrl.u32 %v6338_v10, 16 }
 0x170   : > { %4898 = vmatprep.mubr.bf16.mxu1 %v3104_v33  ;;  %v3110_v33 = vsel %vm3075_vm6, %v3107_v36, %v3109_v38  ;;  %v7507_v36 = vld [vmem:[#allocation2 + $0x80] sm:$0xff]  }
 0x171   : > { %4789 = vmatpush1.bf16.msra.mxu0 %v6386_v15  ;;  %v6330_v15 = vld [vmem:[#allocation2 + $0xa8] ss:$0 sps:$4 sm:$0x11]   ;;  %v2899_v24 = vrot.slane %v2897_v46, 1 }
 0x172   : > { %4790 = vmatprep.subr.bf16.mxu0 %v6397_v2  ;;  %v2905_v26 = vshll.u32 %v6330_v15, 16  ;;  %v7517_v46 = vld [vmem:[#allocation2 + $0x88] sm:$0xff]   ;;  %v6342_v15 = vld [vmem:[#allocation2 + $0x40] sm:$0xff]  }
 0x173   : > { %v2903_v5 = vor.u32 %v2901_v25, %v2899_v24 }
 0x174   : > { %4674 = vmatmul.mubr.bf16.gmra.mrb[28].mxu0 %v6308_v16  ;;  %v6322_v16 = vld [vmem:[#allocation2 + $0x60] sm:$0xff]  }
 0x175   : > { %4681 = vmatprep.mubr.bf16.mxu0 %v2522_v6  ;;  %4791 = vmatpush1.bf16.msra.mxu0 %v6387_v4  ;;  %v2895_v6 = vor.u32 %v2893_v54, %v2891_v27  ;;  %v2559_v27 = vshll.u32 %v7507_v36, 16 }
 0x176   : > { %4792 = vmatprep.subr.bf16.mxu0 %v6397_v2 }
 0x177   : > { %4899 = vmatmul.mubr.bf16.gmra.mrb[104].mxu1 %v2876_v63  ;;  %v3289_v63 = vshrl.u32 %v6333_v30, 16  ;;  %v2900_v59 = vsel %vm2446_vm7, %v2895_v6, %v2899_v24  ;;  %v3309_v30 = vrot.slane %v3307_v37, 1 }
 0x178   : > { %4906 = vmatprep.mubr.bf16.mxu1 %v3106_v52 }
 0x179   : > { %4793 = vmatpush1.bf16.msra.mxu0 %v6388_v29  ;;  %v3281_v29 = vshrl.u32 %v6332_v28, 16  ;;  %v3291_v40 = vrot.slane %v3289_v63, 1  ;;  %v3325_v63 = vshrl.u32 %v6342_v15, 16 }
 0x17a   : > { %v7483_v57 = vpop.f32.mrb[0].mxu1 }
 0x17b   : > { %v4267_v2 = vpop.f32.mrb[1].mxu1 }
 0x17c   : > { %4682 = vmatmul.mubr.bf16.gmra.mrb[32].mxu0 %v6313_v22  ;;  %v7486_v34 = vpop.f32.mrb[2].mxu1  ;;  %v3284_v22 = vshll.u32 %v6332_v28, 16  ;;  %v2547_v2 = vshrl.u32 %v6324_v55, 16  ;;  %v3298_v55 = vshrl.u32 %v6336_v9, 16 }
 0x17d   : > { %4689 = vmatprep.mubr.bf16.mxu0 %v2530_v43  ;;  %v4270_v23 = vpop.f32.mrb[3].mxu1  ;;  %v3294_v43 = vrot.slane %v3292_v41, 2  ;;  %v3328_v41 = vshll.u32 %v6342_v15, 16 }
 0x17e   : > { %v2549_v23 = vor.u32 %v2547_v2, %v2545_v58  ;;  %v3286_v3 = vrot.slane %v3284_v22, 2  ;;  %v3300_v51 = vrot.slane %v3298_v55, 1  ;;  %v2561_v58 = vrot.slane %v2559_v27, 1  ;;  %v6344_v2 = vld [vmem:[#allocation2 + $0x48] sm:$0xff]  }
 0x17f   : > { %4907 = vmatmul.mubr.bf16.gmra.mrb[108].mxu1 %v2884_v44  ;;  %v2907_v44 = vrot.slane %v2905_v26, 1  ;;  %v3295_v61 = vor.u32 %v3294_v43, %v3291_v40  ;;  %v3330_v40 = vrot.slane %v3328_v41, 2  ;;  %v6343_v43 = vld [vmem:[#allocation2 + $0x90] sm:$0xff]  }
 0x180   : > { %4914 = vmatprep.mubr.bf16.mxu1 %v3108_v13  ;;  %v3283_v13 = vrot.slane %v3281_v29, 1  ;;  %v2554_v45 = vsel %vm2446_vm7, %v2549_v23, %v2553_v8 }
 0x181   : > { %v2908_v38 = vsel %vm2446_vm7, %v2903_v5, %v2907_v44  ;;  %v6337_v5 = vld [vmem:[#allocation2 + $0x78] sm:$0xff]  }
 0x182   : > { %v7490_v20 = vpop.f32.mrb[4].mxu1  ;;  %v3287_v56 = vor.u32 %v3286_v3, %v3283_v13  ;;  %v3334_v13 = vshrl.u32 %v6344_v2, 16  ;;  %v3337_v3 = vshll.u32 %v6344_v2, 16 }
 0x183   : > { %v4275_v53 = vpop.f32.mrb[5].mxu1 }
 0x184   : > { %4690 = vmatmul.mubr.bf16.gmra.mrb[36].mxu0 %v6317_v50  ;;  %v7493_v7 = vpop.f32.mrb[6].mxu1  ;;  %v3301_v50 = vshll.u32 %v6336_v9, 16  ;;  %v3296_v17 = vsel %vm3279_vm8, %v3287_v56, %v3295_v61  ;;  %v3327_v9 = vrot.slane %v3325_v63, 1  ;;  %v3339_v56 = vrot.slane %v3337_v3, 2 }
 0x185   : > { %4697 = vmatprep.mubr.bf16.mxu0 %v2538_v14  ;;  %v4278_v62 = vpop.f32.mrb[7].mxu1  ;;  %v3310_v14 = vshll.u32 %v6338_v10, 16  ;;  %v6346_v10 = vld [vmem:[#allocation2 + $0x50] sm:$0xff]  }
 0x186   : > { %v2555_v62 = vshrl.u32 %v7496_v47, 16  ;;  %v2567_v47 = vshll.u32 %v7517_v46, 16  ;;  %v3331_v55 = vor.u32 %v3330_v40, %v3327_v9  ;;  %v6351_v40 = vld [vmem:[#allocation2 + $0xa0] ss:$0 sps:$4 sm:$0x11]  }
 0x187   : > { %4915 = vmatmul.mubr.bf16.gmra.mrb[112].mxu1 %v2892_v31  ;;  %v3303_v31 = vrot.slane %v3301_v50, 2  ;;  %v3312_v54 = vrot.slane %v3310_v14, 2  ;;  %v2575_v50 = vshll.u32 %v6343_v43, 16 }
 0x188   : > { %4922 = vmatprep.mubr.bf16.mxu1 %v3110_v33  ;;  %v6340_v33 = vld [vmem:[#allocation2 + $0x38] sm:$0xff]   ;;  %v2557_v18 = vor.u32 %v2555_v62, %v2553_v8  ;;  %v2569_v29 = vrot.slane %v2567_v47, 1 }
 0x189   : > { %v3304_v28 = vor.u32 %v3303_v31, %v3300_v51  ;;  %v3316_v6 = vshrl.u32 %v6340_v33, 16  ;;  %v3319_v24 = vshll.u32 %v6340_v33, 16  ;;  %v6347_v62 = vld [vmem:[#allocation2 + $0x98] sm:$0xff]   ;;  %v2577_v33 = vrot.slane %v2575_v50, 1 }
 0x18a   : > { %v7499_v60 = vpop.f32.mrb[8].mxu1  ;;  %v2562_v0 = vsel %vm2446_vm7, %v2557_v18, %v2561_v58  ;;  %v6348_v51 = vld [vmem:[#allocation2 + $0x58] sm:$0xff]   ;;  %v2591_v50 = vshll.u32 %v6351_v40, 16 }
 0x18b   : > { %v4283_v4 = vpop.f32.mrb[9].mxu1  ;;  %v3318_v22 = vrot.slane %v3316_v6, 1  ;;  %v3352_v47 = vshrl.u32 %v6348_v51, 16 }
 0x18c   : > { %4698 = vmatmul.mubr.bf16.gmra.mrb[40].mxu0 %v6322_v16  ;;  %v7503_v52 = vpop.f32.mrb[10].mxu1  ;;  %v6331_v16 = vld [vmem:[#allocation2 + $0x70] sm:$0xff]   ;;  %v3313_v4 = vor.u32 %v3312_v54, %v3309_v30  ;;  %v6350_v30 = vld [vmem:[#allocation2 + $0x60] sm:$0xff]  }
 0x18d   : > { %4705 = vmatprep.mubr.bf16.mxu0 %v2546_v49  ;;  %v4286_v48 = vpop.f32.mrb[11].mxu1  ;;  %v6341_v54 = vld [vmem:[#allocation2 + $0x80] sm:$0xff]  }
 0x18e   : > { %v2563_v48 = vshrl.u32 %v7507_v36, 16  ;;  %v3314_v8 = vsel %vm3279_vm8, %v3304_v28, %v3313_v4 }
 0x18f   : > { %4923 = vmatmul.mubr.bf16.gmra.mrb[116].mxu1 %v2900_v59  ;;  %v3321_v59 = vrot.slane %v3319_v24, 2 }
 0x190   : > { %4930 = vmatprep.mubr.bf16.mxu1 %v3112_v39  ;;  %v3305_v39 = vsel %vm3279_vm8, %v3295_v61, %v3304_v28  ;;  %v2565_v23 = vor.u32 %v2563_v48, %v2561_v58  ;;  %v3346_v61 = vshll.u32 %v6346_v10, 16  ;;  %v2583_v28 = vshll.u32 %v6347_v62, 16 }
 0x191   : > { %v3322_v36 = vor.u32 %v3321_v59, %v3318_v22  ;;  %v6352_v59 = vld [vmem:[#allocation2 + $0x68] sm:$0xff]  }
 0x192   : > { %v7510_v35 = vpop.f32.mrb[12].mxu1  ;;  %v2570_v44 = vsel %vm2446_vm7, %v2565_v23, %v2569_v29  ;;  %v3348_v58 = vrot.slane %v3346_v61, 2  ;;  %v3373_v3 = vshll.u32 %v6352_v59, 16 }
 0x193   : > { %v4291_v19 = vpop.f32.mrb[13].mxu1  ;;  %v3323_v14 = vsel %vm3279_vm8, %v3313_v4, %v3322_v36  ;;  %v3332_v31 = vsel %vm3279_vm8, %v3322_v36, %v3331_v55  ;;  %v3364_v4 = vshll.u32 %v6350_v30, 16 }
 0x194   : > { %4706 = vmatmul.mubr.bf16.gmra.mrb[44].mxu0 %v6327_v11  ;;  %v7513_v53 = vpop.f32.mrb[14].mxu1  ;;  %v3343_v19 = vshrl.u32 %v6346_v10, 16  ;;  %v6354_v10 = vld [vmem:[#allocation2 + $0x70] sm:$0xff]  }
 0x195   : > { %4713 = vmatprep.mubr.bf16.mxu0 %v2554_v45  ;;  %v4294_v12 = vpop.f32.mrb[15].mxu1  ;;  %v3366_v9 = vrot.slane %v3364_v4, 2  ;;  %v3382_v61 = vshll.u32 %v6354_v10, 16 }
 0x196   : > { %v3336_v12 = vrot.slane %v3334_v13, 1  ;;  %v3370_v13 = vshrl.u32 %v6352_v59, 16 }
 0x197   : > { %4931 = vmatmul.mubr.bf16.gmra.mrb[120].mxu1 %v2908_v38  ;;  %v2571_v38 = vshrl.u32 %v7517_v46, 16  ;;  %v3355_v46 = vshll.u32 %v6348_v51, 16 }
 0x198   : > { %5858 = vmatprep.mubr.bf16.mxu1 %v3296_v17  ;;  %v3345_v17 = vrot.slane %v3343_v19, 1  ;;  %v3340_v18 = vor.u32 %v3339_v56, %v3336_v12  ;;  %v3379_v19 = vshrl.u32 %v6354_v10, 16  ;;  %v3372_v51 = vrot.slane %v3370_v13, 1  ;;  %v6353_v13 = vld [vmem:[#allocation2 + $0x98] sm:$0xff]  }
 0x199   : > { %v2573_v15 = vor.u32 %v2571_v38, %v2569_v29  ;;  %v3354_v29 = vrot.slane %v3352_v47, 1  ;;  %v3357_v22 = vrot.slane %v3355_v46, 2 }
 0x19a   : > { %v7520_v42 = vpop.f32.mrb[16].mxu1  ;;  %v3341_v48 = vsel %vm3279_vm8, %v3331_v55, %v3340_v18 }
 0x19b   : > { %v4299_v49 = vpop.f32.mrb[17].mxu1  ;;  %v2578_v6 = vsel %vm2446_vm7, %v2573_v15, %v2577_v33  ;;  %v6360_v15 = vld [vmem:[#allocation2 + $0x80] sm:$0xff]  }
 0x19c   : > { %4714 = vmatmul.mubr.bf16.gmra.mrb[48].mxu0 %v6331_v16  ;;  %v7524_v25 = vpop.f32.mrb[18].mxu1  ;;  %v3361_v49 = vshrl.u32 %v6350_v30, 16  ;;  %v3381_v30 = vrot.slane %v3379_v19, 1  ;;  %v3397_v4 = vshrl.u32 %v6360_v15, 16 }
 0x19d   : > { %4721 = vmatprep.mubr.bf16.mxu0 %v2562_v0  ;;  %7965 = vst [vmem:[#allocation4_spill] sm:$0xff] %v7524_v25  ;;  %v4302_v26 = vpop.f32.mrb[19].mxu1  ;;  %v3349_v0 = vor.u32 %v3348_v58, %v3345_v17  ;;  %v2593_v58 = vrot.slane %v2591_v50, 1 }
 0x19e   : > { %v2579_v26 = vshrl.u32 %v6343_v43, 16  ;;  %v3358_v43 = vor.u32 %v3357_v22, %v3354_v29  ;;  %v6355_v29 = vld [vmem:[#allocation2 + $0x18] sm:$0xfe]  }
 0x19f   : > { %5859 = vmatmul.mubr.bf16.vlgmr.msra.gmra.mrb[124].mxu1 %v3305_v39  ;;  %v2585_v39 = vrot.slane %v2583_v28, 1  ;;  %v3350_v2 = vsel %vm3279_vm8, %v3340_v18, %v3349_v0  ;;  %v6349_v18 = vld [vmem:[#allocation2 + $0x90] sm:$0xff]  }
 0x1a0   : > { %5862 = vmatprep.mubr.bf16.mxu1 %v3314_v8  ;;  %v3363_v8 = vrot.slane %v3361_v49, 1  ;;  %v2581_v23 = vor.u32 %v2579_v26, %v2577_v33  ;;  %v3359_v12 = vsel %vm3279_vm8, %v3349_v0, %v3358_v43  ;;  %v6357_v33 = vld [vmem:[#allocation2 + $0x78] sm:$0xff]   ;;  %v7554_v49 = vld [vmem:[#allocation2 + $0x20] sm:$0xff]  }
 0x1a1   : > { %v3391_v46 = vshll.u32 %v6357_v33, 16  ;;  %v3077_v10 = vrot.slane %v7554_v49, 1 }
 0x1a2   : > { %v7530_v11 = vpop.f32.mrb[20].mxu1  ;;  %v3367_v55 = vor.u32 %v3366_v9, %v3363_v8  ;;  %v7559_v8 = vld [vmem:[#allocation2 + $0x20] sm:$0xff]   ;;  %v6362_v9 = vld [vmem:[#allocation2 + $0x88] sm:$0xff]  }
 0x1a3   : > { %v4307_v45 = vpop.f32.mrb[21].mxu1  ;;  %v2769_v50 = vshll.u32 %v7559_v8, 16  ;;  %v3406_v19 = vshrl.u32 %v6362_v9, 16 }
 0x1a4   : > { %4722 = vmatmul.mubr.bf16.gmra.mrb[52].mxu0 %v6337_v5  ;;  %v7532_v27 = vpop.f32.mrb[22].mxu1  ;;  %v6345_v5 = vld [vmem:[#allocation2 + $0x88] sm:$0xff]   ;;  %v3368_v17 = vsel %vm3279_vm8, %v3358_v43, %v3367_v55 }
 0x1a5   : > { %4729 = vmatprep.mubr.bf16.mxu0 %v2570_v44  ;;  %v4310_v37 = vpop.f32.mrb[23].mxu1  ;;  %v2586_v44 = vsel %vm2446_vm7, %v2581_v23, %v2585_v39  ;;  %v3399_v23 = vrot.slane %v3397_v4, 1 }
 0x1a7   : > { %5863 = vmatmul.mubr.bf16.gmra.mrb[128].mxu1 %v3323_v14  ;;  %v2587_v14 = vshrl.u32 %v6347_v62, 16  ;;  %v3388_v62 = vshrl.u32 %v6357_v33, 16 }
 0x1a8   : > { %5866 = vmatprep.mubr.bf16.mxu1 %v3332_v31  ;;  %v3375_v31 = vrot.slane %v3373_v3, 2  ;;  %v3076_v3 = vrot.slane %v6355_v29, 1 }
 0x1a9   : > { %v2589_v56 = vor.u32 %v2587_v14, %v2585_v39  ;;  %v3390_v59 = vrot.slane %v3388_v62, 1 }
 0x1aa   : > { %v7537_v16 = vpop.f32.mrb[24].mxu1  ;;  %v3376_v47 = vor.u32 %v3375_v31, %v3372_v51  ;;  %v3078_v14 = vsel %vm3075_vm6, %v3076_v3, %v3077_v10  ;;  %v6370_v3 = vld [vmem:[#allocation2 + $0xa8] ss:$0 sps:$4 sm:$0x33]  }
 0x1ab   : > { %v4315_v24 = vpop.f32.mrb[25].mxu1 }
 0x1ac   : > { %4730 = vmatmul.mubr.bf16.gmra.mrb[56].mxu0 %v6341_v54  ;;  %v7540_v63 = vpop.f32.mrb[26].mxu1  ;;  %v3384_v54 = vrot.slane %v3382_v61, 2  ;;  %v3377_v22 = vsel %vm3279_vm8, %v3367_v55, %v3376_v47  ;;  %v3409_v61 = vshll.u32 %v6362_v9, 16 }
 0x1ad   : > { %4737 = vmatprep.mubr.bf16.mxu0 %v2578_v6  ;;  %v4318_v41 = vpop.f32.mrb[27].mxu1  ;;  %v2594_v6 = vsel %vm2446_vm7, %v2589_v56, %v2593_v58  ;;  %v6361_v56 = vld [vmem:[#allocation2 + $0x28] sm:$0xff]  }
 0x1ae   : > { %v3385_v0 = vor.u32 %v3384_v54, %v3381_v30  ;;  %v3400_v41 = vshll.u32 %v6360_v15, 16  ;;  %v7569_v54 = vld [vmem:[#allocation2 + $0x28] sm:$0xff]   ;;  %v3411_v62 = vrot.slane %v3409_v61, 2 }
 0x1af   : > { %5867 = vmatmul.mubr.bf16.gmra.mrb[132].mxu1 %v3341_v48  ;;  %v6358_v48 = vld [vmem:[#allocation2 + $0x18] sm:$0xff]   ;;  %v2777_v29 = vshll.u32 %v7569_v54, 16 }
 0x1b0   : > { %5870 = vmatprep.mubr.bf16.mxu1 %v3350_v2  ;;  %v3393_v2 = vrot.slane %v3391_v46, 2  ;;  %v3386_v40 = vsel %vm3279_vm8, %v3376_v47, %v3385_v0  ;;  %v2764_v43 = vshll.u32 %v6358_v48, 16  ;;  %v2762_v30 = vshrl.u32 %v6358_v48, 16  ;;  %v6366_v46 = vld [vmem:[#allocation2 + $0x98] sm:$0xff]  }
 0x1b1   : > { %v3408_v47 = vrot.slane %v3406_v19, 1  ;;  %v2779_v61 = vrot.slane %v2777_v29, 1 }
 0x1b2   : > { %v7545_v36 = vpop.f32.mrb[28].mxu1  ;;  %v3394_v55 = vor.u32 %v3393_v2, %v3390_v59  ;;  %v3424_v59 = vshrl.u32 %v6366_v46, 16  ;;  %v3427_v2 = vshll.u32 %v6366_v46, 16 }
 0x1b3   : > { %v4323_v45 = vpop.f32.mrb[29].mxu1 }
 0x1b4   : > { %4738 = vmatmul.mubr.bf16.gmra.mrb[60].mxu0 %v6345_v5  ;;  %v7547_v37 = vpop.f32.mrb[30].mxu1  ;;  %v3402_v5 = vrot.slane %v3400_v41, 2  ;;  %v3395_v15 = vsel %vm3279_vm8, %v3385_v0, %v3394_v55  ;;  %v6368_v41 = vld [vmem:[#allocation2 + $0xa0] sm:$0xff]   ;;  %v3412_v0 = vor.u32 %v3411_v62, %v3408_v47 }
 0x1b5   : > { %4745 = vmatprep.mubr.bf16.mxu0 %v2586_v44  ;;  %v4326_v38 = vpop.f32.mrb[31].mxu1  ;;  %v6364_v44 = vld [vmem:[#allocation2 + $0x90] sm:$0xff]  }
 0x1b6   : > { %v3415_v51 = vshrl.u32 %v6364_v44, 16  ;;  %v3418_v31 = vshll.u32 %v6364_v44, 16  ;;  %v3433_v44 = vshrl.u32 %v6368_v41, 16 }
 0x1b7   : > { %5871 = vmatmul.mubr.bf16.gmra.mrb[136].mxu1 %v3359_v12  ;;  %v3403_v12 = vor.u32 %v3402_v5, %v3399_v23  ;;  %v6365_v5 = vld [vmem:[#allocation2 + $0x30] sm:$0xff]  }
 0x1b8   : > { %5874 = vmatprep.mubr.bf16.mxu1 %v3368_v17  ;;  %v2766_v17 = vrot.slane %v2764_v43, 1  ;;  %v3417_v49 = vrot.slane %v3415_v51, 1  ;;  %v3420_v4 = vrot.slane %v3418_v31, 2  ;;  %v3436_v43 = vshll.u32 %v6368_v41, 16 }
 0x1b9   : > { %v3413_v19 = vsel %vm3279_vm8, %v3403_v12, %v3412_v0  ;;  %v3081_v51 = vrot.slane %v6365_v5, 1  ;;  %v3435_v31 = vrot.slane %v3433_v44, 1 }
 0x1ba   : > { %v7551_v28 = vpop.f32.mrb[32].mxu1  ;;  %v3421_v23 = vor.u32 %v3420_v4, %v3417_v49  ;;  %v6369_v4 = vld [vmem:[#allocation2 + $0x38] sm:$0xff]  }
 0x1bb   : > { %v4331_v24 = vpop.f32.mrb[33].mxu1 }
 0x1bc   : > { %4746 = vmatmul.mubr.bf16.gmra.mrb[64].mxu0 %v6349_v18  ;;  %v7556_v26 = vpop.f32.mrb[34].mxu1  ;;  %v2771_v18 = vrot.slane %v2769_v50, 1  ;;  %v3079_v24 = vrot.slane %v6361_v56, 1  ;;  %v2773_v50 = vshrl.u32 %v7559_v8, 16  ;;  %v6367_v56 = vld [vmem:[#allocation2 + $0x30] sm:$0xff]  }
 0x1bd   : > { %4753 = vmatprep.mubr.bf16.mxu0 %v2594_v6  ;;  %v4334_v39 = vpop.f32.mrb[35].mxu1  ;;  %v3404_v6 = vsel %vm3279_vm8, %v3394_v55, %v3403_v12  ;;  %v2785_v12 = vshll.u32 %v6367_v56, 16 }
 0x1be   : > { %v2767_v39 = vor.u32 %v2766_v17, %v2762_v30  ;;  %v3080_v9 = vsel %vm3075_vm6, %v3077_v10, %v3079_v24  ;;  %v3422_v10 = vsel %vm3279_vm8, %v3412_v0, %v3421_v23  ;;  %v3438_v17 = vrot.slane %v3436_v43, 2 }
 0x1bf   : > { %5875 = vmatmul.mubr.bf16.gmra.mrb[140].mxu1 %v3377_v22  ;;  %v3442_v30 = vshrl.u32 %v6370_v3, 16  ;;  %v3082_v46 = vsel %vm3075_vm6, %v3079_v24, %v3081_v51  ;;  %v2781_v0 = vshrl.u32 %v7569_v54, 16 }
 0x1c0   : > { %5878 = vmatprep.mubr.bf16.mxu1 %v3386_v40  ;;  %v2772_v48 = vsel %vm2446_vm7, %v2767_v39, %v2771_v18  ;;  %v3439_v49 = vor.u32 %v3438_v17, %v3435_v31 }
 0x1c1   : > { %v3444_v39 = vrot.slane %v3442_v30, 1  ;;  %v2783_v24 = vor.u32 %v2781_v0, %v2779_v61 }
 0x1c2   : > { %v7563_v45 = vpop.f32.mrb[36].mxu1 }
 0x1c3   : > { %v4339_v38 = vpop.f32.mrb[37].mxu1 }
 0x1c4   : > { %4754 = vmatmul.mubr.bf16.gmra.mrb[68].mxu0 %v6353_v13  ;;  %v7567_v33 = vpop.f32.mrb[38].mxu1  ;;  %v3429_v38 = vrot.slane %v3427_v2, 2  ;;  %v6371_v2 = vld [vmem:[#allocation2 + $0x38] sm:$0xff]  }
 0x1c5   : > { %4794 = vmatprep.mubr.bf16.mxu0 %v3078_v14  ;;  %v4342_v58 = vpop.f32.mrb[39].mxu1  ;;  %v3426_v14 = vrot.slane %v3424_v59, 1  ;;  %v2787_v59 = vrot.slane %v2785_v12, 1 }
 0x1c6   : > { %v2775_v58 = vor.u32 %v2773_v50, %v2771_v18 }
 0x1c7   : > { %5879 = vmatmul.mubr.bf16.gmra.mrb[144].mxu1 %v3395_v15  ;;  %v3445_v15 = vshll.u32 %v6370_v3, 16  ;;  %v3430_v8 = vor.u32 %v3429_v38, %v3426_v14  ;;  %v2788_v44 = vsel %vm2446_vm7, %v2783_v24, %v2787_v59  ;;  %v2793_v3 = vshll.u32 %v6371_v2, 16 }
 0x1c8   : > { %5882 = vmatprep.mubr.bf16.mxu1 %v3404_v6  ;;  %v2780_v47 = vsel %vm2446_vm7, %v2775_v58, %v2779_v61  ;;  %v2789_v14 = vshrl.u32 %v6367_v56, 16 }
 0x1c9   : > { %v3447_v18 = vrot.slane %v3445_v15, 2  ;;  %v2795_v38 = vrot.slane %v2793_v3, 1  ;;  %v2797_v15 = vshrl.u32 %v6371_v2, 16 }
 0x1ca   : > { %v7575_v22 = vpop.f32.mrb[40].mxu1  ;;  %v2791_v61 = vor.u32 %v2789_v14, %v2787_v59 }
 0x1cb   : > { %v4347_v40 = vpop.f32.mrb[41].mxu1  ;;  %v3448_v5 = vor.u32 %v3447_v18, %v3444_v39 }
 0x1cc   : > { %4795 = vmatmul.mubr.bf16.vlgmr.msra.gmra.mrb[0].mxu0 %v2772_v48  ;;  %v7578_v13 = vpop.f32.mrb[42].mxu1  ;;  %v3431_v48 = vsel %vm3279_vm8, %v3421_v23, %v3430_v8  ;;  %v3083_v40 = vrot.slane %v6369_v4, 1 }
 0x1cd   : > { %4802 = vmatprep.mubr.bf16.mxu0 %v3080_v9  ;;  %v4350_v55 = vpop.f32.mrb[43].mxu1  ;;  %v3440_v9 = vsel %vm3279_vm8, %v3430_v8, %v3439_v49  ;;  %v3449_v50 = vsel %vm3279_vm8, %v3439_v49, %v3448_v5 }
 0x1ce   : > { %v3084_v55 = vsel %vm3075_vm6, %v3081_v51, %v3083_v40  ;;  %v3086_v51 = vsel %vm3075_vm6, %v3083_v40, %v3085_v32 }
 0x1cf   : > { %5883 = vmatmul.mubr.bf16.gmra.mrb[148].mxu1 %v3413_v19 }
 0x1d0   : > { %5886 = vmatprep.mubr.bf16.mxu1 %v3422_v10  ;;  %v2796_v10 = vsel %vm2446_vm7, %v2791_v61, %v2795_v38 }
 0x1d2   : > { %v7584_v62 = vpop.f32.mrb[44].mxu1 }
 0x1d3   : > { %v4355_v6 = vpop.f32.mrb[45].mxu1 }
 0x1d4   : > { %4803 = vmatmul.mubr.bf16.gmra.mrb[4].mxu0 %v2780_v47  ;;  %v7587_v41 = vpop.f32.mrb[46].mxu1  ;;  %v2799_v47 = vor.u32 %v2797_v15, %v2795_v38 }
 0x1d5   : > { %4810 = vmatprep.mubr.bf16.mxu0 %v3082_v46  ;;  %v4358_v29 = vpop.f32.mrb[47].mxu1 }
 0x1d6   : > { %v2804_v56 = vsel %vm2446_vm7, %v2799_v47, %v7330_v21 }
 0x1d7   : > { %5887 = vmatmul.mubr.bf16.gmra.mrb[152].mxu1 %v3431_v48 }
 0x1d8   : > { %5890 = vmatprep.mubr.bf16.mxu1 %v3440_v9 }
 0x1da   : > { %v7593_v43 = vpop.f32.mrb[48].mxu1 }
 0x1db   : > { %v4363_v23 = vpop.f32.mrb[49].mxu1 }
 0x1dc   : > { %4811 = vmatmul.mubr.bf16.gmra.mrb[8].mxu0 %v2788_v44  ;;  %v7596_v54 = vpop.f32.mrb[50].mxu1 }
 0x1dd   : > { %4818 = vmatprep.mubr.bf16.mxu0 %v3084_v55  ;;  %v4366_v19 = vpop.f32.mrb[51].mxu1 }
 0x1df   : > { %5891 = vmatmul.mubr.bf16.gmra.mrb[156].mxu1 %v3449_v50 }
 0x1e2   : > { %v7600_v31 = vpop.f32.mrb[52].mxu1 }
 0x1e3   : > { %v4371_v17 = vpop.f32.mrb[53].mxu1 }
 0x1e4   : > { %4819 = vmatmul.mubr.bf16.gmra.mrb[12].mxu0 %v2796_v10  ;;  %v7605_v58 = vpop.f32.mrb[54].mxu1 }
 0x1e5   : > { %4826 = vmatprep.mubr.bf16.mxu0 %v3086_v51  ;;  %v4374_v30 = vpop.f32.mrb[55].mxu1 }
 0x1ea   : > { %v7609_v8 = vpop.f32.mrb[56].mxu1 }
 0x1eb   : > { %v4379_v12 = vpop.f32.mrb[57].mxu1 }
 0x1ec   : > { %4827 = vmatmul.mubr.bf16.gmra.mrb[16].mxu0 %v2804_v56  ;;  %v7611_v46 = vpop.f32.mrb[58].mxu1 }
 0x1ed   : > { %v4382_v6 = vpop.f32.mrb[59].mxu1 }
 0x1f2   : > { %v7613_v1 = vpop.f32.mrb[60].mxu1 }
 0x1f3   : > { %v4387_v32 = vpop.f32.mrb[61].mxu1 }
 0x1f4   : > { %v7615_v49 = vpop.f32.mrb[62].mxu1  ;;  %v7638_v32 = vld [vmem:[%s7963_s6] ss:$0 sm:$0xff] }
 0x1f5   : > { %v4390_v4 = vpop.f32.mrb[63].mxu1 }
 0x1fa   : > { %v7617_v39 = vpop.f32.mrb[64].mxu1 }
 0x1fb   : > { %v4395_v18 = vpop.f32.mrb[65].mxu1 }
 0x1fc   : > { %v7619_v29 = vpop.f32.mrb[66].mxu1  ;;  %v4306_v18 = vadd.f32 %v7638_v32, %v7530_v11  ;;  %v4314_v11 = vadd.f32 %v7638_v32, %v7537_v16  ;;  %v4322_v16 = vadd.f32 %v7638_v32, %v7545_v36  ;;  %v4330_v36 = vadd.f32 %v7638_v32, %v7551_v28 }
 0x1fd   : > { %v4398_v48 = vpop.f32.mrb[67].mxu1 }
 0x202   : > { %v7621_v21 = vpop.f32.mrb[68].mxu1 }
 0x203   : > { %v4403_v0 = vpop.f32.mrb[69].mxu1 }
 0x204   : > { %v7623_v59 = vpop.f32.mrb[70].mxu1 }
 0x205   : > { %v4406_v2 = vpop.f32.mrb[71].mxu1 }
 0x206   : > { %v4309_v2 = vadd.f32 %v7638_v32, %v7532_v27  ;;  %v4317_v27 = vadd.f32 %v7638_v32, %v7540_v63  ;;  %v4325_v63 = vadd.f32 %v7638_v32, %v7547_v37  ;;  %v4333_v37 = vadd.f32 %v7638_v32, %v7556_v26 }
 0x20a   : > { %v4836_v9 = vpop.f32.mrb[72].mxu1 }
 0x20b   : > { %v4838_v40 = vpop.f32.mrb[73].mxu1 }
 0x20c   : > { %v4839_v24 = vpop.f32.mrb[74].mxu1 }
 0x20d   : > { %v4841_v5 = vpop.f32.mrb[75].mxu1 }
 0x212   : > { %v4844_v44 = vpop.f32.mrb[76].mxu1 }
 0x213   : > { %v4846_v3 = vpop.f32.mrb[77].mxu1 }
 0x214   : > { %v4847_v55 = vpop.f32.mrb[78].mxu1 }
 0x215   : > { %v4849_v23 = vpop.f32.mrb[79].mxu1 }
 0x21a   : > { %v4852_v50 = vpop.f32.mrb[80].mxu1 }
 0x21b   : > { %v4854_v19 = vpop.f32.mrb[81].mxu1 }
 0x21c   : > { %v4855_v14 = vpop.f32.mrb[82].mxu1 }
 0x21d   : > { %v4857_v38 = vpop.f32.mrb[83].mxu1 }
 0x222   : > { %v7625_v61 = vpop.f32.mrb[84].mxu1 }
 0x223   : > { %v4862_v10 = vpop.f32.mrb[85].mxu1 }
 0x224   : > { %v7627_v51 = vpop.f32.mrb[86].mxu1 }
 0x225   : > { %v4865_v17 = vpop.f32.mrb[87].mxu1 }
 0x22a   : > { %v7629_v30 = vpop.f32.mrb[88].mxu1 }
 0x22b   : > { %v4870_v15 = vpop.f32.mrb[89].mxu1 }
 0x22c   : > { %v7631_v47 = vpop.f32.mrb[90].mxu1 }
 0x22d   : > { %v4873_v56 = vpop.f32.mrb[91].mxu1 }
 0x232   : > { %v7633_v12 = vpop.f32.mrb[92].mxu1 }
 0x233   : > { %v4878_v6 = vpop.f32.mrb[93].mxu1 }
 0x234   : > { %v7640_v4 = vpop.f32.mrb[94].mxu1 }
 0x235   : > { %v4881_v48 = vpop.f32.mrb[95].mxu1 }
 0x237   : > { %v4659_v0 = vpop.f32.mrb[20].mxu0 }
 0x238   : > { %v5947_v40 = vadd.f32 %v4659_v0, %v4306_v18  ;;  %v4661_v5 = vpop.f32.mrb[21].mxu0 }
 0x239   : > { %v4662_v3 = vpop.f32.mrb[22].mxu0 }
 0x23a   : > { %v5950_v23 = vadd.f32 %v4662_v3, %v4309_v2  ;;  %v4664_v19 = vpop.f32.mrb[23].mxu0  ;;  %v7646_v38 = vadd.f32 %v5947_v40, %v4836_v9  ;;  %v7648_v10 = vpop.f32.mrb[96].mxu1 }
 0x23b   : > { %v4886_v17 = vpop.f32.mrb[97].mxu1 }
 0x23c   : > { %v7650_v15 = vadd.f32 %v5950_v23, %v4839_v24  ;;  %v7652_v56 = vpop.f32.mrb[98].mxu1 }
 0x23d   : > { %v4889_v6 = vpop.f32.mrb[99].mxu1 }
 0x23f   : > { %v4667_v48 = vpop.f32.mrb[24].mxu0 }
 0x240   : > { %v5953_v18 = vadd.f32 %v4667_v48, %v4314_v11  ;;  %v4669_v0 = vpop.f32.mrb[25].mxu0 }
 0x241   : > { %v4670_v2 = vpop.f32.mrb[26].mxu0 }
 0x242   : > { %v5956_v9 = vadd.f32 %v4670_v2, %v4317_v27  ;;  %v4672_v40 = vpop.f32.mrb[27].mxu0  ;;  %v7658_v5 = vadd.f32 %v5953_v18, %v4844_v44  ;;  %v7660_v3 = vpop.f32.mrb[100].mxu1 }
 0x243   : > { %v4894_v24 = vpop.f32.mrb[101].mxu1 }
 0x244   : > { %v7662_v23 = vadd.f32 %v5956_v9, %v4847_v55  ;;  %v7664_v19 = vpop.f32.mrb[102].mxu1 }
 0x245   : > { %v4897_v17 = vpop.f32.mrb[103].mxu1 }
 0x247   : > { %v4675_v6 = vpop.f32.mrb[28].mxu0 }
 0x248   : > { %v5959_v11 = vadd.f32 %v4675_v6, %v4322_v16  ;;  %v4677_v48 = vpop.f32.mrb[29].mxu0 }
 0x249   : > { %v4678_v27 = vpop.f32.mrb[30].mxu0 }
 0x24a   : > { %v5962_v44 = vadd.f32 %v4678_v27, %v4325_v63  ;;  %v4680_v18 = vpop.f32.mrb[31].mxu0  ;;  %v7670_v0 = vadd.f32 %v5959_v11, %v4852_v50  ;;  %v7672_v2 = vpop.f32.mrb[104].mxu1 }
 0x24b   : > { %v4902_v55 = vpop.f32.mrb[105].mxu1  ;;  %v4338_v18 = vadd.f32 %v7638_v32, %v7563_v45 }
 0x24c   : > { %v7674_v9 = vadd.f32 %v5962_v44, %v4855_v14  ;;  %v7676_v40 = vpop.f32.mrb[106].mxu1 }
 0x24d   : > { %v4905_v24 = vpop.f32.mrb[107].mxu1 }
 0x24f   : > { %v4683_v17 = vpop.f32.mrb[32].mxu0 }
 0x250   : > { %v5965_v16 = vadd.f32 %v4683_v17, %v4330_v36  ;;  %v4685_v6 = vpop.f32.mrb[33].mxu0  ;;  %v4341_v36 = vadd.f32 %v7638_v32, %v7567_v33 }
 0x251   : > { %v4686_v63 = vpop.f32.mrb[34].mxu0 }
 0x252   : > { %v5968_v50 = vadd.f32 %v4686_v63, %v4333_v37  ;;  %v4688_v11 = vpop.f32.mrb[35].mxu0  ;;  %v7683_v48 = vadd.f32 %v5965_v16, %v7625_v61  ;;  %v7685_v14 = vpop.f32.mrb[108].mxu1 }
 0x253   : > { %v4910_v27 = vpop.f32.mrb[109].mxu1  ;;  %v4346_v11 = vadd.f32 %v7638_v32, %v7575_v22 }
 0x254   : > { %v7688_v44 = vadd.f32 %v5968_v50, %v7627_v51  ;;  %v7690_v28 = vpop.f32.mrb[110].mxu1 }
 0x255   : > { %v4913_v26 = vpop.f32.mrb[111].mxu1 }
 0x257   : > { %v4691_v55 = vpop.f32.mrb[36].mxu0 }
 0x258   : > { %v5971_v24 = vadd.f32 %v4691_v55, %v4338_v18  ;;  %v4693_v17 = vpop.f32.mrb[37].mxu0  ;;  %v4349_v18 = vadd.f32 %v7638_v32, %v7578_v13 }
 0x259   : > { %v4694_v61 = vpop.f32.mrb[38].mxu0 }
 0x25a   : > { %v5974_v37 = vadd.f32 %v4694_v61, %v4341_v36  ;;  %v4696_v16 = vpop.f32.mrb[39].mxu0  ;;  %v7697_v6 = vadd.f32 %v5971_v24, %v7629_v30  ;;  %v7699_v51 = vpop.f32.mrb[112].mxu1 }
 0x25b   : > { %v4918_v63 = vpop.f32.mrb[113].mxu1  ;;  %v4354_v16 = vadd.f32 %v7638_v32, %v7584_v62 }
 0x25c   : > { %v7702_v50 = vadd.f32 %v5974_v37, %v7631_v47  ;;  %v7704_v45 = vpop.f32.mrb[114].mxu1 }
 0x25d   : > { %v4921_v33 = vpop.f32.mrb[115].mxu1 }
 0x25f   : > { %v4699_v27 = vpop.f32.mrb[40].mxu0 }
 0x260   : > { %v5977_v26 = vadd.f32 %v4699_v27, %v4346_v11  ;;  %v4701_v55 = vpop.f32.mrb[41].mxu0  ;;  %v4357_v11 = vadd.f32 %v7638_v32, %v7587_v41 }
 0x261   : > { %v4702_v30 = vpop.f32.mrb[42].mxu0 }
 0x262   : > { %v5980_v36 = vadd.f32 %v4702_v30, %v4349_v18  ;;  %v4704_v24 = vpop.f32.mrb[43].mxu0  ;;  %v7711_v17 = vadd.f32 %v5977_v26, %v7633_v12  ;;  %v7713_v47 = vpop.f32.mrb[116].mxu1 }
 0x263   : > { %v4926_v61 = vpop.f32.mrb[117].mxu1  ;;  %v4362_v24 = vadd.f32 %v7638_v32, %v7593_v43 }
 0x264   : > { %v7716_v37 = vadd.f32 %v5980_v36, %v7640_v4  ;;  %v7718_v22 = vpop.f32.mrb[118].mxu1 }
 0x265   : > { %v4929_v13 = vpop.f32.mrb[119].mxu1 }
 0x267   : > { %v4707_v63 = vpop.f32.mrb[44].mxu0 }
 0x268   : > { %v5983_v33 = vadd.f32 %v4707_v63, %v4354_v16  ;;  %v4709_v27 = vpop.f32.mrb[45].mxu0  ;;  %v4365_v16 = vadd.f32 %v7638_v32, %v7596_v54  ;;  %v4370_v54 = vadd.f32 %v7638_v32, %v7600_v31 }
 0x269   : > { %v4710_v12 = vpop.f32.mrb[46].mxu0 }
 0x26a   : > { %v5986_v18 = vadd.f32 %v4710_v12, %v4357_v11  ;;  %v4712_v26 = vpop.f32.mrb[47].mxu0  ;;  %v7725_v55 = vadd.f32 %v5983_v33, %v7648_v10  ;;  %v7727_v4 = vpop.f32.mrb[120].mxu1 }
 0x26b   : > { %v4934_v30 = vpop.f32.mrb[121].mxu1 }
 0x26c   : > { %v7730_v36 = vadd.f32 %v5986_v18, %v7652_v56  ;;  %v7732_v62 = vpop.f32.mrb[122].mxu1 }
 0x26d   : > { %v4937_v41 = vpop.f32.mrb[123].mxu1 }
 0x26f   : > { %v4715_v61 = vpop.f32.mrb[48].mxu0 }
 0x270   : > { %v5989_v13 = vadd.f32 %v4715_v61, %v4362_v24  ;;  %v4717_v63 = vpop.f32.mrb[49].mxu0 }
 0x271   : > { %v4718_v10 = vpop.f32.mrb[50].mxu0 }
 0x272   : > { %v5992_v11 = vadd.f32 %v4718_v10, %v4365_v16  ;;  %v4720_v33 = vpop.f32.mrb[51].mxu0  ;;  %v7739_v27 = vadd.f32 %v5989_v13, %v7660_v3  ;;  %v7741_v56 = vpop.f32.mrb[124].mxu1  ;;  %v4373_v3 = vadd.f32 %v7638_v32, %v7605_v58  ;;  %v4378_v58 = vadd.f32 %v7638_v32, %v7609_v8 }
 0x273   : > { %v7743_v12 = vpop.f32.mrb[125].mxu1 }
 0x274   : > { %v7746_v43 = vadd.f32 %v5992_v11, %v7664_v19  ;;  %v7748_v18 = vpop.f32.mrb[126].mxu1 }
 0x275   : > { %v7752_v26 = vpop.f32.mrb[127].mxu1 }
 0x277   : > { %v4723_v30 = vpop.f32.mrb[52].mxu0 }
 0x278   : > { %v5995_v24 = vadd.f32 %v4723_v30, %v4370_v54  ;;  %v4725_v41 = vpop.f32.mrb[53].mxu0 }
 0x279   : > { %v4726_v61 = vpop.f32.mrb[54].mxu0 }
 0x27a   : > { %v5998_v16 = vadd.f32 %v4726_v61, %v4373_v3  ;;  %v4728_v13 = vpop.f32.mrb[55].mxu0  ;;  %v7757_v19 = vadd.f32 %v5995_v24, %v7672_v2  ;;  %v7759_v63 = vpop.f32.mrb[128].mxu1  ;;  %v4381_v2 = vadd.f32 %v7638_v32, %v7611_v46 }
 0x27b   : > { %v7761_v10 = vpop.f32.mrb[129].mxu1 }
 0x27c   : > { %v7765_v31 = vadd.f32 %v5998_v16, %v7676_v40  ;;  %v7767_v11 = vpop.f32.mrb[130].mxu1  ;;  %v5126_v16 = vld [vmem:[%s7778_s14 + $0x70] sm:$0xff] }
 0x27d   : > { %v7771_v33 = vpop.f32.mrb[131].mxu1 }
 0x27f   : > { %v4731_v54 = vpop.f32.mrb[56].mxu0 }
 0x280   : > { %v6001_v30 = vadd.f32 %v4731_v54, %v4378_v58  ;;  %v4733_v3 = vpop.f32.mrb[57].mxu0 }
 0x281   : > { %v4734_v40 = vpop.f32.mrb[58].mxu0 }
 0x282   : > { %v6004_v24 = vadd.f32 %v4734_v40, %v4381_v2  ;;  %v4736_v41 = vpop.f32.mrb[59].mxu0  ;;  %v7782_v8 = vadd.f32 %v6001_v30, %v7685_v14  ;;  %v5868_v61 = vpop.f32.mrb[132].mxu1  ;;  %v5127_v2 = vld [vmem:[%s7778_s14 + $0x78] sm:$0xff]  ;;  %v4386_v14 = vadd.f32 %v7638_v32, %v7613_v1  ;;  %v4389_v40 = vadd.f32 %v7638_v32, %v7615_v49  ;;  %v5128_v49 = vld [vmem:[%s7778_s14 + $0x80] sm:$0xff] }
 0x283   : > { %v5014_v46 = vadd.f32 %v7646_v38, %v5868_v61  ;;  %v7786_v13 = vpop.f32.mrb[133].mxu1 }
 0x284   : > { %7966 = vst [vmem:[#allocation5_spill] sm:$0xff] %v7786_v13  ;;  %v7789_v58 = vadd.f32 %v6004_v24, %v7690_v28  ;;  %v5869_v54 = vpop.f32.mrb[134].mxu1 }
 0x285   : > { %v5162_v30 = vadd.f32 %v5126_v16, %v5014_v46  ;;  %v5017_v38 = vadd.f32 %v7650_v15, %v5869_v54  ;;  %v7800_v3 = vpop.f32.mrb[135].mxu1  ;;  %v5130_v46 = vld [vmem:[%s7778_s14 + $0x90] sm:$0xff] }
 0x286   : > { %7967 = vst [vmem:[#allocation6_spill] sm:$0xff] %v7800_v3 }
 0x287   : > { %v4739_v28 = vpop.f32.mrb[60].mxu0  ;;  %5198 = vst [vmem:[%s7794_s18 + $0x50] sm:$0xff] %v5162_v30  ;;  %v5163_v61 = vadd.f32 %v5127_v2, %v5017_v38  ;;  %v4394_v38 = vadd.f32 %v7638_v32, %v7617_v39 }
 0x288   : > { %v6007_v24 = vadd.f32 %v4739_v28, %v4386_v14  ;;  %v4741_v41 = vpop.f32.mrb[61].mxu0 }
 0x289   : > { %v4742_v13 = vpop.f32.mrb[62].mxu0  ;;  %5199 = vst [vmem:[%s7794_s18 + $0x58] sm:$0xff] %v5163_v61 }
 0x28a   : > { %v6010_v25 = vadd.f32 %v4742_v13, %v4389_v40  ;;  %v4744_v1 = vpop.f32.mrb[63].mxu0  ;;  %v7807_v16 = vadd.f32 %v6007_v24, %v7699_v51  ;;  %v5872_v15 = vpop.f32.mrb[136].mxu1  ;;  %v5131_v13 = vld [vmem:[%s7778_s14 + $0x98] sm:$0xff] }
 0x28b   : > { %v5030_v54 = vadd.f32 %v7670_v0, %v5872_v15  ;;  %v5021_v3 = vpop.f32.mrb[137].mxu1  ;;  %v5129_v0 = vld [vmem:[%s7778_s14 + $0x88] sm:$0xff] }
 0x28c   : > { %v7813_v14 = vadd.f32 %v6010_v25, %v7704_v45  ;;  %v5022_v2 = vadd.f32 %v7658_v5, %v5021_v3  ;;  %v5873_v30 = vpop.f32.mrb[138].mxu1  ;;  %v4397_v5 = vadd.f32 %v7638_v32, %v7619_v29 }
 0x28d   : > { %v5166_v51 = vadd.f32 %v5130_v46, %v5030_v54  ;;  %v5033_v28 = vadd.f32 %v7674_v9, %v5873_v30  ;;  %v5024_v40 = vpop.f32.mrb[139].mxu1  ;;  %v5134_v54 = vld [vmem:[%s7778_s14 + $0xb0] sm:$0xff] }
 0x28e   : > { %v5164_v41 = vadd.f32 %v5128_v49, %v5022_v2  ;;  %v5025_v25 = vadd.f32 %v7662_v23, %v5024_v40  ;;  %v5132_v2 = vld [vmem:[%s7778_s14 + $0xa0] sm:$0xff] }
 0x28f   : > { %v4747_v24 = vpop.f32.mrb[64].mxu0  ;;  %5202 = vst [vmem:[%s7794_s18 + $0x70] sm:$0xff] %v5166_v51  ;;  %v5167_v39 = vadd.f32 %v5131_v13, %v5033_v28  ;;  %v5135_v51 = vld [vmem:[%s7778_s14 + $0xb8] sm:$0xff] }
 0x290   : > { %v6013_v45 = vadd.f32 %v4747_v24, %v4394_v38  ;;  %v4749_v3 = vpop.f32.mrb[65].mxu0  ;;  %5200 = vst [vmem:[%s7794_s18 + $0x60] sm:$0xff] %v5164_v41  ;;  %v5165_v9 = vadd.f32 %v5129_v0, %v5025_v25 }
 0x291   : > { %v4750_v61 = vpop.f32.mrb[66].mxu0  ;;  %5203 = vst [vmem:[%s7794_s18 + $0x78] sm:$0xff] %v5167_v39 }
 0x292   : > { %v6016_v1 = vadd.f32 %v4750_v61, %v4397_v5  ;;  %v4752_v15 = vpop.f32.mrb[67].mxu0  ;;  %v7828_v46 = vadd.f32 %v6013_v45, %v7713_v47  ;;  %5201 = vst [vmem:[%s7794_s18 + $0x68] sm:$0xff] %v5165_v9  ;;  %v5876_v23 = vpop.f32.mrb[140].mxu1  ;;  %v4402_v47 = vadd.f32 %v7638_v32, %v7621_v21  ;;  %v5138_v9 = vld [vmem:[%s7778_s14 + $0xd0] sm:$0xff] }
 0x293   : > { %v5046_v29 = vadd.f32 %v7697_v6, %v5876_v23  ;;  %v5037_v49 = vpop.f32.mrb[141].mxu1  ;;  %v5133_v6 = vld [vmem:[%s7778_s14 + $0xa8] sm:$0xff]  ;;  %v5136_v15 = vld [vmem:[%s7778_s14 + $0xc0] sm:$0xff] }
 0x294   : > { %v7835_v30 = vadd.f32 %v6016_v1, %v7718_v22  ;;  %v5038_v13 = vadd.f32 %v7683_v48, %v5037_v49  ;;  %v5877_v38 = vpop.f32.mrb[142].mxu1  ;;  %v4405_v48 = vadd.f32 %v7638_v32, %v7623_v59  ;;  %v5139_v49 = vld [vmem:[%s7778_s14 + $0xd8] sm:$0xff] }
 0x295   : > { %v5170_v28 = vadd.f32 %v5134_v54, %v5046_v29  ;;  %v5049_v40 = vadd.f32 %v7702_v50, %v5877_v38  ;;  %v5040_v0 = vpop.f32.mrb[143].mxu1  ;;  %v5137_v38 = vld [vmem:[%s7778_s14 + $0xc8] sm:$0xff] }
 0x296   : > { %v5168_v41 = vadd.f32 %v5132_v2, %v5038_v13  ;;  %v5041_v22 = vadd.f32 %v7688_v44, %v5040_v0  ;;  %v5116_v0 = vld [vmem:[%s7778_s14 + $0x20] sm:$0xff] }
 0x297   : > { %v4755_v24 = vpop.f32.mrb[68].mxu0  ;;  %5206 = vst [vmem:[%s7794_s18 + $0x90] sm:$0xff] %v5170_v28  ;;  %v5171_v21 = vadd.f32 %v5135_v51, %v5049_v40 }
 0x298   : > { %v6019_v25 = vadd.f32 %v4755_v24, %v4402_v47  ;;  %v4757_v5 = vpop.f32.mrb[69].mxu0  ;;  %5204 = vst [vmem:[%s7794_s18 + $0x80] sm:$0xff] %v5168_v41  ;;  %v5169_v50 = vadd.f32 %v5133_v6, %v5041_v22  ;;  %v5117_v22 = vld [vmem:[%s7778_s14 + $0x28] sm:$0xff] }
 0x299   : > { %v4758_v45 = vpop.f32.mrb[70].mxu0  ;;  %5207 = vst [vmem:[%s7794_s18 + $0x98] sm:$0xff] %v5171_v21 }
 0x29a   : > { %v6022_v3 = vadd.f32 %v4758_v45, %v4405_v48  ;;  %v4760_v39 = vpop.f32.mrb[71].mxu0  ;;  %v7850_v61 = vadd.f32 %v6019_v25, %v7727_v4  ;;  %5205 = vst [vmem:[%s7794_s18 + $0x88] sm:$0xff] %v5169_v50  ;;  %v5880_v44 = vpop.f32.mrb[144].mxu1  ;;  %v4266_v4 = vadd.f32 %v7638_v32, %v7483_v57  ;;  %v5142_v48 = vld [vmem:[%s7778_s14 + $0xf0] sm:$0xff]  ;;  %v5140_v50 = vld [vmem:[%s7778_s14 + $0xe0] sm:$0xff] }
 0x29b   : > { %v5062_v59 = vadd.f32 %v7725_v55, %v5880_v44  ;;  %v5053_v1 = vpop.f32.mrb[145].mxu1  ;;  %v5143_v39 = vld [vmem:[%s7778_s14 + $0xf8] sm:$0xff]  ;;  %v4274_v44 = vadd.f32 %v7638_v32, %v7490_v20 }
 0x29c   : > { %v7857_v23 = vadd.f32 %v6022_v3, %v7732_v62  ;;  %v5054_v54 = vadd.f32 %v7711_v17, %v5053_v1  ;;  %v5881_v29 = vpop.f32.mrb[146].mxu1  ;;  %v4269_v17 = vadd.f32 %v7638_v32, %v7486_v34 }
 0x29d   : > { %v5174_v2 = vadd.f32 %v5138_v9, %v5062_v59  ;;  %v5065_v13 = vadd.f32 %v7730_v36, %v5881_v29  ;;  %v5056_v55 = vpop.f32.mrb[147].mxu1  ;;  %v4277_v29 = vadd.f32 %v7638_v32, %v7493_v7 }
 0x29e   : > { %v5172_v47 = vadd.f32 %v5136_v15, %v5054_v54  ;;  %v5057_v62 = vadd.f32 %v7716_v37, %v5056_v55 }
 0x29f   : > { %v4796_v51 = vpop.f32.mrb[0].mxu0  ;;  %5210 = vst [vmem:[%s7794_s18 + $0xb0] sm:$0xff] %v5174_v2  ;;  %v5175_v57 = vadd.f32 %v5139_v49, %v5065_v13  ;;  %v5118_v2 = vld [vmem:[%s7778_s14 + $0x30] sm:$0xff] }
 0x2a0   : > { %v5927_v28 = vadd.f32 %v4796_v51, %v4266_v4  ;;  %v4798_v40 = vpop.f32.mrb[1].mxu0  ;;  %5208 = vst [vmem:[%s7794_s18 + $0xa0] sm:$0xff] %v5172_v47  ;;  %v5173_v6 = vadd.f32 %v5137_v38, %v5057_v62  ;;  %v5119_v51 = vld [vmem:[%s7778_s14 + $0x38] sm:$0xff]  ;;  %v5146_v47 = vld [vmem:[%s7778_s14 + $0x110] sm:$0xff] }
 0x2a1   : > { %v4799_v36 = vpop.f32.mrb[2].mxu0  ;;  %5211 = vst [vmem:[%s7794_s18 + $0xb8] sm:$0xff] %v5175_v57  ;;  %v5144_v57 = vld [vmem:[%s7778_s14 + $0x100] sm:$0xff] }
 0x2a2   : > { %v4974_v24 = vadd.f32 %v5927_v28, %v7743_v12  ;;  %v5929_v41 = vadd.f32 %v4799_v36, %v4269_v17  ;;  %v4801_v37 = vpop.f32.mrb[3].mxu0  ;;  %5209 = vst [vmem:[%s7794_s18 + $0xa8] sm:$0xff] %v5173_v6  ;;  %v5884_v34 = vpop.f32.mrb[148].mxu1  ;;  %v5147_v36 = vld [vmem:[%s7778_s14 + $0x118] sm:$0xff]  ;;  %v4282_v6 = vadd.f32 %v7638_v32, %v7499_v60 }
 0x2a3   : > { %v5078_v21 = vadd.f32 %v7757_v19, %v5884_v34  ;;  %v5069_v45 = vpop.f32.mrb[149].mxu1  ;;  %v5141_v19 = vld [vmem:[%s7778_s14 + $0xe8] sm:$0xff] }
 0x2a4   : > { %v5152_v25 = vadd.f32 %v5116_v0, %v4974_v24  ;;  %v4977_v5 = vadd.f32 %v5929_v41, %v7752_v26  ;;  %v5070_v12 = vadd.f32 %v7739_v27, %v5069_v45  ;;  %v5885_v3 = vpop.f32.mrb[150].mxu1 }
 0x2a5   : > { %v5178_v59 = vadd.f32 %v5142_v48, %v5078_v21  ;;  %v5081_v26 = vadd.f32 %v7765_v31, %v5885_v3  ;;  %v5072_v1 = vpop.f32.mrb[151].mxu1  ;;  %v4285_v48 = vadd.f32 %v7638_v32, %v7503_v52  ;;  %v5120_v21 = vld [vmem:[%s7778_s14 + $0x40] sm:$0xff]  ;;  %v5121_v3 = vld [vmem:[%s7778_s14 + $0x48] sm:$0xff] }
 0x2a6   : > { %5188 = vst [vmem:[%s7794_s18] sm:$0xff] %v5152_v25  ;;  %v5153_v9 = vadd.f32 %v5117_v22, %v4977_v5  ;;  %v5176_v54 = vadd.f32 %v5140_v50, %v5070_v12  ;;  %v5073_v27 = vadd.f32 %v7746_v43, %v5072_v1  ;;  %v5148_v1 = vld [vmem:[%s7778_s14 + $0x120] sm:$0xff] }
 0x2a7   : > { %v4804_v15 = vpop.f32.mrb[4].mxu0  ;;  %5214 = vst [vmem:[%s7794_s18 + $0xd0] sm:$0xff] %v5178_v59  ;;  %v5179_v4 = vadd.f32 %v5143_v39, %v5081_v26  ;;  %v5150_v39 = vld [vmem:[%s7778_s14 + $0x130] sm:$0xff] }
 0x2a8   : > { %5189 = vst [vmem:[%s7794_s18 + $0x8] sm:$0xff] %v5153_v9  ;;  %v5931_v20 = vadd.f32 %v4804_v15, %v4274_v44  ;;  %v4806_v49 = vpop.f32.mrb[5].mxu0  ;;  %5212 = vst [vmem:[%s7794_s18 + $0xc0] sm:$0xff] %v5176_v54  ;;  %v5177_v13 = vadd.f32 %v5141_v19, %v5073_v27  ;;  %v5151_v15 = vld [vmem:[%s7778_s14 + $0x138] sm:$0xff]  ;;  %v4290_v54 = vadd.f32 %v7638_v32, %v7510_v35 }
 0x2a9   : > { %v4807_v31 = vpop.f32.mrb[6].mxu0  ;;  %5215 = vst [vmem:[%s7794_s18 + $0xd8] sm:$0xff] %v5179_v4 }
 0x2aa   : > { %v4982_v55 = vadd.f32 %v5931_v20, %v7741_v56  ;;  %v5933_v43 = vadd.f32 %v4807_v31, %v4277_v29  ;;  %v4809_v38 = vpop.f32.mrb[7].mxu0  ;;  %5213 = vst [vmem:[%s7794_s18 + $0xc8] sm:$0xff] %v5177_v13  ;;  %v5888_v7 = vpop.f32.mrb[152].mxu1 }
 0x2ab   : > { %v5094_v28 = vadd.f32 %v7807_v16, %v5888_v7  ;;  %v5085_v40 = vpop.f32.mrb[153].mxu1  ;;  %v5145_v16 = vld [vmem:[%s7778_s14 + $0x108] sm:$0xff]  ;;  %v5123_v7 = vld [vmem:[%s7778_s14 + $0x58] sm:$0xff] }
 0x2ac   : > { %v5154_v62 = vadd.f32 %v5118_v2, %v4982_v55  ;;  %v4985_v17 = vadd.f32 %v5933_v43, %v7748_v18  ;;  %v5086_v56 = vadd.f32 %v7782_v8, %v5085_v40  ;;  %v5889_v0 = vpop.f32.mrb[154].mxu1  ;;  %v4293_v2 = vadd.f32 %v7638_v32, %v7513_v53  ;;  %v5122_v55 = vld [vmem:[%s7778_s14 + $0x50] sm:$0xff] }
 0x2ad   : > { %v5182_v41 = vadd.f32 %v5146_v47, %v5094_v28  ;;  %v5097_v18 = vadd.f32 %v7813_v14, %v5889_v0  ;;  %v5088_v37 = vpop.f32.mrb[155].mxu1  ;;  %v7968_v40 = vld [vmem:[#allocation4_spill] sm:$0xff]  ;;  %v5124_v0 = vld [vmem:[%s7778_s14 + $0x60] sm:$0xff] }
 0x2ae   : > { %5190 = vst [vmem:[%s7794_s18 + $0x10] sm:$0xff] %v5154_v62  ;;  %v5155_v24 = vadd.f32 %v5119_v51, %v4985_v17  ;;  %v5180_v34 = vadd.f32 %v5144_v57, %v5086_v56  ;;  %v5089_v8 = vadd.f32 %v7789_v58, %v5088_v37  ;;  %v4298_v62 = vadd.f32 %v7638_v32, %v7520_v42  ;;  %v7970_v42 = vld [vmem:[#allocation6_spill] sm:$0xff] }
 0x2af   : > { %v4812_v22 = vpop.f32.mrb[8].mxu0  ;;  %5218 = vst [vmem:[%s7794_s18 + $0xf0] sm:$0xff] %v5182_v41  ;;  %v5183_v5 = vadd.f32 %v5147_v36, %v5097_v18  ;;  %v5125_v18 = vld [vmem:[%s7778_s14 + $0x68] sm:$0xff] }
 0x2b0   : > { %5191 = vst [vmem:[%s7794_s18 + $0x18] sm:$0xff] %v5155_v24  ;;  %v5935_v60 = vadd.f32 %v4812_v22, %v4282_v6  ;;  %v4814_v25 = vpop.f32.mrb[9].mxu0  ;;  %5216 = vst [vmem:[%s7794_s18 + $0xe0] sm:$0xff] %v5180_v34  ;;  %v5181_v45 = vadd.f32 %v5145_v16, %v5089_v8  ;;  %v7969_v6 = vld [vmem:[#allocation5_spill] sm:$0xff] }
 0x2b1   : > { %v4815_v14 = vpop.f32.mrb[10].mxu0  ;;  %5219 = vst [vmem:[%s7794_s18 + $0xf8] sm:$0xff] %v5183_v5 }
 0x2b2   : > { %v4990_v50 = vadd.f32 %v5935_v60, %v7761_v10  ;;  %v5937_v58 = vadd.f32 %v4815_v14, %v4285_v48  ;;  %v4817_v12 = vpop.f32.mrb[11].mxu0  ;;  %5217 = vst [vmem:[%s7794_s18 + $0xe8] sm:$0xff] %v5181_v45  ;;  %v5892_v52 = vpop.f32.mrb[156].mxu1 }
 0x2b3   : > { %v5110_v59 = vadd.f32 %v7850_v61, %v5892_v52  ;;  %v5101_v26 = vpop.f32.mrb[157].mxu1  ;;  %v5149_v61 = vld [vmem:[%s7778_s14 + $0x128] sm:$0xff] }
 0x2b4   : > { %v5156_v44 = vadd.f32 %v5120_v21, %v4990_v50  ;;  %v4993_v9 = vadd.f32 %v5937_v58, %v7771_v33  ;;  %v5102_v10 = vadd.f32 %v7828_v46, %v5101_v26  ;;  %v5893_v19 = vpop.f32.mrb[158].mxu1 }
 0x2b5   : > { %v5186_v29 = vadd.f32 %v5150_v39, %v5110_v59  ;;  %v5113_v33 = vadd.f32 %v7857_v23, %v5893_v19  ;;  %v5104_v20 = vpop.f32.mrb[159].mxu1 }
 0x2b6   : > { %5192 = vst [vmem:[%s7794_s18 + $0x20] sm:$0xff] %v5156_v44  ;;  %v5157_v27 = vadd.f32 %v5121_v3, %v4993_v9  ;;  %v5184_v4 = vadd.f32 %v5148_v1, %v5102_v10  ;;  %v5105_v46 = vadd.f32 %v7835_v30, %v5104_v20 }
 0x2b7   : > { %v4820_v49 = vpop.f32.mrb[12].mxu0  ;;  %5222 = vst [vmem:[%s7794_s18 + $0x110] sm:$0xff] %v5186_v29  ;;  %v5187_v13 = vadd.f32 %v5151_v15, %v5113_v33 }
 0x2b8   : > { %5193 = vst [vmem:[%s7794_s18 + $0x28] sm:$0xff] %v5157_v27  ;;  %v5939_v35 = vadd.f32 %v4820_v49, %v4290_v54  ;;  %v4822_v31 = vpop.f32.mrb[13].mxu0  ;;  %5220 = vst [vmem:[%s7794_s18 + $0x100] sm:$0xff] %v5184_v4  ;;  %v5185_v43 = vadd.f32 %v5149_v61, %v5105_v46 }
 0x2b9   : > { %v4823_v23 = vpop.f32.mrb[14].mxu0  ;;  %5223 = vst [vmem:[%s7794_s18 + $0x118] sm:$0xff] %v5187_v13 }
 0x2ba   : > { %v4998_v38 = vadd.f32 %v5939_v35, %v7759_v63  ;;  %v5941_v30 = vadd.f32 %v4823_v23, %v4293_v2  ;;  %v4825_v51 = vpop.f32.mrb[15].mxu0  ;;  %5221 = vst [vmem:[%s7794_s18 + $0x108] sm:$0xff] %v5185_v43  ;;  %v4301_v63 = vadd.f32 %v7638_v32, %v7968_v40 }
 0x2bc   : > { %v5158_v53 = vadd.f32 %v5122_v55, %v4998_v38  ;;  %v5001_v47 = vadd.f32 %v5941_v30, %v7767_v11 }
 0x2be   : > { %5194 = vst [vmem:[%s7794_s18 + $0x30] sm:$0xff] %v5158_v53  ;;  %v5159_v17 = vadd.f32 %v5123_v7, %v5001_v47 }
 0x2bf   : > { %v4828_v28 = vpop.f32.mrb[16].mxu0 }
 0x2c0   : > { %5195 = vst [vmem:[%s7794_s18 + $0x38] sm:$0xff] %v5159_v17  ;;  %v5943_v57 = vadd.f32 %v4828_v28, %v4298_v62  ;;  %v4830_v56 = vpop.f32.mrb[17].mxu0 }
 0x2c1   : > { %v4831_v36 = vpop.f32.mrb[18].mxu0 }
 0x2c2   : > { %v5006_v24 = vadd.f32 %v5943_v57, %v7969_v6  ;;  %v5945_v41 = vadd.f32 %v4831_v36, %v4301_v63  ;;  %v4833_v11 = vpop.f32.mrb[19].mxu0 }
 0x2c4   : > { %v5160_v37 = vadd.f32 %v5124_v0, %v5006_v24  ;;  %v5009_v16 = vadd.f32 %v5945_v41, %v7970_v42 }
 0x2c6   : > { %5196 = vst [vmem:[%s7794_s18 + $0x40] sm:$0xff] %v5160_v37  ;;  %v5161_v22 = vadd.f32 %v5125_v18, %v5009_v16 }
 0x2c8   : > { %5197 = vst [vmem:[%s7794_s18 + $0x48] sm:$0xff] %v5161_v22 }
 0x2c9 PF: > { %s17_s24 = sadd.s32 1, %s6395_s24  }
 0x2ca   : > { %p14_p4 = scmp.ge.s32.totalorder %s17_s24, 4  }
 0x2cc   :  { %16 = sbr.rel (!%p14_p4) target bundleno = 1 (0x1), region = 81 }

</bundles_post_ra>
